<compile_context>
chip_gen: v7x
topology: tpu7x:2x2x1
jax: 0.10.0
libtpu: 0.0.40
codegen_flags: <defaults>
</compile_context>

<pallas_src>
import numpy as np

import jax
import jax.numpy as jnp
from jax.experimental import pallas as pl
from jax.experimental.pallas import tpu as pltpu

BLOCK_B = 8  # images per grid step


# ----------------------------------------------------------------------------
# Fused LeNet kernel: BLOCK_B images per grid step, everything stays in VMEM.
# ----------------------------------------------------------------------------
def _lenet_kernel(x_ref,        # (BLOCK_B*32, 96)  [b*32+h, w*3+ic]
                  w1b_ref,      # (5, 96, 256)   conv1 banded weights (E|O cols)
                  b1_ref,       # (1, 128)
                  w2b_ref,      # (5, 128, 256)  conv2 banded weights (E|O cols)
                  b2_ref,       # (1, 128)
                  psel_ref,     # (5*BLOCK_B, 8*BLOCK_B)  flatten row selection
                  fw1_ref,      # (5, 128, 128)
                  fb1_ref,      # (1, 128)
                  fw2_ref,      # (128, 128)
                  fb2_ref,      # (1, 128)
                  fw3_ref,      # (128, 128)
                  fb3_ref,      # (1, 128)
                  o_ref,        # (BLOCK_B, 128)
                  h1_ref,       # (BLOCK_B*16 + 8, 128) scratch: pool1 output
                  p2_ref):      # (BLOCK_B*8, 128)      scratch: pool2 output
    f32 = jnp.float32

    # Garbage rows of h1 only ever feed garbage conv2 output rows, but keep
    # them finite (0 * garbage must not produce NaN in the selection matmul).
    h1_ref[...] = jnp.zeros_like(h1_ref)

    b1 = b1_ref[...]
    # ---- conv1 (5x5, 3->6) + ReLU + 2x2 maxpool: 2 images per chunk ---------
    # Each chunk's values die at the h1 store, so live ranges stay bounded.
    for g in range(BLOCK_B // 2):
        base = g * 64
        acc_e = jnp.zeros((30, 256), f32)   # even conv rows; lanes: [even|odd] cols
        acc_o = jnp.zeros((30, 256), f32)   # odd  conv rows
        for kh in range(5):
            w = w1b_ref[kh]                                            # (96, 256)
            acc_e += jnp.dot(x_ref[pl.ds(base + kh, 30, stride=2), :], w,
                             preferred_element_type=f32)
            acc_o += jnp.dot(x_ref[pl.ds(base + kh + 1, 30, stride=2), :], w,
                             preferred_element_type=f32)
        m = jnp.maximum(jnp.maximum(acc_e[:, :128], acc_e[:, 128:]),
                        jnp.maximum(acc_o[:, :128], acc_o[:, 128:]))
        # rows 0..13 -> image 2g, rows 16..29 -> image 2g+1 (14,15 garbage)
        h1_ref[pl.ds(g * 32, 30), :] = jnp.maximum(m + b1, 0.0)

    b2 = b2_ref[...]
    # ---- conv2 (5x5, 6->16) + ReLU + 2x2 maxpool: 4 images per chunk --------
    for c in range(BLOCK_B // 4):
        base = c * 64
        acc_e = jnp.zeros((32, 256), f32)
        acc_o = jnp.zeros((32, 256), f32)
        for kh in range(5):
            w = w2b_ref[kh]                                            # (128, 256)
            acc_e += jnp.dot(h1_ref[pl.ds(base + kh, 32, stride=2), :], w,
                             preferred_element_type=f32)
            acc_o += jnp.dot(h1_ref[pl.ds(base + kh + 1, 32, stride=2), :], w,
                             preferred_element_type=f32)
        m = jnp.maximum(jnp.maximum(acc_e[:, :128], acc_e[:, 128:]),
                        jnp.maximum(acc_o[:, :128], acc_o[:, 128:]))
        # row q*8+i (q = image in chunk, i<=4 valid) holds p2[b=4c+q, :, i, :]
        p2_ref[pl.ds(c * 32, 32), :] = jnp.maximum(m + b2, 0.0)

    # ---- flatten via selection matmul + fused MLP tail -----------------------
    # sel[i*BLOCK_B + b, :] = p2_ref[b*8 + i, :]   (no strided/masked stores)
    sel = jnp.dot(psel_ref[...], p2_ref[...], preferred_element_type=f32)
    z = jnp.zeros((BLOCK_B, 128), f32)
    for i in range(5):
        z += jnp.dot(sel[i * BLOCK_B:(i + 1) * BLOCK_B, :], fw1_ref[i],
                     preferred_element_type=f32)
    z = jnp.maximum(z + fb1_ref[...], 0.0)                              # fc1+relu
    z = jnp.maximum(jnp.dot(z, fw2_ref[...], preferred_element_type=f32)
                    + fb2_ref[...], 0.0)                                # fc2+relu
    z = jnp.dot(z, fw3_ref[...], preferred_element_type=f32) + fb3_ref[...]
    o_ref[...] = z.astype(o_ref.dtype)                                  # (8, 128)


# ----------------------------------------------------------------------------
# Wrapper: single pallas_call, batch-parallel grid of BLOCK_B-image steps.
# ----------------------------------------------------------------------------
def lenet_forward(x_nchw, params):
    B = x_nchw.shape[0]
    Bp = ((B + BLOCK_B - 1) // BLOCK_B) * BLOCK_B
    x = jnp.transpose(x_nchw, (0, 2, 3, 1)).astype(jnp.float32)   # NCHW -> NHWC
    if Bp != B:
        x = jnp.pad(x, ((0, Bp - B), (0, 0), (0, 0), (0, 0)))
    x = x.reshape(Bp * 32, 32 * 3)           # lane-dense: [b*32+h, w*3+ic]

    f32 = jnp.float32

    def const_spec(shape):
        return pl.BlockSpec(shape, lambda g: (0,) * len(shape))

    out = pl.pallas_call(
        _lenet_kernel,
        out_shape=jax.ShapeDtypeStruct((Bp, 128), f32),
        grid=(Bp // BLOCK_B,),
        in_specs=[
            pl.BlockSpec((BLOCK_B * 32, 96), lambda g: (g, 0)),    # x block
            const_spec((5, 96, 256)),        # conv1 banded weights
            const_spec((1, 128)),            # conv1 bias row
            const_spec((5, 128, 256)),       # conv2 banded weights
            const_spec((1, 128)),            # conv2 bias row
            const_spec((5 * BLOCK_B, 8 * BLOCK_B)),   # flatten selection
            const_spec((5, 128, 128)),       # fc1 (split per pooled row i)
            const_spec((1, 128)),
            const_spec((128, 128)),          # fc2
            const_spec((1, 128)),
            const_spec((128, 128)),          # fc3
            const_spec((1, 128)),
        ],
        out_specs=pl.BlockSpec((BLOCK_B, 128), lambda g: (g, 0)),
        scratch_shapes=[
            pltpu.VMEM((BLOCK_B * 16 + 8, 128), f32),   # pool1 output slab
            pltpu.VMEM((BLOCK_B * 8, 128), f32),        # pool2 output slab
        ],
        compiler_params=pltpu.CompilerParams(
            dimension_semantics=("parallel",)),
    )(x, params['w1b'], params['b1'], params['w2b'], params['b2'],
      params['psel'], params['fw1'], params['fb1'], params['fw2'],
      params['fb2'], params['fw3'], params['fb3'])

    return out[:B, :10]


# ----------------------------------------------------------------------------
# Parameter packing: PyTorch-shaped weights -> banded / lane-padded layouts.
# ----------------------------------------------------------------------------
def pack_params(conv1_w, conv1_b, conv2_w, conv2_b,
                fc1_w, fc1_b, fc2_w, fc2_b, fc3_w, fc3_b):
    conv1_w = np.asarray(conv1_w, np.float32)   # (6, 3, 5, 5)  (oc, ic, kh, kw)
    conv2_w = np.asarray(conv2_w, np.float32)   # (16, 6, 5, 5)
    fc1_w = np.asarray(fc1_w, np.float32)       # (120, 400)
    fc2_w = np.asarray(fc2_w, np.float32)       # (84, 120)
    fc3_w = np.asarray(fc3_w, np.float32)       # (10, 84)

    # conv1 banded weights: one (96, 256) slab per kh.
    #   rows:  w_in*3 + ic          (lane layout of the input slab)
    #   cols:  par*128 + j*6 + oc   with output column c = 2*j + par
    w1b = np.zeros((5, 96, 2, 14, 6), np.float32)
    for kh in range(5):
        for kw in range(5):
            for j in range(14):
                for par in range(2):
                    w_in = 2 * j + par + kw
                    w1b[kh, w_in * 3:w_in * 3 + 3, par, j, :] = \
                        conv1_w[:, :, kh, kw].T          # (ic, oc)
    w1b_p = np.zeros((5, 96, 256), np.float32)
    w1b_p[:, :, :84] = w1b[:, :, 0].reshape(5, 96, 84)
    w1b_p[:, :, 128:212] = w1b[:, :, 1].reshape(5, 96, 84)
    b1 = np.zeros((1, 128), np.float32)
    b1[0, :84] = np.tile(np.asarray(conv1_b, np.float32), 14)

    # conv2 banded weights over the pooled h1 layout [i, j*6+ch].
    w2b = np.zeros((5, 128, 2, 5, 16), np.float32)
    for kh in range(5):
        for kw in range(5):
            for j in range(5):
                for par in range(2):
                    w_in = 2 * j + par + kw              # h1 column, <= 13
                    w2b[kh, w_in * 6:w_in * 6 + 6, par, j, :] = \
                        conv2_w[:, :, kh, kw].T          # (ch, oc)
    w2b_p = np.zeros((5, 128, 256), np.float32)
    w2b_p[:, :, :80] = w2b[:, :, 0].reshape(5, 128, 80)
    w2b_p[:, :, 128:208] = w2b[:, :, 1].reshape(5, 128, 80)
    b2 = np.zeros((1, 128), np.float32)
    b2[0, :80] = np.tile(np.asarray(conv2_b, np.float32), 5)

    # flatten row selection: sel[i*BLOCK_B + b] = p2_rows[b*8 + i]
    psel = np.zeros((5 * BLOCK_B, 8 * BLOCK_B), np.float32)
    for i in range(5):
        for b in range(BLOCK_B):
            psel[i * BLOCK_B + b, b * 8 + i] = 1.0

    # fc1 split per pooled row i; rows use the p2 lane layout j*16+oc and map
    # to torch's (c, h, w) flatten order oc*25 + i*5 + j.
    fw1 = np.zeros((5, 128, 128), np.float32)
    for i in range(5):
        for j in range(5):
            for oc in range(16):
                fw1[i, j * 16 + oc, :120] = fc1_w[:, oc * 25 + i * 5 + j]
    fb1 = np.zeros((1, 128), np.float32)
    fb1[0, :120] = np.asarray(fc1_b, np.float32)

    fw2 = np.zeros((128, 128), np.float32)
    fw2[:120, :84] = fc2_w.T
    fb2 = np.zeros((1, 128), np.float32)
    fb2[0, :84] = np.asarray(fc2_b, np.float32)

    fw3 = np.zeros((128, 128), np.float32)
    fw3[:84, :10] = fc3_w.T
    fb3 = np.zeros((1, 128), np.float32)
    fb3[0, :10] = np.asarray(fc3_b, np.float32)

    return dict(
        w1b=jnp.asarray(w1b_p), b1=jnp.asarray(b1),
        w2b=jnp.asarray(w2b_p), b2=jnp.asarray(b2),
        psel=jnp.asarray(psel),
        fw1=jnp.asarray(fw1), fb1=jnp.asarray(fb1),
        fw2=jnp.asarray(fw2), fb2=jnp.asarray(fb2),
        fw3=jnp.asarray(fw3), fb3=jnp.asarray(fb3),
    )


def init_params(key):
    def uni(k, shape, fan_in):
        bound = 1.0 / float(np.sqrt(fan_in))
        return jax.random.uniform(k, shape, jnp.float32, -bound, bound)

    ks = jax.random.split(key, 10)
    conv1_w = uni(ks[0], (6, 3, 5, 5), 3 * 5 * 5)
    conv1_b = uni(ks[1], (6,), 3 * 5 * 5)
    conv2_w = uni(ks[2], (16, 6, 5, 5), 6 * 5 * 5)
    conv2_b = uni(ks[3], (16,), 6 * 5 * 5)
    fc1_w = uni(ks[4], (120, 400), 400)
    fc1_b = uni(ks[5], (120,), 400)
    fc2_w = uni(ks[6], (84, 120), 120)
    fc2_b = uni(ks[7], (84,), 120)
    fc3_w = uni(ks[8], (10, 84), 84)
    fc3_b = uni(ks[9], (10,), 84)
    return pack_params(conv1_w, conv1_b, conv2_w, conv2_b,
                       fc1_w, fc1_b, fc2_w, fc2_b, fc3_w, fc3_b)


if __name__ == "__main__":
    key = jax.random.PRNGKey(0)
    k_x, k_p = jax.random.split(key)
    # 32x32 spatial input is required by the module (fc1 expects 16*5*5 = 400
    # features).  Batch 16 -> two parallel grid steps of 8 images each.
    x = jax.random.normal(k_x, (16, 3, 32, 32), dtype=jnp.float32)
    params = init_params(k_p)

    out = jax.jit(lenet_forward)(x, params)
    out = jax.block_until_ready(out)
    assert out.shape == (16, 10), out.shape
    print("KERNEL_OK")
</pallas_src>

<mosaic_0001>
module attributes {stable_mosaic.version = 11 : i64} {
  func.func @_lenet_kernel(%arg0: i32, %arg1: memref<256x96xf32, #tpu.memory_space<vmem>>, %arg2: memref<5x96x256xf32, #tpu.memory_space<vmem>>, %arg3: memref<1x128xf32, #tpu.memory_space<vmem>>, %arg4: memref<5x128x256xf32, #tpu.memory_space<vmem>>, %arg5: memref<1x128xf32, #tpu.memory_space<vmem>>, %arg6: memref<40x64xf32, #tpu.memory_space<vmem>>, %arg7: memref<5x128x128xf32, #tpu.memory_space<vmem>>, %arg8: memref<1x128xf32, #tpu.memory_space<vmem>>, %arg9: memref<128x128xf32, #tpu.memory_space<vmem>>, %arg10: memref<1x128xf32, #tpu.memory_space<vmem>>, %arg11: memref<128x128xf32, #tpu.memory_space<vmem>>, %arg12: memref<1x128xf32, #tpu.memory_space<vmem>>, %arg13: memref<8x128xf32, #tpu.memory_space<vmem>>, %arg14: memref<136x128xf32, #tpu.memory_space<vmem>>, %arg15: memref<64x128xf32, #tpu.memory_space<vmem>>) attributes {dimension_semantics = [#tpu.dimension_semantics<parallel>], iteration_bounds = array<i64: 2>, scalar_prefetch = 0 : i64, scratch_operands = 2 : i64, tpu.core_type = #tpu.core_type<tc>, window_params = [{transform_indices = @transform_0, window_bounds = array<i64: 256, 96>}, {pipeline_mode = #tpu.pipeline_mode<synchronous>, transform_indices = @transform_1, window_bounds = array<i64: 5, 96, 256>}, {pipeline_mode = #tpu.pipeline_mode<synchronous>, transform_indices = @transform_2, window_bounds = array<i64: 1, 128>}, {pipeline_mode = #tpu.pipeline_mode<synchronous>, transform_indices = @transform_3, window_bounds = array<i64: 5, 128, 256>}, {pipeline_mode = #tpu.pipeline_mode<synchronous>, transform_indices = @transform_4, window_bounds = array<i64: 1, 128>}, {pipeline_mode = #tpu.pipeline_mode<synchronous>, transform_indices = @transform_5, window_bounds = array<i64: 40, 64>}, {pipeline_mode = #tpu.pipeline_mode<synchronous>, transform_indices = @transform_6, window_bounds = array<i64: 5, 128, 128>}, {pipeline_mode = #tpu.pipeline_mode<synchronous>, transform_indices = @transform_7, window_bounds = array<i64: 1, 128>}, {pipeline_mode = #tpu.pipeline_mode<synchronous>, transform_indices = @transform_8, window_bounds = array<i64: 128, 128>}, {pipeline_mode = #tpu.pipeline_mode<synchronous>, transform_indices = @transform_9, window_bounds = array<i64: 1, 128>}, {pipeline_mode = #tpu.pipeline_mode<synchronous>, transform_indices = @transform_10, window_bounds = array<i64: 128, 128>}, {pipeline_mode = #tpu.pipeline_mode<synchronous>, transform_indices = @transform_11, window_bounds = array<i64: 1, 128>}, {transform_indices = @transform_12, window_bounds = array<i64: 8, 128>}]} {
    %cst = arith.constant 0.000000e+00 : f32
    %0 = vector.broadcast %cst : f32 to vector<136x128xf32>
    %c0 = arith.constant 0 : index
    %c0_0 = arith.constant 0 : index
    %1 = vector.load %arg14[%c0, %c0_0] : memref<136x128xf32, #tpu.memory_space<vmem>>, vector<136x128xf32>
    tpu.vector_store %arg14[%c0, %c0_0], %0 {strides = array<i32>} : memref<136x128xf32, #tpu.memory_space<vmem>>, vector<136x128xf32>,
    %c0_1 = arith.constant 0 : index
    %c0_2 = arith.constant 0 : index
    %2 = vector.load %arg3[%c0_1, %c0_2] : memref<1x128xf32, #tpu.memory_space<vmem>>, vector<1x128xf32>
    %cst_3 = arith.constant 0.000000e+00 : f32
    %3 = vector.broadcast %cst_3 : f32 to vector<30x256xf32>
    %cst_4 = arith.constant 0.000000e+00 : f32
    %4 = vector.broadcast %cst_4 : f32 to vector<30x256xf32>
    %c0_5 = arith.constant 0 : index
    %c0_6 = arith.constant 0 : index
    %c0_7 = arith.constant 0 : index
    %5 = vector.load %arg2[%c0_5, %c0_6, %c0_7] : memref<5x96x256xf32, #tpu.memory_space<vmem>>, vector<1x96x256xf32>
    %6 = vector.shape_cast %5 : vector<1x96x256xf32> to vector<96x256xf32>
    %c0_8 = arith.constant 0 : index
    %c0_9 = arith.constant 0 : index
    %7 = tpu.strided_load %arg1[%c0_8, %c0_9] {strides = array<i32: 2, 1>} : memref<256x96xf32, #tpu.memory_space<vmem>>, vector<30x96xf32>
    %cst_10 = arith.constant dense<0.000000e+00> : vector<30x256xf32>
    %8 = tpu.matmul %7, %6, %cst_10 {dimension_numbers = #tpu.dot_dimension_numbers<[1], [0], [0], [1], [0, 0, 1, 1], [], []>} : vector<30x96xf32>, vector<96x256xf32>, vector<30x256xf32> -> vector<30x256xf32>
    %9 = arith.addf %3, %8 : vector<30x256xf32>
    %c1 = arith.constant 1 : index
    %c0_11 = arith.constant 0 : index
    %10 = tpu.strided_load %arg1[%c1, %c0_11] {strides = array<i32: 2, 1>} : memref<256x96xf32, #tpu.memory_space<vmem>>, vector<30x96xf32>
    %cst_12 = arith.constant dense<0.000000e+00> : vector<30x256xf32>
    %11 = tpu.matmul %10, %6, %cst_12 {dimension_numbers = #tpu.dot_dimension_numbers<[1], [0], [0], [1], [0, 0, 1, 1], [], []>} : vector<30x96xf32>, vector<96x256xf32>, vector<30x256xf32> -> vector<30x256xf32>
    %12 = arith.addf %4, %11 : vector<30x256xf32>
    %c1_13 = arith.constant 1 : index
    %c0_14 = arith.constant 0 : index
    %c0_15 = arith.constant 0 : index
    %13 = vector.load %arg2[%c1_13, %c0_14, %c0_15] : memref<5x96x256xf32, #tpu.memory_space<vmem>>, vector<1x96x256xf32>
    %14 = vector.shape_cast %13 : vector<1x96x256xf32> to vector<96x256xf32>
    %c1_16 = arith.constant 1 : index
    %c0_17 = arith.constant 0 : index
    %15 = tpu.strided_load %arg1[%c1_16, %c0_17] {strides = array<i32: 2, 1>} : memref<256x96xf32, #tpu.memory_space<vmem>>, vector<30x96xf32>
    %cst_18 = arith.constant dense<0.000000e+00> : vector<30x256xf32>
    %16 = tpu.matmul %15, %14, %cst_18 {dimension_numbers = #tpu.dot_dimension_numbers<[1], [0], [0], [1], [0, 0, 1, 1], [], []>} : vector<30x96xf32>, vector<96x256xf32>, vector<30x256xf32> -> vector<30x256xf32>
    %17 = arith.addf %9, %16 : vector<30x256xf32>
    %c2 = arith.constant 2 : index
    %c0_19 = arith.constant 0 : index
    %18 = tpu.strided_load %arg1[%c2, %c0_19] {strides = array<i32: 2, 1>} : memref<256x96xf32, #tpu.memory_space<vmem>>, vector<30x96xf32>
    %cst_20 = arith.constant dense<0.000000e+00> : vector<30x256xf32>
    %19 = tpu.matmul %18, %14, %cst_20 {dimension_numbers = #tpu.dot_dimension_numbers<[1], [0], [0], [1], [0, 0, 1, 1], [], []>} : vector<30x96xf32>, vector<96x256xf32>, vector<30x256xf32> -> vector<30x256xf32>
    %20 = arith.addf %12, %19 : vector<30x256xf32>
    %c2_21 = arith.constant 2 : index
    %c0_22 = arith.constant 0 : index
    %c0_23 = arith.constant 0 : index
    %21 = vector.load %arg2[%c2_21, %c0_22, %c0_23] : memref<5x96x256xf32, #tpu.memory_space<vmem>>, vector<1x96x256xf32>
    %22 = vector.shape_cast %21 : vector<1x96x256xf32> to vector<96x256xf32>
    %c2_24 = arith.constant 2 : index
    %c0_25 = arith.constant 0 : index
    %23 = tpu.strided_load %arg1[%c2_24, %c0_25] {strides = array<i32: 2, 1>} : memref<256x96xf32, #tpu.memory_space<vmem>>, vector<30x96xf32>
    %cst_26 = arith.constant dense<0.000000e+00> : vector<30x256xf32>
    %24 = tpu.matmul %23, %22, %cst_26 {dimension_numbers = #tpu.dot_dimension_numbers<[1], [0], [0], [1], [0, 0, 1, 1], [], []>} : vector<30x96xf32>, vector<96x256xf32>, vector<30x256xf32> -> vector<30x256xf32>
    %25 = arith.addf %17, %24 : vector<30x256xf32>
    %c3 = arith.constant 3 : index
    %c0_27 = arith.constant 0 : index
    %26 = tpu.strided_load %arg1[%c3, %c0_27] {strides = array<i32: 2, 1>} : memref<256x96xf32, #tpu.memory_space<vmem>>, vector<30x96xf32>
    %cst_28 = arith.constant dense<0.000000e+00> : vector<30x256xf32>
    %27 = tpu.matmul %26, %22, %cst_28 {dimension_numbers = #tpu.dot_dimension_numbers<[1], [0], [0], [1], [0, 0, 1, 1], [], []>} : vector<30x96xf32>, vector<96x256xf32>, vector<30x256xf32> -> vector<30x256xf32>
    %28 = arith.addf %20, %27 : vector<30x256xf32>
    %c3_29 = arith.constant 3 : index
    %c0_30 = arith.constant 0 : index
    %c0_31 = arith.constant 0 : index
    %29 = vector.load %arg2[%c3_29, %c0_30, %c0_31] : memref<5x96x256xf32, #tpu.memory_space<vmem>>, vector<1x96x256xf32>
    %30 = vector.shape_cast %29 : vector<1x96x256xf32> to vector<96x256xf32>
    %c3_32 = arith.constant 3 : index
    %c0_33 = arith.constant 0 : index
    %31 = tpu.strided_load %arg1[%c3_32, %c0_33] {strides = array<i32: 2, 1>} : memref<256x96xf32, #tpu.memory_space<vmem>>, vector<30x96xf32>
    %cst_34 = arith.constant dense<0.000000e+00> : vector<30x256xf32>
    %32 = tpu.matmul %31, %30, %cst_34 {dimension_numbers = #tpu.dot_dimension_numbers<[1], [0], [0], [1], [0, 0, 1, 1], [], []>} : vector<30x96xf32>, vector<96x256xf32>, vector<30x256xf32> -> vector<30x256xf32>
    %33 = arith.addf %25, %32 : vector<30x256xf32>
    %c4 = arith.constant 4 : index
    %c0_35 = arith.constant 0 : index
    %34 = tpu.strided_load %arg1[%c4, %c0_35] {strides = array<i32: 2, 1>} : memref<256x96xf32, #tpu.memory_space<vmem>>, vector<30x96xf32>
    %cst_36 = arith.constant dense<0.000000e+00> : vector<30x256xf32>
    %35 = tpu.matmul %34, %30, %cst_36 {dimension_numbers = #tpu.dot_dimension_numbers<[1], [0], [0], [1], [0, 0, 1, 1], [], []>} : vector<30x96xf32>, vector<96x256xf32>, vector<30x256xf32> -> vector<30x256xf32>
    %36 = arith.addf %28, %35 : vector<30x256xf32>
    %c4_37 = arith.constant 4 : index
    %c0_38 = arith.constant 0 : index
    %c0_39 = arith.constant 0 : index
    %37 = vector.load %arg2[%c4_37, %c0_38, %c0_39] : memref<5x96x256xf32, #tpu.memory_space<vmem>>, vector<1x96x256xf32>
    %38 = vector.shape_cast %37 : vector<1x96x256xf32> to vector<96x256xf32>
    %c4_40 = arith.constant 4 : index
    %c0_41 = arith.constant 0 : index
    %39 = tpu.strided_load %arg1[%c4_40, %c0_41] {strides = array<i32: 2, 1>} : memref<256x96xf32, #tpu.memory_space<vmem>>, vector<30x96xf32>
    %cst_42 = arith.constant dense<0.000000e+00> : vector<30x256xf32>
    %40 = tpu.matmul %39, %38, %cst_42 {dimension_numbers = #tpu.dot_dimension_numbers<[1], [0], [0], [1], [0, 0, 1, 1], [], []>} : vector<30x96xf32>, vector<96x256xf32>, vector<30x256xf32> -> vector<30x256xf32>
    %41 = arith.addf %33, %40 : vector<30x256xf32>
    %c5 = arith.constant 5 : index
    %c0_43 = arith.constant 0 : index
    %42 = tpu.strided_load %arg1[%c5, %c0_43] {strides = array<i32: 2, 1>} : memref<256x96xf32, #tpu.memory_space<vmem>>, vector<30x96xf32>
    %cst_44 = arith.constant dense<0.000000e+00> : vector<30x256xf32>
    %43 = tpu.matmul %42, %38, %cst_44 {dimension_numbers = #tpu.dot_dimension_numbers<[1], [0], [0], [1], [0, 0, 1, 1], [], []>} : vector<30x96xf32>, vector<96x256xf32>, vector<30x256xf32> -> vector<30x256xf32>
    %44 = arith.addf %36, %43 : vector<30x256xf32>
    %45 = vector.extract_strided_slice %41 {offsets = [0, 0], sizes = [30, 128], strides = [1, 1]} : vector<30x256xf32> to vector<30x128xf32>
    %46 = vector.extract_strided_slice %41 {offsets = [0, 128], sizes = [30, 128], strides = [1, 1]} : vector<30x256xf32> to vector<30x128xf32>
    %47 = arith.maximumf %45, %46 : vector<30x128xf32>
    %48 = vector.extract_strided_slice %44 {offsets = [0, 0], sizes = [30, 128], strides = [1, 1]} : vector<30x256xf32> to vector<30x128xf32>
    %49 = vector.extract_strided_slice %44 {offsets = [0, 128], sizes = [30, 128], strides = [1, 1]} : vector<30x256xf32> to vector<30x128xf32>
    %50 = arith.maximumf %48, %49 : vector<30x128xf32>
    %51 = arith.maximumf %47, %50 : vector<30x128xf32>
    %52 = vector.broadcast %2 : vector<1x128xf32> to vector<30x128xf32>
    %53 = arith.addf %51, %52 : vector<30x128xf32>
    %cst_45 = arith.constant 0.000000e+00 : f32
    %54 = vector.broadcast %cst_45 : f32 to vector<30x128xf32>
    %55 = arith.maximumf %53, %54 : vector<30x128xf32>
    %c0_46 = arith.constant 0 : index
    %c0_47 = arith.constant 0 : index
    %56 = vector.load %arg14[%c0_46, %c0_47] : memref<136x128xf32, #tpu.memory_space<vmem>>, vector<30x128xf32>
    tpu.vector_store %arg14[%c0_46, %c0_47], %55 {strides = array<i32>} : memref<136x128xf32, #tpu.memory_space<vmem>>, vector<30x128xf32>,
    %cst_48 = arith.constant 0.000000e+00 : f32
    %57 = vector.broadcast %cst_48 : f32 to vector<30x256xf32>
    %cst_49 = arith.constant 0.000000e+00 : f32
    %58 = vector.broadcast %cst_49 : f32 to vector<30x256xf32>
    %c0_50 = arith.constant 0 : index
    %c0_51 = arith.constant 0 : index
    %c0_52 = arith.constant 0 : index
    %59 = vector.load %arg2[%c0_50, %c0_51, %c0_52] : memref<5x96x256xf32, #tpu.memory_space<vmem>>, vector<1x96x256xf32>
    %60 = vector.shape_cast %59 : vector<1x96x256xf32> to vector<96x256xf32>
    %c64 = arith.constant 64 : index
    %c0_53 = arith.constant 0 : index
    %61 = tpu.strided_load %arg1[%c64, %c0_53] {strides = array<i32: 2, 1>} : memref<256x96xf32, #tpu.memory_space<vmem>>, vector<30x96xf32>
    %cst_54 = arith.constant dense<0.000000e+00> : vector<30x256xf32>
    %62 = tpu.matmul %61, %60, %cst_54 {dimension_numbers = #tpu.dot_dimension_numbers<[1], [0], [0], [1], [0, 0, 1, 1], [], []>} : vector<30x96xf32>, vector<96x256xf32>, vector<30x256xf32> -> vector<30x256xf32>
    %63 = arith.addf %57, %62 : vector<30x256xf32>
    %c65 = arith.constant 65 : index
    %c0_55 = arith.constant 0 : index
    %64 = tpu.strided_load %arg1[%c65, %c0_55] {strides = array<i32: 2, 1>} : memref<256x96xf32, #tpu.memory_space<vmem>>, vector<30x96xf32>
    %cst_56 = arith.constant dense<0.000000e+00> : vector<30x256xf32>
    %65 = tpu.matmul %64, %60, %cst_56 {dimension_numbers = #tpu.dot_dimension_numbers<[1], [0], [0], [1], [0, 0, 1, 1], [], []>} : vector<30x96xf32>, vector<96x256xf32>, vector<30x256xf32> -> vector<30x256xf32>
    %66 = arith.addf %58, %65 : vector<30x256xf32>
    %c1_57 = arith.constant 1 : index
    %c0_58 = arith.constant 0 : index
    %c0_59 = arith.constant 0 : index
    %67 = vector.load %arg2[%c1_57, %c0_58, %c0_59] : memref<5x96x256xf32, #tpu.memory_space<vmem>>, vector<1x96x256xf32>
    %68 = vector.shape_cast %67 : vector<1x96x256xf32> to vector<96x256xf32>
    %c65_60 = arith.constant 65 : index
    %c0_61 = arith.constant 0 : index
    %69 = tpu.strided_load %arg1[%c65_60, %c0_61] {strides = array<i32: 2, 1>} : memref<256x96xf32, #tpu.memory_space<vmem>>, vector<30x96xf32>
    %cst_62 = arith.constant dense<0.000000e+00> : vector<30x256xf32>
    %70 = tpu.matmul %69, %68, %cst_62 {dimension_numbers = #tpu.dot_dimension_numbers<[1], [0], [0], [1], [0, 0, 1, 1], [], []>} : vector<30x96xf32>, vector<96x256xf32>, vector<30x256xf32> -> vector<30x256xf32>
    %71 = arith.addf %63, %70 : vector<30x256xf32>
    %c66 = arith.constant 66 : index
    %c0_63 = arith.constant 0 : index
    %72 = tpu.strided_load %arg1[%c66, %c0_63] {strides = array<i32: 2, 1>} : memref<256x96xf32, #tpu.memory_space<vmem>>, vector<30x96xf32>
    %cst_64 = arith.constant dense<0.000000e+00> : vector<30x256xf32>
    %73 = tpu.matmul %72, %68, %cst_64 {dimension_numbers = #tpu.dot_dimension_numbers<[1], [0], [0], [1], [0, 0, 1, 1], [], []>} : vector<30x96xf32>, vector<96x256xf32>, vector<30x256xf32> -> vector<30x256xf32>
    %74 = arith.addf %66, %73 : vector<30x256xf32>
    %c2_65 = arith.constant 2 : index
    %c0_66 = arith.constant 0 : index
    %c0_67 = arith.constant 0 : index
    %75 = vector.load %arg2[%c2_65, %c0_66, %c0_67] : memref<5x96x256xf32, #tpu.memory_space<vmem>>, vector<1x96x256xf32>
    %76 = vector.shape_cast %75 : vector<1x96x256xf32> to vector<96x256xf32>
    %c66_68 = arith.constant 66 : index
    %c0_69 = arith.constant 0 : index
    %77 = tpu.strided_load %arg1[%c66_68, %c0_69] {strides = array<i32: 2, 1>} : memref<256x96xf32, #tpu.memory_space<vmem>>, vector<30x96xf32>
    %cst_70 = arith.constant dense<0.000000e+00> : vector<30x256xf32>
    %78 = tpu.matmul %77, %76, %cst_70 {dimension_numbers = #tpu.dot_dimension_numbers<[1], [0], [0], [1], [0, 0, 1, 1], [], []>} : vector<30x96xf32>, vector<96x256xf32>, vector<30x256xf32> -> vector<30x256xf32>
    %79 = arith.addf %71, %78 : vector<30x256xf32>
    %c67 = arith.constant 67 : index
    %c0_71 = arith.constant 0 : index
    %80 = tpu.strided_load %arg1[%c67, %c0_71] {strides = array<i32: 2, 1>} : memref<256x96xf32, #tpu.memory_space<vmem>>, vector<30x96xf32>
    %cst_72 = arith.constant dense<0.000000e+00> : vector<30x256xf32>
    %81 = tpu.matmul %80, %76, %cst_72 {dimension_numbers = #tpu.dot_dimension_numbers<[1], [0], [0], [1], [0, 0, 1, 1], [], []>} : vector<30x96xf32>, vector<96x256xf32>, vector<30x256xf32> -> vector<30x256xf32>
    %82 = arith.addf %74, %81 : vector<30x256xf32>
    %c3_73 = arith.constant 3 : index
    %c0_74 = arith.constant 0 : index
    %c0_75 = arith.constant 0 : index
    %83 = vector.load %arg2[%c3_73, %c0_74, %c0_75] : memref<5x96x256xf32, #tpu.memory_space<vmem>>, vector<1x96x256xf32>
    %84 = vector.shape_cast %83 : vector<1x96x256xf32> to vector<96x256xf32>
    %c67_76 = arith.constant 67 : index
    %c0_77 = arith.constant 0 : index
    %85 = tpu.strided_load %arg1[%c67_76, %c0_77] {strides = array<i32: 2, 1>} : memref<256x96xf32, #tpu.memory_space<vmem>>, vector<30x96xf32>
    %cst_78 = arith.constant dense<0.000000e+00> : vector<30x256xf32>
    %86 = tpu.matmul %85, %84, %cst_78 {dimension_numbers = #tpu.dot_dimension_numbers<[1], [0], [0], [1], [0, 0, 1, 1], [], []>} : vector<30x96xf32>, vector<96x256xf32>, vector<30x256xf32> -> vector<30x256xf32>
    %87 = arith.addf %79, %86 : vector<30x256xf32>
    %c68 = arith.constant 68 : index
    %c0_79 = arith.constant 0 : index
    %88 = tpu.strided_load %arg1[%c68, %c0_79] {strides = array<i32: 2, 1>} : memref<256x96xf32, #tpu.memory_space<vmem>>, vector<30x96xf32>
    %cst_80 = arith.constant dense<0.000000e+00> : vector<30x256xf32>
    %89 = tpu.matmul %88, %84, %cst_80 {dimension_numbers = #tpu.dot_dimension_numbers<[1], [0], [0], [1], [0, 0, 1, 1], [], []>} : vector<30x96xf32>, vector<96x256xf32>, vector<30x256xf32> -> vector<30x256xf32>
    %90 = arith.addf %82, %89 : vector<30x256xf32>
    %c4_81 = arith.constant 4 : index
    %c0_82 = arith.constant 0 : index
    %c0_83 = arith.constant 0 : index
    %91 = vector.load %arg2[%c4_81, %c0_82, %c0_83] : memref<5x96x256xf32, #tpu.memory_space<vmem>>, vector<1x96x256xf32>
    %92 = vector.shape_cast %91 : vector<1x96x256xf32> to vector<96x256xf32>
    %c68_84 = arith.constant 68 : index
    %c0_85 = arith.constant 0 : index
    %93 = tpu.strided_load %arg1[%c68_84, %c0_85] {strides = array<i32: 2, 1>} : memref<256x96xf32, #tpu.memory_space<vmem>>, vector<30x96xf32>
    %cst_86 = arith.constant dense<0.000000e+00> : vector<30x256xf32>
    %94 = tpu.matmul %93, %92, %cst_86 {dimension_numbers = #tpu.dot_dimension_numbers<[1], [0], [0], [1], [0, 0, 1, 1], [], []>} : vector<30x96xf32>, vector<96x256xf32>, vector<30x256xf32> -> vector<30x256xf32>
    %95 = arith.addf %87, %94 : vector<30x256xf32>
    %c69 = arith.constant 69 : index
    %c0_87 = arith.constant 0 : index
    %96 = tpu.strided_load %arg1[%c69, %c0_87] {strides = array<i32: 2, 1>} : memref<256x96xf32, #tpu.memory_space<vmem>>, vector<30x96xf32>
    %cst_88 = arith.constant dense<0.000000e+00> : vector<30x256xf32>
    %97 = tpu.matmul %96, %92, %cst_88 {dimension_numbers = #tpu.dot_dimension_numbers<[1], [0], [0], [1], [0, 0, 1, 1], [], []>} : vector<30x96xf32>, vector<96x256xf32>, vector<30x256xf32> -> vector<30x256xf32>
    %98 = arith.addf %90, %97 : vector<30x256xf32>
    %99 = vector.extract_strided_slice %95 {offsets = [0, 0], sizes = [30, 128], strides = [1, 1]} : vector<30x256xf32> to vector<30x128xf32>
    %100 = vector.extract_strided_slice %95 {offsets = [0, 128], sizes = [30, 128], strides = [1, 1]} : vector<30x256xf32> to vector<30x128xf32>
    %101 = arith.maximumf %99, %100 : vector<30x128xf32>
    %102 = vector.extract_strided_slice %98 {offsets = [0, 0], sizes = [30, 128], strides = [1, 1]} : vector<30x256xf32> to vector<30x128xf32>
    %103 = vector.extract_strided_slice %98 {offsets = [0, 128], sizes = [30, 128], strides = [1, 1]} : vector<30x256xf32> to vector<30x128xf32>
    %104 = arith.maximumf %102, %103 : vector<30x128xf32>
    %105 = arith.maximumf %101, %104 : vector<30x128xf32>
    %106 = vector.broadcast %2 : vector<1x128xf32> to vector<30x128xf32>
    %107 = arith.addf %105, %106 : vector<30x128xf32>
    %cst_89 = arith.constant 0.000000e+00 : f32
    %108 = vector.broadcast %cst_89 : f32 to vector<30x128xf32>
    %109 = arith.maximumf %107, %108 : vector<30x128xf32>
    %c32 = arith.constant 32 : index
    %c0_90 = arith.constant 0 : index
    %110 = vector.load %arg14[%c32, %c0_90] : memref<136x128xf32, #tpu.memory_space<vmem>>, vector<30x128xf32>
    tpu.vector_store %arg14[%c32, %c0_90], %109 {strides = array<i32>} : memref<136x128xf32, #tpu.memory_space<vmem>>, vector<30x128xf32>,
    %cst_91 = arith.constant 0.000000e+00 : f32
    %111 = vector.broadcast %cst_91 : f32 to vector<30x256xf32>
    %cst_92 = arith.constant 0.000000e+00 : f32
    %112 = vector.broadcast %cst_92 : f32 to vector<30x256xf32>
    %c0_93 = arith.constant 0 : index
    %c0_94 = arith.constant 0 : index
    %c0_95 = arith.constant 0 : index
    %113 = vector.load %arg2[%c0_93, %c0_94, %c0_95] : memref<5x96x256xf32, #tpu.memory_space<vmem>>, vector<1x96x256xf32>
    %114 = vector.shape_cast %113 : vector<1x96x256xf32> to vector<96x256xf32>
    %c128 = arith.constant 128 : index
    %c0_96 = arith.constant 0 : index
    %115 = tpu.strided_load %arg1[%c128, %c0_96] {strides = array<i32: 2, 1>} : memref<256x96xf32, #tpu.memory_space<vmem>>, vector<30x96xf32>
    %cst_97 = arith.constant dense<0.000000e+00> : vector<30x256xf32>
    %116 = tpu.matmul %115, %114, %cst_97 {dimension_numbers = #tpu.dot_dimension_numbers<[1], [0], [0], [1], [0, 0, 1, 1], [], []>} : vector<30x96xf32>, vector<96x256xf32>, vector<30x256xf32> -> vector<30x256xf32>
    %117 = arith.addf %111, %116 : vector<30x256xf32>
    %c129 = arith.constant 129 : index
    %c0_98 = arith.constant 0 : index
    %118 = tpu.strided_load %arg1[%c129, %c0_98] {strides = array<i32: 2, 1>} : memref<256x96xf32, #tpu.memory_space<vmem>>, vector<30x96xf32>
    %cst_99 = arith.constant dense<0.000000e+00> : vector<30x256xf32>
    %119 = tpu.matmul %118, %114, %cst_99 {dimension_numbers = #tpu.dot_dimension_numbers<[1], [0], [0], [1], [0, 0, 1, 1], [], []>} : vector<30x96xf32>, vector<96x256xf32>, vector<30x256xf32> -> vector<30x256xf32>
    %120 = arith.addf %112, %119 : vector<30x256xf32>
    %c1_100 = arith.constant 1 : index
    %c0_101 = arith.constant 0 : index
    %c0_102 = arith.constant 0 : index
    %121 = vector.load %arg2[%c1_100, %c0_101, %c0_102] : memref<5x96x256xf32, #tpu.memory_space<vmem>>, vector<1x96x256xf32>
    %122 = vector.shape_cast %121 : vector<1x96x256xf32> to vector<96x256xf32>
    %c129_103 = arith.constant 129 : index
    %c0_104 = arith.constant 0 : index
    %123 = tpu.strided_load %arg1[%c129_103, %c0_104] {strides = array<i32: 2, 1>} : memref<256x96xf32, #tpu.memory_space<vmem>>, vector<30x96xf32>
    %cst_105 = arith.constant dense<0.000000e+00> : vector<30x256xf32>
    %124 = tpu.matmul %123, %122, %cst_105 {dimension_numbers = #tpu.dot_dimension_numbers<[1], [0], [0], [1], [0, 0, 1, 1], [], []>} : vector<30x96xf32>, vector<96x256xf32>, vector<30x256xf32> -> vector<30x256xf32>
    %125 = arith.addf %117, %124 : vector<30x256xf32>
    %c130 = arith.constant 130 : index
    %c0_106 = arith.constant 0 : index
    %126 = tpu.strided_load %arg1[%c130, %c0_106] {strides = array<i32: 2, 1>} : memref<256x96xf32, #tpu.memory_space<vmem>>, vector<30x96xf32>
    %cst_107 = arith.constant dense<0.000000e+00> : vector<30x256xf32>
    %127 = tpu.matmul %126, %122, %cst_107 {dimension_numbers = #tpu.dot_dimension_numbers<[1], [0], [0], [1], [0, 0, 1, 1], [], []>} : vector<30x96xf32>, vector<96x256xf32>, vector<30x256xf32> -> vector<30x256xf32>
    %128 = arith.addf %120, %127 : vector<30x256xf32>
    %c2_108 = arith.constant 2 : index
    %c0_109 = arith.constant 0 : index
    %c0_110 = arith.constant 0 : index
    %129 = vector.load %arg2[%c2_108, %c0_109, %c0_110] : memref<5x96x256xf32, #tpu.memory_space<vmem>>, vector<1x96x256xf32>
    %130 = vector.shape_cast %129 : vector<1x96x256xf32> to vector<96x256xf32>
    %c130_111 = arith.constant 130 : index
    %c0_112 = arith.constant 0 : index
    %131 = tpu.strided_load %arg1[%c130_111, %c0_112] {strides = array<i32: 2, 1>} : memref<256x96xf32, #tpu.memory_space<vmem>>, vector<30x96xf32>
    %cst_113 = arith.constant dense<0.000000e+00> : vector<30x256xf32>
    %132 = tpu.matmul %131, %130, %cst_113 {dimension_numbers = #tpu.dot_dimension_numbers<[1], [0], [0], [1], [0, 0, 1, 1], [], []>} : vector<30x96xf32>, vector<96x256xf32>, vector<30x256xf32> -> vector<30x256xf32>
    %133 = arith.addf %125, %132 : vector<30x256xf32>
    %c131 = arith.constant 131 : index
    %c0_114 = arith.constant 0 : index
    %134 = tpu.strided_load %arg1[%c131, %c0_114] {strides = array<i32: 2, 1>} : memref<256x96xf32, #tpu.memory_space<vmem>>, vector<30x96xf32>
    %cst_115 = arith.constant dense<0.000000e+00> : vector<30x256xf32>
    %135 = tpu.matmul %134, %130, %cst_115 {dimension_numbers = #tpu.dot_dimension_numbers<[1], [0], [0], [1], [0, 0, 1, 1], [], []>} : vector<30x96xf32>, vector<96x256xf32>, vector<30x256xf32> -> vector<30x256xf32>
    %136 = arith.addf %128, %135 : vector<30x256xf32>
    %c3_116 = arith.constant 3 : index
    %c0_117 = arith.constant 0 : index
    %c0_118 = arith.constant 0 : index
    %137 = vector.load %arg2[%c3_116, %c0_117, %c0_118] : memref<5x96x256xf32, #tpu.memory_space<vmem>>, vector<1x96x256xf32>
    %138 = vector.shape_cast %137 : vector<1x96x256xf32> to vector<96x256xf32>
    %c131_119 = arith.constant 131 : index
    %c0_120 = arith.constant 0 : index
    %139 = tpu.strided_load %arg1[%c131_119, %c0_120] {strides = array<i32: 2, 1>} : memref<256x96xf32, #tpu.memory_space<vmem>>, vector<30x96xf32>
    %cst_121 = arith.constant dense<0.000000e+00> : vector<30x256xf32>
    %140 = tpu.matmul %139, %138, %cst_121 {dimension_numbers = #tpu.dot_dimension_numbers<[1], [0], [0], [1], [0, 0, 1, 1], [], []>} : vector<30x96xf32>, vector<96x256xf32>, vector<30x256xf32> -> vector<30x256xf32>
    %141 = arith.addf %133, %140 : vector<30x256xf32>
    %c132 = arith.constant 132 : index
    %c0_122 = arith.constant 0 : index
    %142 = tpu.strided_load %arg1[%c132, %c0_122] {strides = array<i32: 2, 1>} : memref<256x96xf32, #tpu.memory_space<vmem>>, vector<30x96xf32>
    %cst_123 = arith.constant dense<0.000000e+00> : vector<30x256xf32>
    %143 = tpu.matmul %142, %138, %cst_123 {dimension_numbers = #tpu.dot_dimension_numbers<[1], [0], [0], [1], [0, 0, 1, 1], [], []>} : vector<30x96xf32>, vector<96x256xf32>, vector<30x256xf32> -> vector<30x256xf32>
    %144 = arith.addf %136, %143 : vector<30x256xf32>
    %c4_124 = arith.constant 4 : index
    %c0_125 = arith.constant 0 : index
    %c0_126 = arith.constant 0 : index
    %145 = vector.load %arg2[%c4_124, %c0_125, %c0_126] : memref<5x96x256xf32, #tpu.memory_space<vmem>>, vector<1x96x256xf32>
    %146 = vector.shape_cast %145 : vector<1x96x256xf32> to vector<96x256xf32>
    %c132_127 = arith.constant 132 : index
    %c0_128 = arith.constant 0 : index
    %147 = tpu.strided_load %arg1[%c132_127, %c0_128] {strides = array<i32: 2, 1>} : memref<256x96xf32, #tpu.memory_space<vmem>>, vector<30x96xf32>
    %cst_129 = arith.constant dense<0.000000e+00> : vector<30x256xf32>
    %148 = tpu.matmul %147, %146, %cst_129 {dimension_numbers = #tpu.dot_dimension_numbers<[1], [0], [0], [1], [0, 0, 1, 1], [], []>} : vector<30x96xf32>, vector<96x256xf32>, vector<30x256xf32> -> vector<30x256xf32>
    %149 = arith.addf %141, %148 : vector<30x256xf32>
    %c133 = arith.constant 133 : index
    %c0_130 = arith.constant 0 : index
    %150 = tpu.strided_load %arg1[%c133, %c0_130] {strides = array<i32: 2, 1>} : memref<256x96xf32, #tpu.memory_space<vmem>>, vector<30x96xf32>
    %cst_131 = arith.constant dense<0.000000e+00> : vector<30x256xf32>
    %151 = tpu.matmul %150, %146, %cst_131 {dimension_numbers = #tpu.dot_dimension_numbers<[1], [0], [0], [1], [0, 0, 1, 1], [], []>} : vector<30x96xf32>, vector<96x256xf32>, vector<30x256xf32> -> vector<30x256xf32>
    %152 = arith.addf %144, %151 : vector<30x256xf32>
    %153 = vector.extract_strided_slice %149 {offsets = [0, 0], sizes = [30, 128], strides = [1, 1]} : vector<30x256xf32> to vector<30x128xf32>
    %154 = vector.extract_strided_slice %149 {offsets = [0, 128], sizes = [30, 128], strides = [1, 1]} : vector<30x256xf32> to vector<30x128xf32>
    %155 = arith.maximumf %153, %154 : vector<30x128xf32>
    %156 = vector.extract_strided_slice %152 {offsets = [0, 0], sizes = [30, 128], strides = [1, 1]} : vector<30x256xf32> to vector<30x128xf32>
    %157 = vector.extract_strided_slice %152 {offsets = [0, 128], sizes = [30, 128], strides = [1, 1]} : vector<30x256xf32> to vector<30x128xf32>
    %158 = arith.maximumf %156, %157 : vector<30x128xf32>
    %159 = arith.maximumf %155, %158 : vector<30x128xf32>
    %160 = vector.broadcast %2 : vector<1x128xf32> to vector<30x128xf32>
    %161 = arith.addf %159, %160 : vector<30x128xf32>
    %cst_132 = arith.constant 0.000000e+00 : f32
    %162 = vector.broadcast %cst_132 : f32 to vector<30x128xf32>
    %163 = arith.maximumf %161, %162 : vector<30x128xf32>
    %c64_133 = arith.constant 64 : index
    %c0_134 = arith.constant 0 : index
    %164 = vector.load %arg14[%c64_133, %c0_134] : memref<136x128xf32, #tpu.memory_space<vmem>>, vector<30x128xf32>
    tpu.vector_store %arg14[%c64_133, %c0_134], %163 {strides = array<i32>} : memref<136x128xf32, #tpu.memory_space<vmem>>, vector<30x128xf32>,
    %cst_135 = arith.constant 0.000000e+00 : f32
    %165 = vector.broadcast %cst_135 : f32 to vector<30x256xf32>
    %cst_136 = arith.constant 0.000000e+00 : f32
    %166 = vector.broadcast %cst_136 : f32 to vector<30x256xf32>
    %c0_137 = arith.constant 0 : index
    %c0_138 = arith.constant 0 : index
    %c0_139 = arith.constant 0 : index
    %167 = vector.load %arg2[%c0_137, %c0_138, %c0_139] : memref<5x96x256xf32, #tpu.memory_space<vmem>>, vector<1x96x256xf32>
    %168 = vector.shape_cast %167 : vector<1x96x256xf32> to vector<96x256xf32>
    %c192 = arith.constant 192 : index
    %c0_140 = arith.constant 0 : index
    %169 = tpu.strided_load %arg1[%c192, %c0_140] {strides = array<i32: 2, 1>} : memref<256x96xf32, #tpu.memory_space<vmem>>, vector<30x96xf32>
    %cst_141 = arith.constant dense<0.000000e+00> : vector<30x256xf32>
    %170 = tpu.matmul %169, %168, %cst_141 {dimension_numbers = #tpu.dot_dimension_numbers<[1], [0], [0], [1], [0, 0, 1, 1], [], []>} : vector<30x96xf32>, vector<96x256xf32>, vector<30x256xf32> -> vector<30x256xf32>
    %171 = arith.addf %165, %170 : vector<30x256xf32>
    %c193 = arith.constant 193 : index
    %c0_142 = arith.constant 0 : index
    %172 = tpu.strided_load %arg1[%c193, %c0_142] {strides = array<i32: 2, 1>} : memref<256x96xf32, #tpu.memory_space<vmem>>, vector<30x96xf32>
    %cst_143 = arith.constant dense<0.000000e+00> : vector<30x256xf32>
    %173 = tpu.matmul %172, %168, %cst_143 {dimension_numbers = #tpu.dot_dimension_numbers<[1], [0], [0], [1], [0, 0, 1, 1], [], []>} : vector<30x96xf32>, vector<96x256xf32>, vector<30x256xf32> -> vector<30x256xf32>
    %174 = arith.addf %166, %173 : vector<30x256xf32>
    %c1_144 = arith.constant 1 : index
    %c0_145 = arith.constant 0 : index
    %c0_146 = arith.constant 0 : index
    %175 = vector.load %arg2[%c1_144, %c0_145, %c0_146] : memref<5x96x256xf32, #tpu.memory_space<vmem>>, vector<1x96x256xf32>
    %176 = vector.shape_cast %175 : vector<1x96x256xf32> to vector<96x256xf32>
    %c193_147 = arith.constant 193 : index
    %c0_148 = arith.constant 0 : index
    %177 = tpu.strided_load %arg1[%c193_147, %c0_148] {strides = array<i32: 2, 1>} : memref<256x96xf32, #tpu.memory_space<vmem>>, vector<30x96xf32>
    %cst_149 = arith.constant dense<0.000000e+00> : vector<30x256xf32>
    %178 = tpu.matmul %177, %176, %cst_149 {dimension_numbers = #tpu.dot_dimension_numbers<[1], [0], [0], [1], [0, 0, 1, 1], [], []>} : vector<30x96xf32>, vector<96x256xf32>, vector<30x256xf32> -> vector<30x256xf32>
    %179 = arith.addf %171, %178 : vector<30x256xf32>
    %c194 = arith.constant 194 : index
    %c0_150 = arith.constant 0 : index
    %180 = tpu.strided_load %arg1[%c194, %c0_150] {strides = array<i32: 2, 1>} : memref<256x96xf32, #tpu.memory_space<vmem>>, vector<30x96xf32>
    %cst_151 = arith.constant dense<0.000000e+00> : vector<30x256xf32>
    %181 = tpu.matmul %180, %176, %cst_151 {dimension_numbers = #tpu.dot_dimension_numbers<[1], [0], [0], [1], [0, 0, 1, 1], [], []>} : vector<30x96xf32>, vector<96x256xf32>, vector<30x256xf32> -> vector<30x256xf32>
    %182 = arith.addf %174, %181 : vector<30x256xf32>
    %c2_152 = arith.constant 2 : index
    %c0_153 = arith.constant 0 : index
    %c0_154 = arith.constant 0 : index
    %183 = vector.load %arg2[%c2_152, %c0_153, %c0_154] : memref<5x96x256xf32, #tpu.memory_space<vmem>>, vector<1x96x256xf32>
    %184 = vector.shape_cast %183 : vector<1x96x256xf32> to vector<96x256xf32>
    %c194_155 = arith.constant 194 : index
    %c0_156 = arith.constant 0 : index
    %185 = tpu.strided_load %arg1[%c194_155, %c0_156] {strides = array<i32: 2, 1>} : memref<256x96xf32, #tpu.memory_space<vmem>>, vector<30x96xf32>
    %cst_157 = arith.constant dense<0.000000e+00> : vector<30x256xf32>
    %186 = tpu.matmul %185, %184, %cst_157 {dimension_numbers = #tpu.dot_dimension_numbers<[1], [0], [0], [1], [0, 0, 1, 1], [], []>} : vector<30x96xf32>, vector<96x256xf32>, vector<30x256xf32> -> vector<30x256xf32>
    %187 = arith.addf %179, %186 : vector<30x256xf32>
    %c195 = arith.constant 195 : index
    %c0_158 = arith.constant 0 : index
    %188 = tpu.strided_load %arg1[%c195, %c0_158] {strides = array<i32: 2, 1>} : memref<256x96xf32, #tpu.memory_space<vmem>>, vector<30x96xf32>
    %cst_159 = arith.constant dense<0.000000e+00> : vector<30x256xf32>
    %189 = tpu.matmul %188, %184, %cst_159 {dimension_numbers = #tpu.dot_dimension_numbers<[1], [0], [0], [1], [0, 0, 1, 1], [], []>} : vector<30x96xf32>, vector<96x256xf32>, vector<30x256xf32> -> vector<30x256xf32>
    %190 = arith.addf %182, %189 : vector<30x256xf32>
    %c3_160 = arith.constant 3 : index
    %c0_161 = arith.constant 0 : index
    %c0_162 = arith.constant 0 : index
    %191 = vector.load %arg2[%c3_160, %c0_161, %c0_162] : memref<5x96x256xf32, #tpu.memory_space<vmem>>, vector<1x96x256xf32>
    %192 = vector.shape_cast %191 : vector<1x96x256xf32> to vector<96x256xf32>
    %c195_163 = arith.constant 195 : index
    %c0_164 = arith.constant 0 : index
    %193 = tpu.strided_load %arg1[%c195_163, %c0_164] {strides = array<i32: 2, 1>} : memref<256x96xf32, #tpu.memory_space<vmem>>, vector<30x96xf32>
    %cst_165 = arith.constant dense<0.000000e+00> : vector<30x256xf32>
    %194 = tpu.matmul %193, %192, %cst_165 {dimension_numbers = #tpu.dot_dimension_numbers<[1], [0], [0], [1], [0, 0, 1, 1], [], []>} : vector<30x96xf32>, vector<96x256xf32>, vector<30x256xf32> -> vector<30x256xf32>
    %195 = arith.addf %187, %194 : vector<30x256xf32>
    %c196 = arith.constant 196 : index
    %c0_166 = arith.constant 0 : index
    %196 = tpu.strided_load %arg1[%c196, %c0_166] {strides = array<i32: 2, 1>} : memref<256x96xf32, #tpu.memory_space<vmem>>, vector<30x96xf32>
    %cst_167 = arith.constant dense<0.000000e+00> : vector<30x256xf32>
    %197 = tpu.matmul %196, %192, %cst_167 {dimension_numbers = #tpu.dot_dimension_numbers<[1], [0], [0], [1], [0, 0, 1, 1], [], []>} : vector<30x96xf32>, vector<96x256xf32>, vector<30x256xf32> -> vector<30x256xf32>
    %198 = arith.addf %190, %197 : vector<30x256xf32>
    %c4_168 = arith.constant 4 : index
    %c0_169 = arith.constant 0 : index
    %c0_170 = arith.constant 0 : index
    %199 = vector.load %arg2[%c4_168, %c0_169, %c0_170] : memref<5x96x256xf32, #tpu.memory_space<vmem>>, vector<1x96x256xf32>
    %200 = vector.shape_cast %199 : vector<1x96x256xf32> to vector<96x256xf32>
    %c196_171 = arith.constant 196 : index
    %c0_172 = arith.constant 0 : index
    %201 = tpu.strided_load %arg1[%c196_171, %c0_172] {strides = array<i32: 2, 1>} : memref<256x96xf32, #tpu.memory_space<vmem>>, vector<30x96xf32>
    %cst_173 = arith.constant dense<0.000000e+00> : vector<30x256xf32>
    %202 = tpu.matmul %201, %200, %cst_173 {dimension_numbers = #tpu.dot_dimension_numbers<[1], [0], [0], [1], [0, 0, 1, 1], [], []>} : vector<30x96xf32>, vector<96x256xf32>, vector<30x256xf32> -> vector<30x256xf32>
    %203 = arith.addf %195, %202 : vector<30x256xf32>
    %c197 = arith.constant 197 : index
    %c0_174 = arith.constant 0 : index
    %204 = tpu.strided_load %arg1[%c197, %c0_174] {strides = array<i32: 2, 1>} : memref<256x96xf32, #tpu.memory_space<vmem>>, vector<30x96xf32>
    %cst_175 = arith.constant dense<0.000000e+00> : vector<30x256xf32>
    %205 = tpu.matmul %204, %200, %cst_175 {dimension_numbers = #tpu.dot_dimension_numbers<[1], [0], [0], [1], [0, 0, 1, 1], [], []>} : vector<30x96xf32>, vector<96x256xf32>, vector<30x256xf32> -> vector<30x256xf32>
    %206 = arith.addf %198, %205 : vector<30x256xf32>
    %207 = vector.extract_strided_slice %203 {offsets = [0, 0], sizes = [30, 128], strides = [1, 1]} : vector<30x256xf32> to vector<30x128xf32>
    %208 = vector.extract_strided_slice %203 {offsets = [0, 128], sizes = [30, 128], strides = [1, 1]} : vector<30x256xf32> to vector<30x128xf32>
    %209 = arith.maximumf %207, %208 : vector<30x128xf32>
    %210 = vector.extract_strided_slice %206 {offsets = [0, 0], sizes = [30, 128], strides = [1, 1]} : vector<30x256xf32> to vector<30x128xf32>
    %211 = vector.extract_strided_slice %206 {offsets = [0, 128], sizes = [30, 128], strides = [1, 1]} : vector<30x256xf32> to vector<30x128xf32>
    %212 = arith.maximumf %210, %211 : vector<30x128xf32>
    %213 = arith.maximumf %209, %212 : vector<30x128xf32>
    %214 = vector.broadcast %2 : vector<1x128xf32> to vector<30x128xf32>
    %215 = arith.addf %213, %214 : vector<30x128xf32>
    %cst_176 = arith.constant 0.000000e+00 : f32
    %216 = vector.broadcast %cst_176 : f32 to vector<30x128xf32>
    %217 = arith.maximumf %215, %216 : vector<30x128xf32>
    %c96 = arith.constant 96 : index
    %c0_177 = arith.constant 0 : index
    %218 = vector.load %arg14[%c96, %c0_177] : memref<136x128xf32, #tpu.memory_space<vmem>>, vector<30x128xf32>
    tpu.vector_store %arg14[%c96, %c0_177], %217 {strides = array<i32>} : memref<136x128xf32, #tpu.memory_space<vmem>>, vector<30x128xf32>,
    %c0_178 = arith.constant 0 : index
    %c0_179 = arith.constant 0 : index
    %219 = vector.load %arg5[%c0_178, %c0_179] : memref<1x128xf32, #tpu.memory_space<vmem>>, vector<1x128xf32>
    %cst_180 = arith.constant 0.000000e+00 : f32
    %220 = vector.broadcast %cst_180 : f32 to vector<32x256xf32>
    %cst_181 = arith.constant 0.000000e+00 : f32
    %221 = vector.broadcast %cst_181 : f32 to vector<32x256xf32>
    %c0_182 = arith.constant 0 : index
    %c0_183 = arith.constant 0 : index
    %c0_184 = arith.constant 0 : index
    %222 = vector.load %arg4[%c0_182, %c0_183, %c0_184] : memref<5x128x256xf32, #tpu.memory_space<vmem>>, vector<1x128x256xf32>
    %223 = vector.shape_cast %222 : vector<1x128x256xf32> to vector<128x256xf32>
    %c0_185 = arith.constant 0 : index
    %c0_186 = arith.constant 0 : index
    %224 = tpu.strided_load %arg14[%c0_185, %c0_186] {strides = array<i32: 2, 1>} : memref<136x128xf32, #tpu.memory_space<vmem>>, vector<32x128xf32>
    %cst_187 = arith.constant dense<0.000000e+00> : vector<32x256xf32>
    %225 = tpu.matmul %224, %223, %cst_187 {dimension_numbers = #tpu.dot_dimension_numbers<[1], [0], [0], [1], [0, 0, 1, 1], [], []>} : vector<32x128xf32>, vector<128x256xf32>, vector<32x256xf32> -> vector<32x256xf32>
    %226 = arith.addf %220, %225 : vector<32x256xf32>
    %c1_188 = arith.constant 1 : index
    %c0_189 = arith.constant 0 : index
    %227 = tpu.strided_load %arg14[%c1_188, %c0_189] {strides = array<i32: 2, 1>} : memref<136x128xf32, #tpu.memory_space<vmem>>, vector<32x128xf32>
    %cst_190 = arith.constant dense<0.000000e+00> : vector<32x256xf32>
    %228 = tpu.matmul %227, %223, %cst_190 {dimension_numbers = #tpu.dot_dimension_numbers<[1], [0], [0], [1], [0, 0, 1, 1], [], []>} : vector<32x128xf32>, vector<128x256xf32>, vector<32x256xf32> -> vector<32x256xf32>
    %229 = arith.addf %221, %228 : vector<32x256xf32>
    %c1_191 = arith.constant 1 : index
    %c0_192 = arith.constant 0 : index
    %c0_193 = arith.constant 0 : index
    %230 = vector.load %arg4[%c1_191, %c0_192, %c0_193] : memref<5x128x256xf32, #tpu.memory_space<vmem>>, vector<1x128x256xf32>
    %231 = vector.shape_cast %230 : vector<1x128x256xf32> to vector<128x256xf32>
    %c1_194 = arith.constant 1 : index
    %c0_195 = arith.constant 0 : index
    %232 = tpu.strided_load %arg14[%c1_194, %c0_195] {strides = array<i32: 2, 1>} : memref<136x128xf32, #tpu.memory_space<vmem>>, vector<32x128xf32>
    %cst_196 = arith.constant dense<0.000000e+00> : vector<32x256xf32>
    %233 = tpu.matmul %232, %231, %cst_196 {dimension_numbers = #tpu.dot_dimension_numbers<[1], [0], [0], [1], [0, 0, 1, 1], [], []>} : vector<32x128xf32>, vector<128x256xf32>, vector<32x256xf32> -> vector<32x256xf32>
    %234 = arith.addf %226, %233 : vector<32x256xf32>
    %c2_197 = arith.constant 2 : index
    %c0_198 = arith.constant 0 : index
    %235 = tpu.strided_load %arg14[%c2_197, %c0_198] {strides = array<i32: 2, 1>} : memref<136x128xf32, #tpu.memory_space<vmem>>, vector<32x128xf32>
    %cst_199 = arith.constant dense<0.000000e+00> : vector<32x256xf32>
    %236 = tpu.matmul %235, %231, %cst_199 {dimension_numbers = #tpu.dot_dimension_numbers<[1], [0], [0], [1], [0, 0, 1, 1], [], []>} : vector<32x128xf32>, vector<128x256xf32>, vector<32x256xf32> -> vector<32x256xf32>
    %237 = arith.addf %229, %236 : vector<32x256xf32>
    %c2_200 = arith.constant 2 : index
    %c0_201 = arith.constant 0 : index
    %c0_202 = arith.constant 0 : index
    %238 = vector.load %arg4[%c2_200, %c0_201, %c0_202] : memref<5x128x256xf32, #tpu.memory_space<vmem>>, vector<1x128x256xf32>
    %239 = vector.shape_cast %238 : vector<1x128x256xf32> to vector<128x256xf32>
    %c2_203 = arith.constant 2 : index
    %c0_204 = arith.constant 0 : index
    %240 = tpu.strided_load %arg14[%c2_203, %c0_204] {strides = array<i32: 2, 1>} : memref<136x128xf32, #tpu.memory_space<vmem>>, vector<32x128xf32>
    %cst_205 = arith.constant dense<0.000000e+00> : vector<32x256xf32>
    %241 = tpu.matmul %240, %239, %cst_205 {dimension_numbers = #tpu.dot_dimension_numbers<[1], [0], [0], [1], [0, 0, 1, 1], [], []>} : vector<32x128xf32>, vector<128x256xf32>, vector<32x256xf32> -> vector<32x256xf32>
    %242 = arith.addf %234, %241 : vector<32x256xf32>
    %c3_206 = arith.constant 3 : index
    %c0_207 = arith.constant 0 : index
    %243 = tpu.strided_load %arg14[%c3_206, %c0_207] {strides = array<i32: 2, 1>} : memref<136x128xf32, #tpu.memory_space<vmem>>, vector<32x128xf32>
    %cst_208 = arith.constant dense<0.000000e+00> : vector<32x256xf32>
    %244 = tpu.matmul %243, %239, %cst_208 {dimension_numbers = #tpu.dot_dimension_numbers<[1], [0], [0], [1], [0, 0, 1, 1], [], []>} : vector<32x128xf32>, vector<128x256xf32>, vector<32x256xf32> -> vector<32x256xf32>
    %245 = arith.addf %237, %244 : vector<32x256xf32>
    %c3_209 = arith.constant 3 : index
    %c0_210 = arith.constant 0 : index
    %c0_211 = arith.constant 0 : index
    %246 = vector.load %arg4[%c3_209, %c0_210, %c0_211] : memref<5x128x256xf32, #tpu.memory_space<vmem>>, vector<1x128x256xf32>
    %247 = vector.shape_cast %246 : vector<1x128x256xf32> to vector<128x256xf32>
    %c3_212 = arith.constant 3 : index
    %c0_213 = arith.constant 0 : index
    %248 = tpu.strided_load %arg14[%c3_212, %c0_213] {strides = array<i32: 2, 1>} : memref<136x128xf32, #tpu.memory_space<vmem>>, vector<32x128xf32>
    %cst_214 = arith.constant dense<0.000000e+00> : vector<32x256xf32>
    %249 = tpu.matmul %248, %247, %cst_214 {dimension_numbers = #tpu.dot_dimension_numbers<[1], [0], [0], [1], [0, 0, 1, 1], [], []>} : vector<32x128xf32>, vector<128x256xf32>, vector<32x256xf32> -> vector<32x256xf32>
    %250 = arith.addf %242, %249 : vector<32x256xf32>
    %c4_215 = arith.constant 4 : index
    %c0_216 = arith.constant 0 : index
    %251 = tpu.strided_load %arg14[%c4_215, %c0_216] {strides = array<i32: 2, 1>} : memref<136x128xf32, #tpu.memory_space<vmem>>, vector<32x128xf32>
    %cst_217 = arith.constant dense<0.000000e+00> : vector<32x256xf32>
    %252 = tpu.matmul %251, %247, %cst_217 {dimension_numbers = #tpu.dot_dimension_numbers<[1], [0], [0], [1], [0, 0, 1, 1], [], []>} : vector<32x128xf32>, vector<128x256xf32>, vector<32x256xf32> -> vector<32x256xf32>
    %253 = arith.addf %245, %252 : vector<32x256xf32>
    %c4_218 = arith.constant 4 : index
    %c0_219 = arith.constant 0 : index
    %c0_220 = arith.constant 0 : index
    %254 = vector.load %arg4[%c4_218, %c0_219, %c0_220] : memref<5x128x256xf32, #tpu.memory_space<vmem>>, vector<1x128x256xf32>
    %255 = vector.shape_cast %254 : vector<1x128x256xf32> to vector<128x256xf32>
    %c4_221 = arith.constant 4 : index
    %c0_222 = arith.constant 0 : index
    %256 = tpu.strided_load %arg14[%c4_221, %c0_222] {strides = array<i32: 2, 1>} : memref<136x128xf32, #tpu.memory_space<vmem>>, vector<32x128xf32>
    %cst_223 = arith.constant dense<0.000000e+00> : vector<32x256xf32>
    %257 = tpu.matmul %256, %255, %cst_223 {dimension_numbers = #tpu.dot_dimension_numbers<[1], [0], [0], [1], [0, 0, 1, 1], [], []>} : vector<32x128xf32>, vector<128x256xf32>, vector<32x256xf32> -> vector<32x256xf32>
    %258 = arith.addf %250, %257 : vector<32x256xf32>
    %c5_224 = arith.constant 5 : index
    %c0_225 = arith.constant 0 : index
    %259 = tpu.strided_load %arg14[%c5_224, %c0_225] {strides = array<i32: 2, 1>} : memref<136x128xf32, #tpu.memory_space<vmem>>, vector<32x128xf32>
    %cst_226 = arith.constant dense<0.000000e+00> : vector<32x256xf32>
    %260 = tpu.matmul %259, %255, %cst_226 {dimension_numbers = #tpu.dot_dimension_numbers<[1], [0], [0], [1], [0, 0, 1, 1], [], []>} : vector<32x128xf32>, vector<128x256xf32>, vector<32x256xf32> -> vector<32x256xf32>
    %261 = arith.addf %253, %260 : vector<32x256xf32>
    %262 = vector.extract_strided_slice %258 {offsets = [0, 0], sizes = [32, 128], strides = [1, 1]} : vector<32x256xf32> to vector<32x128xf32>
    %263 = vector.extract_strided_slice %258 {offsets = [0, 128], sizes = [32, 128], strides = [1, 1]} : vector<32x256xf32> to vector<32x128xf32>
    %264 = arith.maximumf %262, %263 : vector<32x128xf32>
    %265 = vector.extract_strided_slice %261 {offsets = [0, 0], sizes = [32, 128], strides = [1, 1]} : vector<32x256xf32> to vector<32x128xf32>
    %266 = vector.extract_strided_slice %261 {offsets = [0, 128], sizes = [32, 128], strides = [1, 1]} : vector<32x256xf32> to vector<32x128xf32>
    %267 = arith.maximumf %265, %266 : vector<32x128xf32>
    %268 = arith.maximumf %264, %267 : vector<32x128xf32>
    %269 = vector.broadcast %219 : vector<1x128xf32> to vector<32x128xf32>
    %270 = arith.addf %268, %269 : vector<32x128xf32>
    %cst_227 = arith.constant 0.000000e+00 : f32
    %271 = vector.broadcast %cst_227 : f32 to vector<32x128xf32>
    %272 = arith.maximumf %270, %271 : vector<32x128xf32>
    %c0_228 = arith.constant 0 : index
    %c0_229 = arith.constant 0 : index
    %273 = vector.load %arg15[%c0_228, %c0_229] : memref<64x128xf32, #tpu.memory_space<vmem>>, vector<32x128xf32>
    tpu.vector_store %arg15[%c0_228, %c0_229], %272 {strides = array<i32>} : memref<64x128xf32, #tpu.memory_space<vmem>>, vector<32x128xf32>,
    %cst_230 = arith.constant 0.000000e+00 : f32
    %274 = vector.broadcast %cst_230 : f32 to vector<32x256xf32>
    %cst_231 = arith.constant 0.000000e+00 : f32
    %275 = vector.broadcast %cst_231 : f32 to vector<32x256xf32>
    %c0_232 = arith.constant 0 : index
    %c0_233 = arith.constant 0 : index
    %c0_234 = arith.constant 0 : index
    %276 = vector.load %arg4[%c0_232, %c0_233, %c0_234] : memref<5x128x256xf32, #tpu.memory_space<vmem>>, vector<1x128x256xf32>
    %277 = vector.shape_cast %276 : vector<1x128x256xf32> to vector<128x256xf32>
    %c64_235 = arith.constant 64 : index
    %c0_236 = arith.constant 0 : index
    %278 = tpu.strided_load %arg14[%c64_235, %c0_236] {strides = array<i32: 2, 1>} : memref<136x128xf32, #tpu.memory_space<vmem>>, vector<32x128xf32>
    %cst_237 = arith.constant dense<0.000000e+00> : vector<32x256xf32>
    %279 = tpu.matmul %278, %277, %cst_237 {dimension_numbers = #tpu.dot_dimension_numbers<[1], [0], [0], [1], [0, 0, 1, 1], [], []>} : vector<32x128xf32>, vector<128x256xf32>, vector<32x256xf32> -> vector<32x256xf32>
    %280 = arith.addf %274, %279 : vector<32x256xf32>
    %c65_238 = arith.constant 65 : index
    %c0_239 = arith.constant 0 : index
    %281 = tpu.strided_load %arg14[%c65_238, %c0_239] {strides = array<i32: 2, 1>} : memref<136x128xf32, #tpu.memory_space<vmem>>, vector<32x128xf32>
    %cst_240 = arith.constant dense<0.000000e+00> : vector<32x256xf32>
    %282 = tpu.matmul %281, %277, %cst_240 {dimension_numbers = #tpu.dot_dimension_numbers<[1], [0], [0], [1], [0, 0, 1, 1], [], []>} : vector<32x128xf32>, vector<128x256xf32>, vector<32x256xf32> -> vector<32x256xf32>
    %283 = arith.addf %275, %282 : vector<32x256xf32>
    %c1_241 = arith.constant 1 : index
    %c0_242 = arith.constant 0 : index
    %c0_243 = arith.constant 0 : index
    %284 = vector.load %arg4[%c1_241, %c0_242, %c0_243] : memref<5x128x256xf32, #tpu.memory_space<vmem>>, vector<1x128x256xf32>
    %285 = vector.shape_cast %284 : vector<1x128x256xf32> to vector<128x256xf32>
    %c65_244 = arith.constant 65 : index
    %c0_245 = arith.constant 0 : index
    %286 = tpu.strided_load %arg14[%c65_244, %c0_245] {strides = array<i32: 2, 1>} : memref<136x128xf32, #tpu.memory_space<vmem>>, vector<32x128xf32>
    %cst_246 = arith.constant dense<0.000000e+00> : vector<32x256xf32>
    %287 = tpu.matmul %286, %285, %cst_246 {dimension_numbers = #tpu.dot_dimension_numbers<[1], [0], [0], [1], [0, 0, 1, 1], [], []>} : vector<32x128xf32>, vector<128x256xf32>, vector<32x256xf32> -> vector<32x256xf32>
    %288 = arith.addf %280, %287 : vector<32x256xf32>
    %c66_247 = arith.constant 66 : index
    %c0_248 = arith.constant 0 : index
    %289 = tpu.strided_load %arg14[%c66_247, %c0_248] {strides = array<i32: 2, 1>} : memref<136x128xf32, #tpu.memory_space<vmem>>, vector<32x128xf32>
    %cst_249 = arith.constant dense<0.000000e+00> : vector<32x256xf32>
    %290 = tpu.matmul %289, %285, %cst_249 {dimension_numbers = #tpu.dot_dimension_numbers<[1], [0], [0], [1], [0, 0, 1, 1], [], []>} : vector<32x128xf32>, vector<128x256xf32>, vector<32x256xf32> -> vector<32x256xf32>
    %291 = arith.addf %283, %290 : vector<32x256xf32>
    %c2_250 = arith.constant 2 : index
    %c0_251 = arith.constant 0 : index
    %c0_252 = arith.constant 0 : index
    %292 = vector.load %arg4[%c2_250, %c0_251, %c0_252] : memref<5x128x256xf32, #tpu.memory_space<vmem>>, vector<1x128x256xf32>
    %293 = vector.shape_cast %292 : vector<1x128x256xf32> to vector<128x256xf32>
    %c66_253 = arith.constant 66 : index
    %c0_254 = arith.constant 0 : index
    %294 = tpu.strided_load %arg14[%c66_253, %c0_254] {strides = array<i32: 2, 1>} : memref<136x128xf32, #tpu.memory_space<vmem>>, vector<32x128xf32>
    %cst_255 = arith.constant dense<0.000000e+00> : vector<32x256xf32>
    %295 = tpu.matmul %294, %293, %cst_255 {dimension_numbers = #tpu.dot_dimension_numbers<[1], [0], [0], [1], [0, 0, 1, 1], [], []>} : vector<32x128xf32>, vector<128x256xf32>, vector<32x256xf32> -> vector<32x256xf32>
    %296 = arith.addf %288, %295 : vector<32x256xf32>
    %c67_256 = arith.constant 67 : index
    %c0_257 = arith.constant 0 : index
    %297 = tpu.strided_load %arg14[%c67_256, %c0_257] {strides = array<i32: 2, 1>} : memref<136x128xf32, #tpu.memory_space<vmem>>, vector<32x128xf32>
    %cst_258 = arith.constant dense<0.000000e+00> : vector<32x256xf32>
    %298 = tpu.matmul %297, %293, %cst_258 {dimension_numbers = #tpu.dot_dimension_numbers<[1], [0], [0], [1], [0, 0, 1, 1], [], []>} : vector<32x128xf32>, vector<128x256xf32>, vector<32x256xf32> -> vector<32x256xf32>
    %299 = arith.addf %291, %298 : vector<32x256xf32>
    %c3_259 = arith.constant 3 : index
    %c0_260 = arith.constant 0 : index
    %c0_261 = arith.constant 0 : index
    %300 = vector.load %arg4[%c3_259, %c0_260, %c0_261] : memref<5x128x256xf32, #tpu.memory_space<vmem>>, vector<1x128x256xf32>
    %301 = vector.shape_cast %300 : vector<1x128x256xf32> to vector<128x256xf32>
    %c67_262 = arith.constant 67 : index
    %c0_263 = arith.constant 0 : index
    %302 = tpu.strided_load %arg14[%c67_262, %c0_263] {strides = array<i32: 2, 1>} : memref<136x128xf32, #tpu.memory_space<vmem>>, vector<32x128xf32>
    %cst_264 = arith.constant dense<0.000000e+00> : vector<32x256xf32>
    %303 = tpu.matmul %302, %301, %cst_264 {dimension_numbers = #tpu.dot_dimension_numbers<[1], [0], [0], [1], [0, 0, 1, 1], [], []>} : vector<32x128xf32>, vector<128x256xf32>, vector<32x256xf32> -> vector<32x256xf32>
    %304 = arith.addf %296, %303 : vector<32x256xf32>
    %c68_265 = arith.constant 68 : index
    %c0_266 = arith.constant 0 : index
    %305 = tpu.strided_load %arg14[%c68_265, %c0_266] {strides = array<i32: 2, 1>} : memref<136x128xf32, #tpu.memory_space<vmem>>, vector<32x128xf32>
    %cst_267 = arith.constant dense<0.000000e+00> : vector<32x256xf32>
    %306 = tpu.matmul %305, %301, %cst_267 {dimension_numbers = #tpu.dot_dimension_numbers<[1], [0], [0], [1], [0, 0, 1, 1], [], []>} : vector<32x128xf32>, vector<128x256xf32>, vector<32x256xf32> -> vector<32x256xf32>
    %307 = arith.addf %299, %306 : vector<32x256xf32>
    %c4_268 = arith.constant 4 : index
    %c0_269 = arith.constant 0 : index
    %c0_270 = arith.constant 0 : index
    %308 = vector.load %arg4[%c4_268, %c0_269, %c0_270] : memref<5x128x256xf32, #tpu.memory_space<vmem>>, vector<1x128x256xf32>
    %309 = vector.shape_cast %308 : vector<1x128x256xf32> to vector<128x256xf32>
    %c68_271 = arith.constant 68 : index
    %c0_272 = arith.constant 0 : index
    %310 = tpu.strided_load %arg14[%c68_271, %c0_272] {strides = array<i32: 2, 1>} : memref<136x128xf32, #tpu.memory_space<vmem>>, vector<32x128xf32>
    %cst_273 = arith.constant dense<0.000000e+00> : vector<32x256xf32>
    %311 = tpu.matmul %310, %309, %cst_273 {dimension_numbers = #tpu.dot_dimension_numbers<[1], [0], [0], [1], [0, 0, 1, 1], [], []>} : vector<32x128xf32>, vector<128x256xf32>, vector<32x256xf32> -> vector<32x256xf32>
    %312 = arith.addf %304, %311 : vector<32x256xf32>
    %c69_274 = arith.constant 69 : index
    %c0_275 = arith.constant 0 : index
    %313 = tpu.strided_load %arg14[%c69_274, %c0_275] {strides = array<i32: 2, 1>} : memref<136x128xf32, #tpu.memory_space<vmem>>, vector<32x128xf32>
    %cst_276 = arith.constant dense<0.000000e+00> : vector<32x256xf32>
    %314 = tpu.matmul %313, %309, %cst_276 {dimension_numbers = #tpu.dot_dimension_numbers<[1], [0], [0], [1], [0, 0, 1, 1], [], []>} : vector<32x128xf32>, vector<128x256xf32>, vector<32x256xf32> -> vector<32x256xf32>
    %315 = arith.addf %307, %314 : vector<32x256xf32>
    %316 = vector.extract_strided_slice %312 {offsets = [0, 0], sizes = [32, 128], strides = [1, 1]} : vector<32x256xf32> to vector<32x128xf32>
    %317 = vector.extract_strided_slice %312 {offsets = [0, 128], sizes = [32, 128], strides = [1, 1]} : vector<32x256xf32> to vector<32x128xf32>
    %318 = arith.maximumf %316, %317 : vector<32x128xf32>
    %319 = vector.extract_strided_slice %315 {offsets = [0, 0], sizes = [32, 128], strides = [1, 1]} : vector<32x256xf32> to vector<32x128xf32>
    %320 = vector.extract_strided_slice %315 {offsets = [0, 128], sizes = [32, 128], strides = [1, 1]} : vector<32x256xf32> to vector<32x128xf32>
    %321 = arith.maximumf %319, %320 : vector<32x128xf32>
    %322 = arith.maximumf %318, %321 : vector<32x128xf32>
    %323 = vector.broadcast %219 : vector<1x128xf32> to vector<32x128xf32>
    %324 = arith.addf %322, %323 : vector<32x128xf32>
    %cst_277 = arith.constant 0.000000e+00 : f32
    %325 = vector.broadcast %cst_277 : f32 to vector<32x128xf32>
    %326 = arith.maximumf %324, %325 : vector<32x128xf32>
    %c32_278 = arith.constant 32 : index
    %c0_279 = arith.constant 0 : index
    %327 = vector.load %arg15[%c32_278, %c0_279] : memref<64x128xf32, #tpu.memory_space<vmem>>, vector<32x128xf32>
    tpu.vector_store %arg15[%c32_278, %c0_279], %326 {strides = array<i32>} : memref<64x128xf32, #tpu.memory_space<vmem>>, vector<32x128xf32>,
    %c0_280 = arith.constant 0 : index
    %c0_281 = arith.constant 0 : index
    %328 = vector.load %arg6[%c0_280, %c0_281] : memref<40x64xf32, #tpu.memory_space<vmem>>, vector<40x64xf32>
    %c0_282 = arith.constant 0 : index
    %c0_283 = arith.constant 0 : index
    %329 = vector.load %arg15[%c0_282, %c0_283] : memref<64x128xf32, #tpu.memory_space<vmem>>, vector<64x128xf32>
    %cst_284 = arith.constant dense<0.000000e+00> : vector<40x128xf32>
    %330 = tpu.matmul %328, %329, %cst_284 {dimension_numbers = #tpu.dot_dimension_numbers<[1], [0], [0], [1], [0, 0, 1, 1], [], []>} : vector<40x64xf32>, vector<64x128xf32>, vector<40x128xf32> -> vector<40x128xf32>
    %cst_285 = arith.constant 0.000000e+00 : f32
    %331 = vector.broadcast %cst_285 : f32 to vector<8x128xf32>
    %332 = vector.extract_strided_slice %330 {offsets = [0, 0], sizes = [8, 128], strides = [1, 1]} : vector<40x128xf32> to vector<8x128xf32>
    %c0_286 = arith.constant 0 : index
    %c0_287 = arith.constant 0 : index
    %c0_288 = arith.constant 0 : index
    %333 = vector.load %arg7[%c0_286, %c0_287, %c0_288] : memref<5x128x128xf32, #tpu.memory_space<vmem>>, vector<1x128x128xf32>
    %334 = vector.shape_cast %333 : vector<1x128x128xf32> to vector<128x128xf32>
    %cst_289 = arith.constant dense<0.000000e+00> : vector<8x128xf32>
    %335 = tpu.matmul %332, %334, %cst_289 {dimension_numbers = #tpu.dot_dimension_numbers<[1], [0], [0], [1], [0, 0, 1, 1], [], []>} : vector<8x128xf32>, vector<128x128xf32>, vector<8x128xf32> -> vector<8x128xf32>
    %336 = arith.addf %331, %335 : vector<8x128xf32>
    %337 = vector.extract_strided_slice %330 {offsets = [8, 0], sizes = [8, 128], strides = [1, 1]} : vector<40x128xf32> to vector<8x128xf32>
    %c1_290 = arith.constant 1 : index
    %c0_291 = arith.constant 0 : index
    %c0_292 = arith.constant 0 : index
    %338 = vector.load %arg7[%c1_290, %c0_291, %c0_292] : memref<5x128x128xf32, #tpu.memory_space<vmem>>, vector<1x128x128xf32>
    %339 = vector.shape_cast %338 : vector<1x128x128xf32> to vector<128x128xf32>
    %cst_293 = arith.constant dense<0.000000e+00> : vector<8x128xf32>
    %340 = tpu.matmul %337, %339, %cst_293 {dimension_numbers = #tpu.dot_dimension_numbers<[1], [0], [0], [1], [0, 0, 1, 1], [], []>} : vector<8x128xf32>, vector<128x128xf32>, vector<8x128xf32> -> vector<8x128xf32>
    %341 = arith.addf %336, %340 : vector<8x128xf32>
    %342 = vector.extract_strided_slice %330 {offsets = [16, 0], sizes = [8, 128], strides = [1, 1]} : vector<40x128xf32> to vector<8x128xf32>
    %c2_294 = arith.constant 2 : index
    %c0_295 = arith.constant 0 : index
    %c0_296 = arith.constant 0 : index
    %343 = vector.load %arg7[%c2_294, %c0_295, %c0_296] : memref<5x128x128xf32, #tpu.memory_space<vmem>>, vector<1x128x128xf32>
    %344 = vector.shape_cast %343 : vector<1x128x128xf32> to vector<128x128xf32>
    %cst_297 = arith.constant dense<0.000000e+00> : vector<8x128xf32>
    %345 = tpu.matmul %342, %344, %cst_297 {dimension_numbers = #tpu.dot_dimension_numbers<[1], [0], [0], [1], [0, 0, 1, 1], [], []>} : vector<8x128xf32>, vector<128x128xf32>, vector<8x128xf32> -> vector<8x128xf32>
    %346 = arith.addf %341, %345 : vector<8x128xf32>
    %347 = vector.extract_strided_slice %330 {offsets = [24, 0], sizes = [8, 128], strides = [1, 1]} : vector<40x128xf32> to vector<8x128xf32>
    %c3_298 = arith.constant 3 : index
    %c0_299 = arith.constant 0 : index
    %c0_300 = arith.constant 0 : index
    %348 = vector.load %arg7[%c3_298, %c0_299, %c0_300] : memref<5x128x128xf32, #tpu.memory_space<vmem>>, vector<1x128x128xf32>
    %349 = vector.shape_cast %348 : vector<1x128x128xf32> to vector<128x128xf32>
    %cst_301 = arith.constant dense<0.000000e+00> : vector<8x128xf32>
    %350 = tpu.matmul %347, %349, %cst_301 {dimension_numbers = #tpu.dot_dimension_numbers<[1], [0], [0], [1], [0, 0, 1, 1], [], []>} : vector<8x128xf32>, vector<128x128xf32>, vector<8x128xf32> -> vector<8x128xf32>
    %351 = arith.addf %346, %350 : vector<8x128xf32>
    %352 = vector.extract_strided_slice %330 {offsets = [32, 0], sizes = [8, 128], strides = [1, 1]} : vector<40x128xf32> to vector<8x128xf32>
    %c4_302 = arith.constant 4 : index
    %c0_303 = arith.constant 0 : index
    %c0_304 = arith.constant 0 : index
    %353 = vector.load %arg7[%c4_302, %c0_303, %c0_304] : memref<5x128x128xf32, #tpu.memory_space<vmem>>, vector<1x128x128xf32>
    %354 = vector.shape_cast %353 : vector<1x128x128xf32> to vector<128x128xf32>
    %cst_305 = arith.constant dense<0.000000e+00> : vector<8x128xf32>
    %355 = tpu.matmul %352, %354, %cst_305 {dimension_numbers = #tpu.dot_dimension_numbers<[1], [0], [0], [1], [0, 0, 1, 1], [], []>} : vector<8x128xf32>, vector<128x128xf32>, vector<8x128xf32> -> vector<8x128xf32>
    %356 = arith.addf %351, %355 : vector<8x128xf32>
    %c0_306 = arith.constant 0 : index
    %c0_307 = arith.constant 0 : index
    %357 = vector.load %arg8[%c0_306, %c0_307] : memref<1x128xf32, #tpu.memory_space<vmem>>, vector<1x128xf32>
    %358 = vector.broadcast %357 : vector<1x128xf32> to vector<8x128xf32>
    %359 = arith.addf %356, %358 : vector<8x128xf32>
    %cst_308 = arith.constant 0.000000e+00 : f32
    %360 = vector.broadcast %cst_308 : f32 to vector<8x128xf32>
    %361 = arith.maximumf %359, %360 : vector<8x128xf32>
    %c0_309 = arith.constant 0 : index
    %c0_310 = arith.constant 0 : index
    %362 = vector.load %arg9[%c0_309, %c0_310] : memref<128x128xf32, #tpu.memory_space<vmem>>, vector<128x128xf32>
    %cst_311 = arith.constant dense<0.000000e+00> : vector<8x128xf32>
    %363 = tpu.matmul %361, %362, %cst_311 {dimension_numbers = #tpu.dot_dimension_numbers<[1], [0], [0], [1], [0, 0, 1, 1], [], []>} : vector<8x128xf32>, vector<128x128xf32>, vector<8x128xf32> -> vector<8x128xf32>
    %c0_312 = arith.constant 0 : index
    %c0_313 = arith.constant 0 : index
    %364 = vector.load %arg10[%c0_312, %c0_313] : memref<1x128xf32, #tpu.memory_space<vmem>>, vector<1x128xf32>
    %365 = vector.broadcast %364 : vector<1x128xf32> to vector<8x128xf32>
    %366 = arith.addf %363, %365 : vector<8x128xf32>
    %cst_314 = arith.constant 0.000000e+00 : f32
    %367 = vector.broadcast %cst_314 : f32 to vector<8x128xf32>
    %368 = arith.maximumf %366, %367 : vector<8x128xf32>
    %c0_315 = arith.constant 0 : index
    %c0_316 = arith.constant 0 : index
    %369 = vector.load %arg11[%c0_315, %c0_316] : memref<128x128xf32, #tpu.memory_space<vmem>>, vector<128x128xf32>
    %cst_317 = arith.constant dense<0.000000e+00> : vector<8x128xf32>
    %370 = tpu.matmul %368, %369, %cst_317 {dimension_numbers = #tpu.dot_dimension_numbers<[1], [0], [0], [1], [0, 0, 1, 1], [], []>} : vector<8x128xf32>, vector<128x128xf32>, vector<8x128xf32> -> vector<8x128xf32>
    %c0_318 = arith.constant 0 : index
    %c0_319 = arith.constant 0 : index
    %371 = vector.load %arg12[%c0_318, %c0_319] : memref<1x128xf32, #tpu.memory_space<vmem>>, vector<1x128xf32>
    %372 = vector.broadcast %371 : vector<1x128xf32> to vector<8x128xf32>
    %373 = arith.addf %370, %372 : vector<8x128xf32>
    %c0_320 = arith.constant 0 : index
    %c0_321 = arith.constant 0 : index
    %374 = vector.load %arg13[%c0_320, %c0_321] : memref<8x128xf32, #tpu.memory_space<vmem>>, vector<8x128xf32>
    tpu.vector_store %arg13[%c0_320, %c0_321], %373 {strides = array<i32>} : memref<8x128xf32, #tpu.memory_space<vmem>>, vector<8x128xf32>,
    return
  }
  func.func @transform_0(%arg0: i32) -> (i32, i32) {
    %c0_i32 = arith.constant 0 : i32
    %c0_i32_0 = arith.constant 0 : i32
    return %arg0, %c0_i32 : i32, i32
  }
  func.func @transform_1(%arg0: i32) -> (i32, i32, i32) {
    %c0_i32 = arith.constant 0 : i32
    %c0_i32_0 = arith.constant 0 : i32
    %c0_i32_1 = arith.constant 0 : i32
    %c0_i32_2 = arith.constant 0 : i32
    return %c0_i32, %c0_i32_0, %c0_i32_1 : i32, i32, i32
  }
  func.func @transform_2(%arg0: i32) -> (i32, i32) {
    %c0_i32 = arith.constant 0 : i32
    %c0_i32_0 = arith.constant 0 : i32
    %c0_i32_1 = arith.constant 0 : i32
    return %c0_i32, %c0_i32_0 : i32, i32
  }
  func.func @transform_3(%arg0: i32) -> (i32, i32, i32) {
    %c0_i32 = arith.constant 0 : i32
    %c0_i32_0 = arith.constant 0 : i32
    %c0_i32_1 = arith.constant 0 : i32
    %c0_i32_2 = arith.constant 0 : i32
    return %c0_i32, %c0_i32_0, %c0_i32_1 : i32, i32, i32
  }
  func.func @transform_4(%arg0: i32) -> (i32, i32) {
    %c0_i32 = arith.constant 0 : i32
    %c0_i32_0 = arith.constant 0 : i32
    %c0_i32_1 = arith.constant 0 : i32
    return %c0_i32, %c0_i32_0 : i32, i32
  }
  func.func @transform_5(%arg0: i32) -> (i32, i32) {
    %c0_i32 = arith.constant 0 : i32
    %c0_i32_0 = arith.constant 0 : i32
    %c0_i32_1 = arith.constant 0 : i32
    return %c0_i32, %c0_i32_0 : i32, i32
  }
  func.func @transform_6(%arg0: i32) -> (i32, i32, i32) {
    %c0_i32 = arith.constant 0 : i32
    %c0_i32_0 = arith.constant 0 : i32
    %c0_i32_1 = arith.constant 0 : i32
    %c0_i32_2 = arith.constant 0 : i32
    return %c0_i32, %c0_i32_0, %c0_i32_1 : i32, i32, i32
  }
  func.func @transform_7(%arg0: i32) -> (i32, i32) {
    %c0_i32 = arith.constant 0 : i32
    %c0_i32_0 = arith.constant 0 : i32
    %c0_i32_1 = arith.constant 0 : i32
    return %c0_i32, %c0_i32_0 : i32, i32
  }
  func.func @transform_8(%arg0: i32) -> (i32, i32) {
    %c0_i32 = arith.constant 0 : i32
    %c0_i32_0 = arith.constant 0 : i32
    %c0_i32_1 = arith.constant 0 : i32
    return %c0_i32, %c0_i32_0 : i32, i32
  }
  func.func @transform_9(%arg0: i32) -> (i32, i32) {
    %c0_i32 = arith.constant 0 : i32
    %c0_i32_0 = arith.constant 0 : i32
    %c0_i32_1 = arith.constant 0 : i32
    return %c0_i32, %c0_i32_0 : i32, i32
  }
  func.func @transform_10(%arg0: i32) -> (i32, i32) {
    %c0_i32 = arith.constant 0 : i32
    %c0_i32_0 = arith.constant 0 : i32
    %c0_i32_1 = arith.constant 0 : i32
    return %c0_i32, %c0_i32_0 : i32, i32
  }
  func.func @transform_11(%arg0: i32) -> (i32, i32) {
    %c0_i32 = arith.constant 0 : i32
    %c0_i32_0 = arith.constant 0 : i32
    %c0_i32_1 = arith.constant 0 : i32
    return %c0_i32, %c0_i32_0 : i32, i32
  }
  func.func @transform_12(%arg0: i32) -> (i32, i32) {
    %c0_i32 = arith.constant 0 : i32
    %c0_i32_0 = arith.constant 0 : i32
    return %arg0, %c0_i32 : i32, i32
  }
}

</mosaic_0001>

<bundles_post_ra>
// kernel: lenet_forward.1
= control target key start
LH: loop header
LB: loop body
LE: loop exit
PB: predicated region body
PF: predicated region fallthrough
CT: control target
= control target key end

     0   :  { %17 = vsyncpa [#allocation5], 0  ;;  %s16337_s0 = inlined_call_operand.vmem [shape: f32[512,96], index: 0, kind: input, shape index: {}]   ;;  %s16338_s1 = inlined_call_operand.vmem [shape: f32[5,96,256], index: 1, kind: input, shape index: {}]   ;;  %s16339_s2 = inlined_call_operand.vmem [shape: f32[1,128], index: 2, kind: input, shape index: {}]   ;;  %s16340_s3 = inlined_call_operand.vmem [shape: f32[5,128,256], index: 3, kind: input, shape index: {}]   ;;  %s16341_s4 = inlined_call_operand.vmem [shape: f32[1,128], index: 4, kind: input, shape index: {}]   ;;  %s16342_s5 = inlined_call_operand.vmem [shape: f32[40,64], index: 5, kind: input, shape index: {}]   ;;  %s16343_s6 = inlined_call_operand.vmem [shape: f32[5,128,128], index: 6, kind: input, shape index: {}]   ;;  %s16344_s7 = inlined_call_operand.vmem [shape: f32[1,128], index: 7, kind: input, shape index: {}]   ;;  %s16345_s8 = inlined_call_operand.vmem [shape: f32[128,128], index: 8, kind: input, shape index: {}]   ;;  %s16346_s9 = inlined_call_operand.vmem [shape: f32[1,128], index: 9, kind: input, shape index: {}]   ;;  %s16347_s10 = inlined_call_operand.vmem [shape: f32[128,128], index: 10, kind: input, shape index: {}]   ;;  %s16348_s11 = inlined_call_operand.vmem [shape: f32[1,128], index: 11, kind: input, shape index: {}]   ;;  %s16349_s12 = inlined_call_operand.hbm [shape: f32[16,128], index: 12, kind: output, shape index: {}]  }
   0x1   :  { %19 = vsyncpa [#allocation5 + $0x1], 0  ;;  %s12159_s21 = smov 0   ;;  %s12161_s22 = smov 0  }
   0x2   :  { %s12163_s23 = smov 0   ;;  %s12165_s24 = smov 0  }
   0x3 LB: > { %16391 = sst [smem:[#allocation7_spill]] %s12084_s23  ;;  %s12180_s25 = sadd.s32 4294967295, %s12088_s24   ;;  %s12088_s24 = sphi %s12165_s24, %s16433_s24   ;;  %s12084_s23 = sphi %s12163_s23, %s16435_s23   ;;  %s12080_s22 = sphi %s12161_s22, %s16437_s22   ;;  %s12076_s21 = sphi %s12159_s21, %s16436_s21  }
   0x4   : > { %s8426_s26 = sadd.s32 4294967294, %s12088_s24   ;;  %s12184_s27 = sadd.s32 1, %s12088_s24  }
   0x5   : > { %16392 = sst [smem:[#allocation8_spill]] %s12184_s27  ;;  %s289_s28 = sadd.s32 1, %s12084_s23 }
   0x6   : > { %s286_s29 = ssub.s32 %s12088_s24, %s12184_s27  ;;  %p299_p0 = scmp.ne.s32.totalorder %s12084_s23, %s12080_s22 }
   0x7   : > { %p287_p1 = scmp.eq.s32.totalorder %s286_s29, 0  ;;  %p300_p2 = scmp.eq.s32.totalorder %s12180_s25, 1 }
   0x8   : > { %p305_p3 = scmp.ne.s32.totalorder %s12080_s22, %s12076_s21  ;;  %p306_p4 = scmp.eq.s32.totalorder %s8426_s26, 1 }
   0x9   : > { %s12195_s30 = scalar_select %p287_p1, %s12084_s23, %s289_s28  }
   0xa   : > { %p12197_p5 = por %p300_p2, %p299_p0  ;;  %p12201_p6 = por %p306_p4, %p305_p3 }
   0xb   : > { %16393 = sst [smem:[#allocation9_spill]] %s12195_s30  ;;  %p8429_p7 = scmp.ge.s32.totalorder %s12088_s24, 1 }
   0xc   : > { %p366_p8 = scmp.lt.s32.totalorder %s12088_s24, 3 }
   0xe   : > { %p367_p9 = pnand %p8429_p7, %p366_p8 }
  0x10   : > { %370 = sbr.rel (%p367_p9) target bundleno = 2056 (0x808), region = 68 }
  0x17   : > { %v8441_v0 = vld [vmem:[%s16338_s1 + $0xc8] sm:$0xff]  ;;  %v8443_v1 = vld [vmem:[%s16338_s1 + $0xd8] sm:$0xff]  ;;  %v8440_v2 = vld [vmem:[%s16338_s1 + $0xc0] sm:$0xff]  ;;  %v16353_v7 = vmov 0.0   ;;  %s8431_s28 = sshll.u32 %s12180_s25, 5  ;;  %vm496_vm0 = vcmask 785408  }
  0x18   : > { %v12216_v3 = vpack.c.bf16 %v8443_v1, %v8441_v0  ;;  %v8442_v4 = vld [vmem:[%s16338_s1 + $0xd0] sm:$0xff]  ;;  %v8445_v5 = vld [vmem:[%s16338_s1 + $0xe8] sm:$0xff]  ;;  %v8447_v6 = vld [vmem:[%s16338_s1 + $0xf8] sm:$0xff]  ;;  %573 = vmatprep.mubr.f32.mxu0 %v16353_v7  ;;  %417 = vst [vmem:[#allocation2 + $0x18] sm:$0xff] %v16353_v7  ;;  %783 = vmatprep.mubr.f32.mxu1 %v16353_v7  ;;  %p409_p10 = scmp.lt.s32.totalorder %s8431_s28, 63  ;;  %vm12092_vm1 = vmmov 0  }
  0x19   : > { %421 = vst [vmem:[#allocation2 + $0x38] sm:$0xff] %v16353_v7  ;;  %425 = vst [vmem:[#allocation2 + $0x58] sm:$0xff] %v16353_v7  ;;  %v12234_v8 = vpack.c.bf16 %v8442_v4, %v8440_v2  ;;  %v12236_v9 = vpack.c.bf16 %v8447_v6, %v8445_v5  ;;  %v8444_v10 = vld [vmem:[%s16338_s1 + $0xe0] sm:$0xff]  ;;  %v8446_v11 = vld [vmem:[%s16338_s1 + $0xf0] sm:$0xff]  ;;  %vm7613_vm2 = vcmask 523264   ;;  %s405_s17 = sand.u32 1, %s12080_s22  }
  0x1a   : > { %429 = vst [vmem:[#allocation2 + $0x78] sm:$0xff] %v16353_v7  ;;  %430 = vst [vmem:[#allocation2 + $0x80] sm:$0xff] %v16353_v7  ;;  %v8449_v12 = vld [vmem:[%s16338_s1 + $0x108] sm:$0xff]  ;;  %9815 = vmatprep.subr.bf16.mxu0 %v12216_v3  ;;  %9863 = vmatprep.subr.bf16.mxu1 %v12216_v3  ;;  %v8451_v13 = vld [vmem:[%s16338_s1 + $0x118] sm:$0xff]  ;;  %v12254_v14 = vpack.c.bf16 %v8446_v11, %v8444_v10  ;;  %s16439_s28 = smov (!%p409_p10, %s8431_s28), 63  ;;  %s8430_s18 = sshll.u32 %s405_s17, 3 }
  0x1b   : > { %9817 = vmatpush1.bf16.msra.mxu0 %v12234_v8  ;;  %9865 = vmatpush1.bf16.msra.mxu1 %v12234_v8  ;;  %v12258_v15 = vpack.c.bf16 %v8451_v13, %v8449_v12  ;;  %v8448_v16 = vld [vmem:[%s16338_s1 + $0x100] sm:$0xff]  ;;  %v8450_v17 = vld [vmem:[%s16338_s1 + $0x110] sm:$0xff]  ;;  %v8453_v18 = vld [vmem:[%s16338_s1 + $0x128] sm:$0xff]  ;;  %s8432_s19 = sshll.u32 %s16439_s28, 3  ;;  %s9403_s27 = sshll.u32 %s12180_s25, 7 }
  0x1c   : > { %9819 = vmatprep.subr.bf16.mxu0 %v12236_v9  ;;  %9867 = vmatprep.subr.bf16.mxu1 %v12236_v9  ;;  %v8455_v19 = vld [vmem:[%s16338_s1 + $0x138] sm:$0xff]  ;;  %v12275_v20 = vpack.c.bf16 %v8450_v17, %v8448_v16  ;;  %v8452_v22 = vld [vmem:[%s16338_s1 + $0x120] sm:$0xff]  ;;  %v8454_v23 = vld [vmem:[%s16338_s1 + $0x130] sm:$0xff]  ;;  %s12344_s29 = scalar_lea.vmem %s16337_s0, %s8432_s19  ;;  %s407_s19 = scalar_lea.vmem [#allocation4], %s8430_s18 }
  0x1d   : > { %v12279_v21 = vpack.c.bf16 %v8455_v19, %v8453_v18  ;;  %v8457_v24 = vld [vmem:[%s16338_s1 + $0x148] sm:$0xff]  ;;  %v8459_v25 = vld [vmem:[%s16338_s1 + $0x158] sm:$0xff]  ;;  %v12295_v26 = vpack.c.bf16 %v8454_v23, %v8452_v22  ;;  %v8456_v28 = vld [vmem:[%s16338_s1 + $0x140] sm:$0xff]  ;;  %s8367_s20 = sshll.u32 %s407_s19, 4  ;;  %s16295_s16 = scalar_lea.hbm %s16349_s12, %s9403_s27  ;;  %s16297_s20 = int_to_ptr.vmem [resolvable:$true] %s8367_s20 }
  0x1e   : > { %v12299_v27 = vpack.c.bf16 %v8459_v25, %v8457_v24  ;;  %v8458_v29 = vld [vmem:[%s16338_s1 + $0x150] sm:$0xff]  ;;  %v8461_v30 = vld [vmem:[%s16338_s1 + $0x168] sm:$0xff]  ;;  %v8463_v31 = vld [vmem:[%s16338_s1 + $0x178] sm:$0xff]  ;;  %s8354_s28 = scalar_lea.sflag [#allocation5], %s405_s17  ;;  %s12026_s30 = scalar_lea.vmem %s16297_s20, 128 }
  0x1f   : > { %9821 = vmatpush1.bf16.msra.mxu0 %v12254_v14  ;;  %9869 = vmatpush1.bf16.msra.mxu1 %v12254_v14  ;;  %v12315_v32 = vpack.c.bf16 %v8458_v29, %v8456_v28  ;;  %v12319_v33 = vpack.c.bf16 %v8463_v31, %v8461_v30  ;;  %v8460_v34 = vld [vmem:[%s16338_s1 + $0x160] sm:$0xff]  ;;  %v8462_v35 = vld [vmem:[%s16338_s1 + $0x170] sm:$0xff]  ;;  %v433_v36 = vld [vmem:[%s16338_s1 + $0x8] sm:$0xff]  ;;  %p12027_p11 = scmp.ne.s32.totalorder %s16297_s20, %s12026_s30  ;;  %s12093_s25 = smov [#allocation4]  }
  0x20   : > { %9823 = vmatprep.subr.bf16.mxu0 %v12258_v15  ;;  %9871 = vmatprep.subr.bf16.mxu1 %v12258_v15  ;;  %v435_v37 = vld [vmem:[%s16338_s1 + $0x18] sm:$0xff]  ;;  %v12335_v38 = vpack.c.bf16 %v8462_v35, %v8460_v34  ;;  %v432_v40 = vld [vmem:[%s16338_s1] sm:$0xff]  ;;  %v434_v41 = vld [vmem:[%s16338_s1 + $0x10] sm:$0xff]  ;;  %s12030_s18 = sshll.u32 %s12093_s25, 4  ;;  %s12031_s18 = int_to_ptr.vmem [resolvable:$false] %s12030_s18 }
  0x21   : > { %v12339_v39 = vpack.c.bf16 %v435_v37, %v433_v36  ;;  %v437_v42 = vld [vmem:[%s16338_s1 + $0x28] sm:$0xff]  ;;  %v439_v43 = vld [vmem:[%s16338_s1 + $0x38] sm:$0xff]  ;;  %v12363_v45 = vpack.c.bf16 %v434_v41, %v432_v40  ;;  %v436_v48 = vld [vmem:[%s16338_s1 + $0x20] sm:$0xff]  ;;  %p12028_p12 = pnand %p12027_p11, %p12197_p5  ;;  %p12033_p0 = scmp.lt.s32.totalorder %s16297_s20, %s12031_s18 }
  0x22   : > { %v12361_v44 = vld [vmem:[%s12344_s29 + $0x1] ss:$2 sm:$0xff]  ;;  %v12366_v46 = vld [vmem:[%s12344_s29 + $0x2] ss:$2 sm:$0xff]  ;;  %v12370_v47 = vpack.c.bf16 %v439_v43, %v437_v42  ;;  %v443_v51 = vld [vmem:[%s16338_s1 + $0x58] sm:$0xff] }
  0x23   : > { %9825 = vmatpush1.bf16.msra.mxu0 %v12275_v20  ;;  %9873 = vmatpush1.bf16.msra.mxu1 %v12275_v20  ;;  %v438_v49 = vld [vmem:[%s16338_s1 + $0x30] sm:$0xff]  ;;  %v441_v50 = vld [vmem:[%s16338_s1 + $0x48] sm:$0xff]  ;;  %v440_v56 = vld [vmem:[%s16338_s1 + $0x40] sm:$0xff]  ;;  %p12029_p13 = pneg %p12028_p12 }
  0x24   : > { %9827 = vmatprep.subr.bf16.mxu0 %v12279_v21  ;;  %9875 = vmatprep.subr.bf16.mxu1 %v12279_v21  ;;  %v12390_v52 = vpack.c.bf16 %v438_v49, %v436_v48  ;;  %v12393_v53 = vld [vmem:[%s12344_s29 + $0x11] ss:$2 sm:$0xff]  ;;  %v12396_v54 = vld [vmem:[%s12344_s29 + $0x12] ss:$2 sm:$0xff]  ;;  %v12400_v55 = vpack.c.bf16 %v443_v51, %v441_v50  ;;  %v445_v58 = vld [vmem:[%s16338_s1 + $0x68] sm:$0xff] }
  0x25   : > { %v442_v57 = vld [vmem:[%s16338_s1 + $0x50] sm:$0xff]  ;;  %v447_v59 = vld [vmem:[%s16338_s1 + $0x78] sm:$0xff]  ;;  %v12425_v61 = vld [vmem:[%s12344_s29 + $0x21] ss:$2 sm:$0xff] }
  0x26   : > { %v12422_v60 = vpack.c.bf16 %v442_v57, %v440_v56  ;;  %v12428_v62 = vld [vmem:[%s12344_s29 + $0x22] ss:$2 sm:$0xff]  ;;  %v12432_v63 = vpack.c.bf16 %v447_v59, %v445_v58  ;;  %v451_v4 = vld [vmem:[%s16338_s1 + $0x98] sm:$0xff] }
  0x27   : > { %9829 = vmatpush1.bf16.msra.mxu0 %v12295_v26  ;;  %9877 = vmatpush1.bf16.msra.mxu1 %v12295_v26  ;;  %v444_v0 = vld [vmem:[%s16338_s1 + $0x60] sm:$0xff]  ;;  %v446_v1 = vld [vmem:[%s16338_s1 + $0x70] sm:$0xff]  ;;  %v449_v2 = vld [vmem:[%s16338_s1 + $0x88] sm:$0xff] }
  0x28   : > { %9831 = vmatprep.subr.bf16.mxu0 %v12299_v27  ;;  %9879 = vmatprep.subr.bf16.mxu1 %v12299_v27  ;;  %v12454_v5 = vpack.c.bf16 %v446_v1, %v444_v0  ;;  %v12457_v6 = vld [vmem:[%s12344_s29 + $0x31] ss:$2 sm:$0x3f]  ;;  %v12460_v10 = vld [vmem:[%s12344_s29 + $0x32] ss:$2 sm:$0x3f]  ;;  %v12464_v11 = vpack.c.bf16 %v451_v4, %v449_v2 }
  0x29   : > { %v448_v12 = vld [vmem:[%s16338_s1 + $0x80] sm:$0xff]  ;;  %v450_v13 = vld [vmem:[%s16338_s1 + $0x90] sm:$0xff]  ;;  %v453_v16 = vld [vmem:[%s16338_s1 + $0xa8] sm:$0xff] }
  0x2a   : > { %v455_v17 = vld [vmem:[%s16338_s1 + $0xb8] sm:$0xff]  ;;  %v12486_v18 = vpack.c.bf16 %v450_v13, %v448_v12  ;;  %v452_v22 = vld [vmem:[%s16338_s1 + $0xa0] sm:$0xff]  ;;  %v454_v23 = vld [vmem:[%s16338_s1 + $0xb0] sm:$0xff] }
  0x2b   : > { %9833 = vmatpush1.bf16.msra.mxu0 %v12315_v32  ;;  %9881 = vmatpush1.bf16.msra.mxu1 %v12315_v32  ;;  %v12490_v19 = vpack.c.bf16 %v455_v17, %v453_v16  ;;  %v8485_v24 = vld [vmem:[%s16338_s1 + $0x188] sm:$0xff]  ;;  %v8487_v25 = vld [vmem:[%s16338_s1 + $0x198] sm:$0xff]  ;;  %v12508_v28 = vpack.c.bf16 %v454_v23, %v452_v22  ;;  %v8484_v30 = vld [vmem:[%s16338_s1 + $0x180] sm:$0xff] }
  0x2c   : > { %9835 = vmatprep.subr.bf16.mxu0 %v12319_v33  ;;  %9883 = vmatprep.subr.bf16.mxu1 %v12319_v33  ;;  %v12512_v29 = vpack.c.bf16 %v8487_v25, %v8485_v24  ;;  %v8486_v31 = vld [vmem:[%s16338_s1 + $0x190] sm:$0xff]  ;;  %v8489_v34 = vld [vmem:[%s16338_s1 + $0x1a8] sm:$0xff]  ;;  %v8491_v35 = vld [vmem:[%s16338_s1 + $0x1b8] sm:$0xff] }
  0x2d   : > { %v456_v36 = vld [vmem:[%s12344_s29] ss:$2 sm:$0xff]  ;;  %v12529_v37 = vpack.c.bf16 %v8486_v31, %v8484_v30  ;;  %v12533_v40 = vpack.c.bf16 %v8491_v35, %v8489_v34  ;;  %v8490_v42 = vld [vmem:[%s16338_s1 + $0x1b0] sm:$0xff]  ;;  %v8495_v48 = vld [vmem:[%s16338_s1 + $0x1d8] sm:$0xff] }
  0x2e   : > { %v8488_v41 = vld [vmem:[%s16338_s1 + $0x1a0] sm:$0xff]  ;;  %v8493_v43 = vld [vmem:[%s16338_s1 + $0x1c8] sm:$0xff]  ;;  %v8433_v50 = vld [vmem:[%s12344_s29 + $0x10] ss:$2 sm:$0xff] }
  0x2f   : > { %9837 = vmatpush1.bf16.msra.mxu0 %v12335_v38  ;;  %9885 = vmatpush1.bf16.msra.mxu1 %v12335_v38  ;;  %v12552_v49 = vpack.c.bf16 %v8490_v42, %v8488_v41  ;;  %v12557_v51 = vpack.c.bf16 %v8495_v48, %v8493_v43  ;;  %v8492_v56 = vld [vmem:[%s16338_s1 + $0x1c0] sm:$0xff]  ;;  %v8497_v57 = vld [vmem:[%s16338_s1 + $0x1e8] sm:$0xff]  ;;  %v8499_v58 = vld [vmem:[%s16338_s1 + $0x1f8] sm:$0xff] }
  0x30   : > { %9839 = vmatprep.subr.bf16.mxu0 %v12339_v39  ;;  %9887 = vmatprep.subr.bf16.mxu1 %v12339_v39  ;;  %v8434_v0 = vld [vmem:[%s12344_s29 + $0x20] ss:$2 sm:$0xff]  ;;  %v12583_v1 = vpack.c.bf16 %v8499_v58, %v8497_v57  ;;  %v8503_v12 = vld [vmem:[%s16338_s1 + $0x218] sm:$0xff]  ;;  %v8522_v43 = vld [vmem:[%s16338_s1 + $0x250] sm:$0xff] }
  0x31   : > { %v8496_v2 = vld [vmem:[%s16338_s1 + $0x1e0] sm:$0xff]  ;;  %v8501_v4 = vld [vmem:[%s16338_s1 + $0x208] sm:$0xff]  ;;  %v8435_v16 = vld [vmem:[%s12344_s29 + $0x30] ss:$2 sm:$0x3f] }
  0x32   : > { %8464 = vmatmul.mubr.msk.f32.vlgmr.msra.gmra.mrb[0].mxu0 %vm496_vm0, %v12361_v44  ;;  %8476 = vmatmul.mubr.msk.f32.vlgmr.msra.gmra.mrb[0].mxu1 %vm496_vm0, %v12366_v46  ;;  %v12609_v17 = vpack.c.bf16 %v8503_v12, %v8501_v4  ;;  %v8500_v22 = vld [vmem:[%s16338_s1 + $0x200] sm:$0xff]  ;;  %v8505_v23 = vld [vmem:[%s16338_s1 + $0x228] sm:$0xff]  ;;  %v8507_v24 = vld [vmem:[%s16338_s1 + $0x238] sm:$0xff] }
  0x33   : > { %9841 = vmatpush1.bf16.msra.mxu0 %v12363_v45  ;;  %9889 = vmatpush1.bf16.msra.mxu1 %v12363_v45  ;;  %v12634_v30 = vpack.c.bf16 %v8507_v24, %v8505_v23  ;;  %v8504_v31 = vld [vmem:[%s16338_s1 + $0x220] sm:$0xff]  ;;  %v8521_v34 = vld [vmem:[%s16338_s1 + $0x248] sm:$0xff]  ;;  %v8523_v35 = vld [vmem:[%s16338_s1 + $0x258] sm:$0xff] }
  0x34   : > { %9843 = vmatprep.subr.bf16.mxu0 %v12370_v47  ;;  %9891 = vmatprep.subr.bf16.mxu1 %v12370_v47  ;;  %v12656_v41 = vpack.c.bf16 %v8523_v35, %v8521_v34  ;;  %v8520_v42 = vld [vmem:[%s16338_s1 + $0x240] sm:$0xff]  ;;  %v8525_v48 = vld [vmem:[%s16338_s1 + $0x268] sm:$0xff]  ;;  %v8535_v23 = vld [vmem:[%s16338_s1 + $0x2b8] sm:$0xff] }
  0x35   : > { %579 = vmatprep.mubr.f32.mxu0 %v16353_v7  ;;  %789 = vmatprep.mubr.f32.mxu1 %v16353_v7  ;;  %v8524_v58 = vld [vmem:[%s16338_s1 + $0x260] sm:$0xff]  ;;  %v8534_v34 = vld [vmem:[%s16338_s1 + $0x2b0] sm:$0xff]  ;;  %v8537_v35 = vld [vmem:[%s16338_s1 + $0x2c8] sm:$0xff] }
  0x36   : > { %8465 = vmatmul.mubr.msk.f32.gmra.mrb[2].mxu0 %vm496_vm0, %v12393_v53  ;;  %8477 = vmatmul.mubr.msk.f32.gmra.mrb[2].mxu1 %vm496_vm0, %v12396_v54  ;;  %v12702_v12 = vld [vmem:[%s12344_s29 + $0x13] ss:$2 sm:$0xff] }
  0x37   : > { %9845 = vmatpush1.bf16.msra.mxu0 %v12390_v52  ;;  %9893 = vmatpush1.bf16.msra.mxu1 %v12390_v52 }
  0x38   : > { %9847 = vmatprep.subr.bf16.mxu0 %v12400_v55  ;;  %9895 = vmatprep.subr.bf16.mxu1 %v12400_v55 }
  0x39   : > { %585 = vmatprep.mubr.f32.mxu0 %v16353_v7  ;;  %795 = vmatprep.mubr.f32.mxu1 %v16353_v7 }
  0x3a   : > { %8466 = vmatmul.mubr.msk.f32.gmra.mrb[4].mxu0 %vm496_vm0, %v12425_v61  ;;  %8478 = vmatmul.mubr.msk.f32.gmra.mrb[4].mxu1 %vm496_vm0, %v12428_v62 }
  0x3b   : > { %9849 = vmatpush1.bf16.msra.mxu0 %v12422_v60  ;;  %9897 = vmatpush1.bf16.msra.mxu1 %v12422_v60 }
  0x3c   : > { %9851 = vmatprep.subr.bf16.mxu0 %v12432_v63  ;;  %9899 = vmatprep.subr.bf16.mxu1 %v12432_v63 }
  0x3d   : > { %591 = vmatprep.mubr.f32.mxu0 %v16353_v7  ;;  %801 = vmatprep.mubr.f32.mxu1 %v16353_v7 }
  0x3e   : > { %8467 = vmatmul.mubr.msk.f32.gmra.mrb[6].mxu0 %vm496_vm0, %v12457_v6  ;;  %8479 = vmatmul.mubr.msk.f32.gmra.mrb[6].mxu1 %vm496_vm0, %v12460_v10 }
  0x3f   : > { %9853 = vmatpush1.bf16.msra.mxu0 %v12454_v5  ;;  %9901 = vmatpush1.bf16.msra.mxu1 %v12454_v5 }
  0x40   : > { %9855 = vmatprep.subr.bf16.mxu0 %v12464_v11  ;;  %9903 = vmatprep.subr.bf16.mxu1 %v12464_v11 }
  0x41   : > { %674 = vmatprep.mubr.f32.mxu0 %v16353_v7  ;;  %872 = vmatprep.mubr.f32.mxu1 %v16353_v7 }
  0x43   : > { %9857 = vmatpush1.bf16.msra.mxu0 %v12486_v18  ;;  %9905 = vmatpush1.bf16.msra.mxu1 %v12486_v18 }
  0x44   : > { %9859 = vmatprep.subr.bf16.mxu0 %v12490_v19  ;;  %9907 = vmatprep.subr.bf16.mxu1 %v12490_v19 }
  0x47   : > { %9861 = vmatpush1.bf16.msra.mxu0 %v12508_v28  ;;  %9909 = vmatpush1.bf16.msra.mxu1 %v12508_v28 }
  0x48   : > { %9911 = vmatprep.subr.bf16.mxu0 %v12512_v29  ;;  %9935 = vmatprep.subr.bf16.mxu1 %v12512_v29 }
  0x4a   : > { %8468 = vmatmul.mubr.msk.f32.vlgmr.msra.gmra.mrb[0].mxu0 %vm496_vm0, %v456_v36  ;;  %8480 = vmatmul.mubr.msk.f32.vlgmr.msra.gmra.mrb[0].mxu1 %vm496_vm0, %v12361_v44  ;;  %v8494_v44 = vld [vmem:[%s16338_s1 + $0x1d0] sm:$0xff] }
  0x4b   : > { %9913 = vmatpush1.bf16.msra.mxu0 %v12529_v37  ;;  %9937 = vmatpush1.bf16.msra.mxu1 %v12529_v37  ;;  %v12578_v59 = vpack.c.bf16 %v8494_v44, %v8492_v56  ;;  %v12673_v56 = vld [vmem:[%s12344_s29 + $0x3] ss:$2 sm:$0xff]  ;;  %v12675_v44 = vpack.c.bf16 %v8522_v43, %v8520_v42  ;;  %v8539_v42 = vld [vmem:[%s16338_s1 + $0x2d8] sm:$0xff] }
  0x4c   : > { %9915 = vmatprep.subr.bf16.mxu0 %v12533_v40  ;;  %9939 = vmatprep.subr.bf16.mxu1 %v12533_v40 }
  0x4d   : > { %680 = vmatprep.mubr.f32.mxu0 %v16353_v7  ;;  %878 = vmatprep.mubr.f32.mxu1 %v16353_v7 }
  0x4e   : > { %8469 = vmatmul.mubr.msk.f32.gmra.mrb[2].mxu0 %vm496_vm0, %v8433_v50  ;;  %8481 = vmatmul.mubr.msk.f32.gmra.mrb[2].mxu1 %vm496_vm0, %v12393_v53  ;;  %v8498_v53 = vld [vmem:[%s16338_s1 + $0x1f0] sm:$0xff]  ;;  %v8527_v50 = vld [vmem:[%s16338_s1 + $0x278] sm:$0xff] }
  0x4f   : > { %9917 = vmatpush1.bf16.msra.mxu0 %v12552_v49  ;;  %9941 = vmatpush1.bf16.msra.mxu1 %v12552_v49  ;;  %v12604_v13 = vpack.c.bf16 %v8498_v53, %v8496_v2  ;;  %v12679_v57 = vpack.c.bf16 %v8527_v50, %v8525_v48  ;;  %v8529_v2 = vld [vmem:[%s16338_s1 + $0x288] sm:$0xff]  ;;  %v8531_v53 = vld [vmem:[%s16338_s1 + $0x298] sm:$0xff]  ;;  %v12764_v50 = vpack.c.bf16 %v8539_v42, %v8537_v35  ;;  %v8556_v35 = vld [vmem:[%s16338_s1 + $0x300] sm:$0xff] }
  0x50   : > { %9919 = vmatprep.subr.bf16.mxu0 %v12557_v51  ;;  %9943 = vmatprep.subr.bf16.mxu1 %v12557_v51  ;;  %v12760_v48 = vld [vmem:[%s12344_s29 + $0x33] ss:$2 sm:$0x3f] }
  0x51   : > { %686 = vmatprep.mubr.f32.mxu0 %v16353_v7  ;;  %884 = vmatprep.mubr.f32.mxu1 %v16353_v7  ;;  %v8558_v42 = vld [vmem:[%s16338_s1 + $0x310] sm:$0xff] }
  0x52   : > { %8470 = vmatmul.mubr.msk.f32.gmra.mrb[4].mxu0 %vm496_vm0, %v8434_v0  ;;  %8482 = vmatmul.mubr.msk.f32.gmra.mrb[4].mxu1 %vm496_vm0, %v12425_v61  ;;  %v8502_v61 = vld [vmem:[%s16338_s1 + $0x210] sm:$0xff] }
  0x53   : > { %9921 = vmatpush1.bf16.msra.mxu0 %v12578_v59  ;;  %9945 = vmatpush1.bf16.msra.mxu1 %v12578_v59  ;;  %v12630_v25 = vpack.c.bf16 %v8502_v61, %v8500_v22  ;;  %v8526_v0 = vld [vmem:[%s16338_s1 + $0x270] sm:$0xff]  ;;  %v8533_v61 = vld [vmem:[%s16338_s1 + $0x2a8] sm:$0xff] }
  0x54   : > { %9923 = vmatprep.subr.bf16.mxu0 %v12583_v1  ;;  %9947 = vmatprep.subr.bf16.mxu1 %v12583_v1  ;;  %v12699_v4 = vpack.c.bf16 %v8526_v0, %v8524_v58  ;;  %v8530_v22 = vld [vmem:[%s16338_s1 + $0x290] sm:$0xff]  ;;  %v8541_v0 = vld [vmem:[%s16338_s1 + $0x2e8] sm:$0xff] }
  0x55   : > { %692 = vmatprep.mubr.f32.mxu0 %v16353_v7  ;;  %890 = vmatprep.mubr.f32.mxu1 %v16353_v7  ;;  %v8538_v58 = vld [vmem:[%s16338_s1 + $0x2d0] sm:$0xff] }
  0x56   : > { %8471 = vmatmul.mubr.msk.f32.gmra.mrb[6].mxu0 %vm496_vm0, %v8435_v16  ;;  %8483 = vmatmul.mubr.msk.f32.gmra.mrb[6].mxu1 %vm496_vm0, %v12457_v6  ;;  %v8506_v6 = vld [vmem:[%s16338_s1 + $0x230] sm:$0xff]  ;;  %v12706_v16 = vpack.c.bf16 %v8531_v53, %v8529_v2  ;;  %v8543_v2 = vld [vmem:[%s16338_s1 + $0x2f8] sm:$0xff] }
  0x57   : > { %9925 = vmatpush1.bf16.msra.mxu0 %v12604_v13  ;;  %9949 = vmatpush1.bf16.msra.mxu1 %v12604_v13  ;;  %v12652_v36 = vpack.c.bf16 %v8506_v6, %v8504_v31  ;;  %v12731_v31 = vld [vmem:[%s12344_s29 + $0x23] ss:$2 sm:$0xff]  ;;  %v12735_v6 = vpack.c.bf16 %v8535_v23, %v8533_v61  ;;  %v8559_v23 = vld [vmem:[%s16338_s1 + $0x318] sm:$0xff] }
  0x58   : > { %9927 = vmatprep.subr.bf16.mxu0 %v12609_v17  ;;  %9951 = vmatprep.subr.bf16.mxu1 %v12609_v17  ;;  %v8557_v61 = vld [vmem:[%s16338_s1 + $0x308] sm:$0xff] }
  0x59   : > { %986 = vmatprep.mubr.f32.mxu0 %v16353_v7  ;;  %1103 = vmatprep.mubr.f32.mxu1 %v16353_v7 }
  0x5b   : > { %9929 = vmatpush1.bf16.msra.mxu0 %v12630_v25  ;;  %9953 = vmatpush1.bf16.msra.mxu1 %v12630_v25 }
  0x5c   : > { %9931 = vmatprep.subr.bf16.mxu0 %v12634_v30  ;;  %9955 = vmatprep.subr.bf16.mxu1 %v12634_v30 }
  0x5f   : > { %9933 = vmatpush1.bf16.msra.mxu0 %v12652_v36  ;;  %9957 = vmatpush1.bf16.msra.mxu1 %v12652_v36 }
  0x60   : > { %9959 = vmatprep.subr.bf16.mxu0 %v12656_v41  ;;  %9983 = vmatprep.subr.bf16.mxu1 %v12656_v41 }
  0x62   : > { %8508 = vmatmul.mubr.msk.f32.vlgmr.msra.gmra.mrb[0].mxu0 %vm496_vm0, %v12366_v46  ;;  %8516 = vmatmul.mubr.msk.f32.vlgmr.msra.gmra.mrb[0].mxu1 %vm496_vm0, %v12673_v56  ;;  %v8528_v46 = vld [vmem:[%s16338_s1 + $0x280] sm:$0xff] }
  0x63   : > { %9961 = vmatpush1.bf16.msra.mxu0 %v12675_v44  ;;  %9985 = vmatpush1.bf16.msra.mxu1 %v12675_v44  ;;  %v12728_v24 = vpack.c.bf16 %v8530_v22, %v8528_v46  ;;  %v12790_v46 = vpack.c.bf16 %v8543_v2, %v8541_v0  ;;  %v8540_v22 = vld [vmem:[%s16338_s1 + $0x2e0] sm:$0xff]  ;;  %v12831_v2 = vpack.c.bf16 %v8558_v42, %v8556_v35  ;;  %v8567_v35 = vld [vmem:[%s16338_s1 + $0x358] sm:$0xff] }
  0x64   : > { %9963 = vmatprep.subr.bf16.mxu0 %v12679_v57  ;;  %9987 = vmatprep.subr.bf16.mxu1 %v12679_v57  ;;  %v12829_v0 = vld [vmem:[%s12344_s29 + $0x4] ss:$2 sm:$0xff] }
  0x65   : > { %992 = vmatprep.mubr.f32.mxu0 %v16353_v7  ;;  %1109 = vmatprep.mubr.f32.mxu1 %v16353_v7  ;;  %16397 = vst [vmem:[#allocation11_spill] sm:$0xff] %v12831_v2 }
  0x66   : > { %8509 = vmatmul.mubr.msk.f32.gmra.mrb[2].mxu0 %vm496_vm0, %v12396_v54  ;;  %8517 = vmatmul.mubr.msk.f32.gmra.mrb[2].mxu1 %vm496_vm0, %v12702_v12  ;;  %v8532_v54 = vld [vmem:[%s16338_s1 + $0x2a0] sm:$0xff] }
  0x67   : > { %9965 = vmatpush1.bf16.msra.mxu0 %v12699_v4  ;;  %9989 = vmatpush1.bf16.msra.mxu1 %v12699_v4  ;;  %v12757_v43 = vpack.c.bf16 %v8534_v34, %v8532_v54  ;;  %v12812_v34 = vpack.c.bf16 %v8559_v23, %v8557_v61  ;;  %v8562_v61 = vld [vmem:[%s16338_s1 + $0x330] sm:$0xff]  ;;  %v8565_v23 = vld [vmem:[%s16338_s1 + $0x348] sm:$0xff] }
  0x68   : > { %9967 = vmatprep.subr.bf16.mxu0 %v12706_v16  ;;  %9991 = vmatprep.subr.bf16.mxu1 %v12706_v16 }
  0x69   : > { %998 = vmatprep.mubr.f32.mxu0 %v16353_v7  ;;  %1115 = vmatprep.mubr.f32.mxu1 %v16353_v7  ;;  %16396 = vst [vmem:[#allocation10_spill] sm:$0xff] %v12812_v34 }
  0x6a   : > { %8510 = vmatmul.mubr.msk.f32.gmra.mrb[4].mxu0 %vm496_vm0, %v12428_v62  ;;  %8518 = vmatmul.mubr.msk.f32.gmra.mrb[4].mxu1 %vm496_vm0, %v12731_v31  ;;  %v8536_v62 = vld [vmem:[%s16338_s1 + $0x2c0] sm:$0xff] }
  0x6b   : > { %9969 = vmatpush1.bf16.msra.mxu0 %v12728_v24  ;;  %9993 = vmatpush1.bf16.msra.mxu1 %v12728_v24  ;;  %v12786_v53 = vpack.c.bf16 %v8538_v58, %v8536_v62  ;;  %v8561_v62 = vld [vmem:[%s16338_s1 + $0x328] sm:$0xff]  ;;  %v8563_v58 = vld [vmem:[%s16338_s1 + $0x338] sm:$0xff] }
  0x6c   : > { %9971 = vmatprep.subr.bf16.mxu0 %v12735_v6  ;;  %9995 = vmatprep.subr.bf16.mxu1 %v12735_v6 }
  0x6d   : > { %1004 = vmatprep.mubr.f32.mxu0 %v16353_v7  ;;  %1121 = vmatprep.mubr.f32.mxu1 %v16353_v7 }
  0x6e   : > { %8511 = vmatmul.mubr.msk.f32.gmra.mrb[6].mxu0 %vm496_vm0, %v12460_v10  ;;  %8519 = vmatmul.mubr.msk.f32.gmra.mrb[6].mxu1 %vm496_vm0, %v12760_v48  ;;  %v8542_v10 = vld [vmem:[%s16338_s1 + $0x2f0] sm:$0xff] }
  0x6f   : > { %9973 = vmatpush1.bf16.msra.mxu0 %v12757_v43  ;;  %9997 = vmatpush1.bf16.msra.mxu1 %v12757_v43  ;;  %v12808_v54 = vpack.c.bf16 %v8542_v10, %v8540_v22  ;;  %v12835_v22 = vpack.c.bf16 %v8563_v58, %v8561_v62  ;;  %v8560_v10 = vld [vmem:[%s16338_s1 + $0x320] sm:$0xff]  ;;  %v12862_v58 = vpack.c.bf16 %v8567_v35, %v8565_v23 }
  0x70   : > { %9975 = vmatprep.subr.bf16.mxu0 %v12764_v50  ;;  %9999 = vmatprep.subr.bf16.mxu1 %v12764_v50  ;;  %v12855_v42 = vpack.c.bf16 %v8562_v61, %v8560_v10  ;;  %v12858_v62 = vld [vmem:[%s12344_s29 + $0x14] ss:$2 sm:$0xff]  ;;  %v8569_v10 = vld [vmem:[%s16338_s1 + $0x368] sm:$0xff] }
  0x71   : > { %1225 = vmatprep.mubr.f32.mxu0 %v16353_v7  ;;  %1342 = vmatprep.mubr.f32.mxu1 %v16353_v7  ;;  %16398 = vst [vmem:[#allocation12_spill] sm:$0xff] %v12835_v22  ;;  %16400 = vst [vmem:[#allocation14_spill] sm:$0xff] %v12862_v58  ;;  %v8566_v7 = vld [vmem:[%s16338_s1 + $0x350] sm:$0xff]  ;;  %v8571_v61 = vld [vmem:[%s16338_s1 + $0x378] sm:$0xff] }
  0x72   : > { %16399 = vst [vmem:[#allocation13_spill] sm:$0xff] %v12855_v42  ;;  %v12887_v35 = vld [vmem:[%s12344_s29 + $0x24] ss:$2 sm:$0xff] }
  0x73   : > { %9977 = vmatpush1.bf16.msra.mxu0 %v12786_v53  ;;  %10001 = vmatpush1.bf16.msra.mxu1 %v12786_v53 }
  0x74   : > { %9979 = vmatprep.subr.bf16.mxu0 %v12790_v46  ;;  %10003 = vmatprep.subr.bf16.mxu1 %v12790_v46 }
  0x77   : > { %9981 = vmatpush1.bf16.msra.mxu0 %v12808_v54  ;;  %10005 = vmatpush1.bf16.msra.mxu1 %v12808_v54 }
  0x78   : > { %10007 = vmatprep.subr.bf16.mxu0 %v12812_v34  ;;  %10031 = vmatprep.subr.bf16.mxu1 %v12812_v34  ;;  %v8570_v34 = vld [vmem:[%s16338_s1 + $0x370] sm:$0xff] }
  0x7a   : > { %8544 = vmatmul.mubr.msk.f32.vlgmr.msra.gmra.mrb[0].mxu0 %vm496_vm0, %v12673_v56  ;;  %8552 = vmatmul.mubr.msk.f32.vlgmr.msra.gmra.mrb[0].mxu1 %vm496_vm0, %v12829_v0  ;;  %v8564_v56 = vld [vmem:[%s16338_s1 + $0x340] sm:$0xff] }
  0x7b   : > { %10009 = vmatpush1.bf16.msra.mxu0 %v12831_v2  ;;  %10033 = vmatpush1.bf16.msra.mxu1 %v12831_v2  ;;  %v16401_v2 = vmov 0.0   ;;  %v12884_v23 = vpack.c.bf16 %v8566_v7, %v8564_v56  ;;  %v8573_v7 = vld [vmem:[%s16338_s1 + $0x388] sm:$0xff]  ;;  %v8575_v56 = vld [vmem:[%s16338_s1 + $0x398] sm:$0xff] }
  0x7c   : > { %10011 = vmatprep.subr.bf16.mxu0 %v12835_v22  ;;  %10035 = vmatprep.subr.bf16.mxu1 %v12835_v22  ;;  %v12891_v22 = vpack.c.bf16 %v8571_v61, %v8569_v10  ;;  %v8551_v61 = vld [vmem:[%s12344_s29 + $0x34] ss:$2 sm:$0x3f] }
  0x7d   : > { %1231 = vmatprep.mubr.f32.mxu0 %v16401_v2  ;;  %1348 = vmatprep.mubr.f32.mxu1 %v16401_v2 }
  0x7e   : > { %8545 = vmatmul.mubr.msk.f32.gmra.mrb[2].mxu0 %vm496_vm0, %v12702_v12  ;;  %8553 = vmatmul.mubr.msk.f32.gmra.mrb[2].mxu1 %vm496_vm0, %v12858_v62  ;;  %16402 = vst [vmem:[#allocation15_spill] sm:$0xff] %v12891_v22  ;;  %v8568_v12 = vld [vmem:[%s16338_s1 + $0x360] sm:$0xff] }
  0x7f   : > { %10013 = vmatpush1.bf16.msra.mxu0 %v12855_v42  ;;  %10037 = vmatpush1.bf16.msra.mxu1 %v12855_v42  ;;  %v12913_v10 = vpack.c.bf16 %v8570_v34, %v8568_v12  ;;  %v8574_v42 = vld [vmem:[%s16338_s1 + $0x390] sm:$0xff]  ;;  %v8577_v34 = vld [vmem:[%s16338_s1 + $0x3a8] sm:$0xff]  ;;  %v8579_v12 = vld [vmem:[%s16338_s1 + $0x3b8] sm:$0xff] }
  0x80   : > { %10015 = vmatprep.subr.bf16.mxu0 %v12862_v58  ;;  %10039 = vmatprep.subr.bf16.mxu1 %v12862_v58  ;;  %v12918_v58 = vpack.c.bf16 %v8575_v56, %v8573_v7  ;;  %v12943_v56 = vpack.c.bf16 %v8579_v12, %v8577_v34  ;;  %v8780_v34 = vld [vmem:[%s16338_s1 + $0x158] sm:$0xff] }
  0x81   : > { %1237 = vmatprep.mubr.f32.mxu0 %v16401_v2  ;;  %1354 = vmatprep.mubr.f32.mxu1 %v16401_v2  ;;  %v8748_v12 = vld [vmem:[%s12344_s29 + $0x75] ss:$2 sm:$0x3f] }
  0x82   : > { %8546 = vmatmul.mubr.msk.f32.gmra.mrb[4].mxu0 %vm496_vm0, %v12731_v31  ;;  %8554 = vmatmul.mubr.msk.f32.gmra.mrb[4].mxu1 %vm496_vm0, %v12887_v35  ;;  %v8572_v31 = vld [vmem:[%s16338_s1 + $0x380] sm:$0xff] }
  0x83   : > { %10017 = vmatpush1.bf16.msra.mxu0 %v12884_v23  ;;  %10041 = vmatpush1.bf16.msra.mxu1 %v12884_v23  ;;  %v12939_v7 = vpack.c.bf16 %v8574_v42, %v8572_v31  ;;  %v8584_v31 = vld [vmem:[%s12344_s29 + $0x5] ss:$2 sm:$0xff] }
  0x84   : > { %10019 = vmatprep.subr.bf16.mxu0 %v12891_v22  ;;  %10043 = vmatprep.subr.bf16.mxu1 %v12891_v22  ;;  %v8576_v22 = vld [vmem:[%s16338_s1 + $0x3a0] sm:$0xff] }
  0x85   : > { %1243 = vmatprep.mubr.f32.mxu0 %v16401_v2  ;;  %1360 = vmatprep.mubr.f32.mxu1 %v16401_v2 }
  0x86   : > { %8547 = vmatmul.mubr.msk.f32.gmra.mrb[6].mxu0 %vm496_vm0, %v12760_v48  ;;  %8555 = vmatmul.mubr.msk.f32.gmra.mrb[6].mxu1 %vm496_vm0, %v8551_v61  ;;  %v8578_v48 = vld [vmem:[%s16338_s1 + $0x3b0] sm:$0xff] }
  0x87   : > { %10021 = vmatpush1.bf16.msra.mxu0 %v12913_v10  ;;  %10045 = vmatpush1.bf16.msra.mxu1 %v12913_v10  ;;  %v12955_v42 = vpack.c.bf16 %v8578_v48, %v8576_v22  ;;  %v8585_v22 = vld [vmem:[%s12344_s29 + $0x15] ss:$2 sm:$0xff] }
  0x88   : > { %10023 = vmatprep.subr.bf16.mxu0 %v12918_v58  ;;  %10047 = vmatprep.subr.bf16.mxu1 %v12918_v58  ;;  %v8777_v48 = vld [vmem:[%s16338_s1 + $0x140] sm:$0xff] }
  0x89   : > { %1464 = vmatprep.mubr.f32.mxu0 %v16401_v2  ;;  %1581 = vmatprep.mubr.f32.mxu1 %v16401_v2 }
  0x8b   : > { %10025 = vmatpush1.bf16.msra.mxu0 %v12939_v7  ;;  %10049 = vmatpush1.bf16.msra.mxu1 %v12939_v7 }
  0x8c   : > { %10027 = vmatprep.subr.bf16.mxu0 %v12943_v56  ;;  %10051 = vmatprep.subr.bf16.mxu1 %v12943_v56 }
  0x8f   : > { %10029 = vmatpush1.bf16.msra.mxu0 %v12955_v42  ;;  %10053 = vmatpush1.bf16.msra.mxu1 %v12955_v42 }
  0x90   : > { %10055 = vmatprep.subr.bf16.mxu0 %v12216_v3  ;;  %10103 = vmatprep.subr.bf16.mxu1 %v12216_v3  ;;  %v8586_v3 = vld [vmem:[%s12344_s29 + $0x25] ss:$2 sm:$0xff] }
  0x92   : > { %8580 = vmatmul.mubr.msk.f32.vlgmr.msra.gmra.mrb[0].mxu0 %vm496_vm0, %v12829_v0  ;;  %8588 = vmatmul.mubr.msk.f32.vlgmr.msra.gmra.mrb[0].mxu1 %vm496_vm0, %v8584_v31  ;;  %v8774_v0 = vld [vmem:[%s16338_s1 + $0x128] sm:$0xff] }
  0x93   : > { %10057 = vmatpush1.bf16.msra.mxu0 %v12234_v8  ;;  %10105 = vmatpush1.bf16.msra.mxu1 %v12234_v8  ;;  %v8587_v8 = vld [vmem:[%s12344_s29 + $0x35] ss:$2 sm:$0x3f]  ;;  %v8782_v31 = vld [vmem:[%s16338_s1 + $0x168] sm:$0xff] }
  0x94   : > { %1470 = vmatprep.mubr.f32.mxu0 %v16401_v2  ;;  %1587 = vmatprep.mubr.f32.mxu1 %v16401_v2 }
  0x95   : > { %10059 = vmatprep.subr.bf16.mxu0 %v12236_v9  ;;  %10107 = vmatprep.subr.bf16.mxu1 %v12236_v9  ;;  %v8597_v9 = vld [vmem:[%s12344_s29 + $0x41] ss:$2 sm:$0xff] }
  0x96   : > { %8581 = vmatmul.mubr.msk.f32.gmra.mrb[2].mxu0 %vm496_vm0, %v12858_v62  ;;  %8589 = vmatmul.mubr.msk.f32.gmra.mrb[2].mxu1 %vm496_vm0, %v8585_v22  ;;  %v8747_v62 = vld [vmem:[%s12344_s29 + $0x65] ss:$2 sm:$0xff]  ;;  %v8784_v22 = vld [vmem:[%s16338_s1 + $0x178] sm:$0xff] }
  0x97   : > { %10061 = vmatpush1.bf16.msra.mxu0 %v12254_v14  ;;  %10109 = vmatpush1.bf16.msra.mxu1 %v12254_v14  ;;  %v13010_v14 = vld [vmem:[%s12344_s29 + $0x42] ss:$2 sm:$0xff] }
  0x98   : > { %1476 = vmatprep.mubr.f32.mxu0 %v16401_v2  ;;  %1593 = vmatprep.mubr.f32.mxu1 %v16401_v2 }
  0x99   : > { %10063 = vmatprep.subr.bf16.mxu0 %v12258_v15  ;;  %10111 = vmatprep.subr.bf16.mxu1 %v12258_v15  ;;  %v8598_v15 = vld [vmem:[%s12344_s29 + $0x51] ss:$2 sm:$0xff] }
  0x9a   : > { %8582 = vmatmul.mubr.msk.f32.gmra.mrb[4].mxu0 %vm496_vm0, %v12887_v35  ;;  %8590 = vmatmul.mubr.msk.f32.gmra.mrb[4].mxu1 %vm496_vm0, %v8586_v3  ;;  %v8775_v35 = vld [vmem:[%s16338_s1 + $0x130] sm:$0xff] }
  0x9b   : > { %10065 = vmatpush1.bf16.msra.mxu0 %v12275_v20  ;;  %10113 = vmatpush1.bf16.msra.mxu1 %v12275_v20  ;;  %v13021_v20 = vld [vmem:[%s12344_s29 + $0x52] ss:$2 sm:$0xff] }
  0x9c   : > { %1482 = vmatprep.mubr.f32.mxu0 %v16401_v2  ;;  %1599 = vmatprep.mubr.f32.mxu1 %v16401_v2 }
  0x9d   : > { %10067 = vmatprep.subr.bf16.mxu0 %v12279_v21  ;;  %10115 = vmatprep.subr.bf16.mxu1 %v12279_v21  ;;  %v8599_v21 = vld [vmem:[%s12344_s29 + $0x61] ss:$2 sm:$0xff] }
  0x9e   : > { %8583 = vmatmul.mubr.msk.f32.gmra.mrb[6].mxu0 %vm496_vm0, %v8551_v61  ;;  %8591 = vmatmul.mubr.msk.f32.gmra.mrb[6].mxu1 %vm496_vm0, %v8587_v8  ;;  %v8778_v61 = vld [vmem:[%s16338_s1 + $0x148] sm:$0xff]  ;;  %v13340_v8 = vpack.c.bf16 %v8784_v22, %v8782_v31  ;;  %v8805_v31 = vld [vmem:[%s16338_s1 + $0x180] sm:$0xff]  ;;  %v8807_v22 = vld [vmem:[%s16338_s1 + $0x190] sm:$0xff] }
  0x9f   : > { %10069 = vmatpush1.bf16.msra.mxu0 %v12295_v26  ;;  %10117 = vmatpush1.bf16.msra.mxu1 %v12295_v26  ;;  %v13034_v26 = vld [vmem:[%s12344_s29 + $0x62] ss:$2 sm:$0xff] }
  0xa0   : > { %10071 = vmatprep.subr.bf16.mxu0 %v12299_v27  ;;  %10119 = vmatprep.subr.bf16.mxu1 %v12299_v27  ;;  %v8600_v27 = vld [vmem:[%s12344_s29 + $0x71] ss:$2 sm:$0x3f] }
  0xa1   : > { %1784 = vmatprep.mubr.f32.mxu0 %v16401_v2  ;;  %1994 = vmatprep.mubr.f32.mxu1 %v16401_v2 }
  0xa3   : > { %10073 = vmatpush1.bf16.msra.mxu0 %v12315_v32  ;;  %10121 = vmatpush1.bf16.msra.mxu1 %v12315_v32  ;;  %v13047_v32 = vld [vmem:[%s12344_s29 + $0x72] ss:$2 sm:$0x3f] }
  0xa4   : > { %10075 = vmatprep.subr.bf16.mxu0 %v12319_v33  ;;  %10123 = vmatprep.subr.bf16.mxu1 %v12319_v33  ;;  %v8593_v33 = vld [vmem:[%s12344_s29 + $0x40] ss:$2 sm:$0xff] }
  0xa7   : > { %10077 = vmatpush1.bf16.msra.mxu0 %v12335_v38  ;;  %10125 = vmatpush1.bf16.msra.mxu1 %v12335_v38  ;;  %v8594_v38 = vld [vmem:[%s12344_s29 + $0x50] ss:$2 sm:$0xff] }
  0xa8   : > { %10079 = vmatprep.subr.bf16.mxu0 %v12339_v39  ;;  %10127 = vmatprep.subr.bf16.mxu1 %v12339_v39  ;;  %v8595_v39 = vld [vmem:[%s12344_s29 + $0x60] ss:$2 sm:$0xff] }
  0xaa   : > { %8625 = vmatmul.mubr.msk.f32.vlgmr.msra.gmra.mrb[8].mxu0 %vm496_vm0, %v8597_v9  ;;  %8637 = vmatmul.mubr.msk.f32.vlgmr.msra.gmra.mrb[8].mxu1 %vm496_vm0, %v13010_v14 }
  0xab   : > { %10081 = vmatpush1.bf16.msra.mxu0 %v12363_v45  ;;  %10129 = vmatpush1.bf16.msra.mxu1 %v12363_v45  ;;  %v8596_v45 = vld [vmem:[%s12344_s29 + $0x70] ss:$2 sm:$0x3f] }
  0xac   : > { %10083 = vmatprep.subr.bf16.mxu0 %v12370_v47  ;;  %10131 = vmatprep.subr.bf16.mxu1 %v12370_v47  ;;  %v13104_v47 = vld [vmem:[#allocation2 + $0x18] sm:$0xff] }
  0xad   : > { %1790 = vmatprep.mubr.f32.mxu0 %v16401_v2  ;;  %2000 = vmatprep.mubr.f32.mxu1 %v16401_v2 }
  0xae   : > { %8626 = vmatmul.mubr.msk.f32.gmra.mrb[10].mxu0 %vm496_vm0, %v8598_v15  ;;  %8638 = vmatmul.mubr.msk.f32.gmra.mrb[10].mxu1 %vm496_vm0, %v13021_v20 }
  0xaf   : > { %10085 = vmatpush1.bf16.msra.mxu0 %v12390_v52  ;;  %10133 = vmatpush1.bf16.msra.mxu1 %v12390_v52  ;;  %v8673_v52 = vld [vmem:[%s12344_s29 + $0x43] ss:$2 sm:$0xff] }
  0xb0   : > { %10087 = vmatprep.subr.bf16.mxu0 %v12400_v55  ;;  %10135 = vmatprep.subr.bf16.mxu1 %v12400_v55  ;;  %v8674_v55 = vld [vmem:[%s12344_s29 + $0x53] ss:$2 sm:$0xff] }
  0xb1   : > { %1796 = vmatprep.mubr.f32.mxu0 %v16401_v2  ;;  %2006 = vmatprep.mubr.f32.mxu1 %v16401_v2 }
  0xb2   : > { %8627 = vmatmul.mubr.msk.f32.gmra.mrb[12].mxu0 %vm496_vm0, %v8599_v21  ;;  %8639 = vmatmul.mubr.msk.f32.gmra.mrb[12].mxu1 %vm496_vm0, %v13034_v26 }
  0xb3   : > { %10089 = vmatpush1.bf16.msra.mxu0 %v12422_v60  ;;  %10137 = vmatpush1.bf16.msra.mxu1 %v12422_v60  ;;  %v8675_v60 = vld [vmem:[%s12344_s29 + $0x63] ss:$2 sm:$0xff] }
  0xb4   : > { %10091 = vmatprep.subr.bf16.mxu0 %v12432_v63  ;;  %10139 = vmatprep.subr.bf16.mxu1 %v12432_v63  ;;  %v8676_v63 = vld [vmem:[%s12344_s29 + $0x73] ss:$2 sm:$0x3f] }
  0xb5   : > { %1802 = vmatprep.mubr.f32.mxu0 %v16401_v2  ;;  %2012 = vmatprep.mubr.f32.mxu1 %v16401_v2 }
  0xb6   : > { %8628 = vmatmul.mubr.msk.f32.gmra.mrb[14].mxu0 %vm496_vm0, %v8600_v27  ;;  %8640 = vmatmul.mubr.msk.f32.gmra.mrb[14].mxu1 %vm496_vm0, %v13047_v32 }
  0xb7   : > { %10093 = vmatpush1.bf16.msra.mxu0 %v12454_v5  ;;  %10141 = vmatpush1.bf16.msra.mxu1 %v12454_v5  ;;  %v8709_v5 = vld [vmem:[%s12344_s29 + $0x44] ss:$2 sm:$0xff] }
  0xb8   : > { %10095 = vmatprep.subr.bf16.mxu0 %v12464_v11  ;;  %10143 = vmatprep.subr.bf16.mxu1 %v12464_v11  ;;  %v16403_v11 = vld [vmem:[#allocation10_spill] sm:$0xff] }
  0xb9   : > { %1885 = vmatprep.mubr.f32.mxu0 %v16401_v2  ;;  %2083 = vmatprep.mubr.f32.mxu1 %v16401_v2 }
  0xbb   : > { %10097 = vmatpush1.bf16.msra.mxu0 %v12486_v18  ;;  %10145 = vmatpush1.bf16.msra.mxu1 %v12486_v18  ;;  %v16404_v18 = vld [vmem:[#allocation11_spill] sm:$0xff] }
  0xbc   : > { %10099 = vmatprep.subr.bf16.mxu0 %v12490_v19  ;;  %10147 = vmatprep.subr.bf16.mxu1 %v12490_v19  ;;  %v13170_v19 = vld [vmem:[%s12344_s29 + $0x54] ss:$2 sm:$0xff] }
  0xbf   : > { %10101 = vmatpush1.bf16.msra.mxu0 %v12508_v28  ;;  %10149 = vmatpush1.bf16.msra.mxu1 %v12508_v28  ;;  %v16405_v28 = vld [vmem:[#allocation12_spill] sm:$0xff] }
  0xc0   : > { %10151 = vmatprep.subr.bf16.mxu0 %v12512_v29  ;;  %10175 = vmatprep.subr.bf16.mxu1 %v12512_v29  ;;  %v16406_v29 = vld [vmem:[#allocation13_spill] sm:$0xff] }
  0xc2   : > { %8629 = vmatmul.mubr.msk.f32.vlgmr.msra.gmra.mrb[8].mxu0 %vm496_vm0, %v8593_v33  ;;  %8641 = vmatmul.mubr.msk.f32.vlgmr.msra.gmra.mrb[8].mxu1 %vm496_vm0, %v8597_v9  ;;  %v8781_v9 = vld [vmem:[%s16338_s1 + $0x160] sm:$0xff]  ;;  %v2851_v33 = vld [vmem:[%s16338_s1 + $0x28] sm:$0xff] }
  0xc3   : > { %10153 = vmatpush1.bf16.msra.mxu0 %v12529_v37  ;;  %10177 = vmatpush1.bf16.msra.mxu1 %v12529_v37  ;;  %v13182_v37 = vld [vmem:[%s12344_s29 + $0x64] ss:$2 sm:$0xff] }
  0xc4   : > { %10155 = vmatprep.subr.bf16.mxu0 %v12533_v40  ;;  %10179 = vmatprep.subr.bf16.mxu1 %v12533_v40  ;;  %v16407_v40 = vld [vmem:[#allocation14_spill] sm:$0xff] }
  0xc5   : > { %1891 = vmatprep.mubr.f32.mxu0 %v16401_v2  ;;  %2089 = vmatprep.mubr.f32.mxu1 %v16401_v2 }
  0xc6   : > { %8630 = vmatmul.mubr.msk.f32.gmra.mrb[10].mxu0 %vm496_vm0, %v8594_v38  ;;  %8642 = vmatmul.mubr.msk.f32.gmra.mrb[10].mxu1 %vm496_vm0, %v8598_v15  ;;  %v2847_v15 = vld [vmem:[%s16338_s1 + $0x8] sm:$0xff]  ;;  %v2853_v38 = vld [vmem:[%s16338_s1 + $0x38] sm:$0xff] }
  0xc7   : > { %10157 = vmatpush1.bf16.msra.mxu0 %v12552_v49  ;;  %10181 = vmatpush1.bf16.msra.mxu1 %v12552_v49  ;;  %v13194_v49 = vld [vmem:[%s12344_s29 + $0x74] ss:$2 sm:$0x3f] }
  0xc8   : > { %10159 = vmatprep.subr.bf16.mxu0 %v12557_v51  ;;  %10183 = vmatprep.subr.bf16.mxu1 %v12557_v51  ;;  %v16408_v51 = vld [vmem:[#allocation15_spill] sm:$0xff] }
  0xc9   : > { %1897 = vmatprep.mubr.f32.mxu0 %v16401_v2  ;;  %2095 = vmatprep.mubr.f32.mxu1 %v16401_v2 }
  0xca   : > { %8631 = vmatmul.mubr.msk.f32.gmra.mrb[12].mxu0 %vm496_vm0, %v8595_v39  ;;  %8643 = vmatmul.mubr.msk.f32.gmra.mrb[12].mxu1 %vm496_vm0, %v8599_v21  ;;  %v13379_v39 = vld [vmem:[%s12344_s29 + $0x81] ss:$2 sm:$0xff] }
  0xcb   : > { %10161 = vmatpush1.bf16.msra.mxu0 %v12578_v59  ;;  %10185 = vmatpush1.bf16.msra.mxu1 %v12578_v59  ;;  %v8762_v59 = vld [vmem:[%s16338_s1 + $0xc8] sm:$0xff] }
  0xcc   : > { %10163 = vmatprep.subr.bf16.mxu0 %v12583_v1  ;;  %10187 = vmatprep.subr.bf16.mxu1 %v12583_v1  ;;  %v8764_v1 = vld [vmem:[%s16338_s1 + $0xd8] sm:$0xff] }
  0xcd   : > { %1903 = vmatprep.mubr.f32.mxu0 %v16401_v2  ;;  %2101 = vmatprep.mubr.f32.mxu1 %v16401_v2  ;;  %v8776_v2 = vld [vmem:[%s16338_s1 + $0x138] sm:$0xff] }
  0xce   : > { %8632 = vmatmul.mubr.msk.f32.gmra.mrb[14].mxu0 %vm496_vm0, %v8596_v45  ;;  %8644 = vmatmul.mubr.msk.f32.gmra.mrb[14].mxu1 %vm496_vm0, %v8600_v27  ;;  %v2846_v27 = vld [vmem:[%s16338_s1] sm:$0xff] }
  0xcf   : > { %10165 = vmatpush1.bf16.msra.mxu0 %v12604_v13  ;;  %10189 = vmatpush1.bf16.msra.mxu1 %v12604_v13  ;;  %v13219_v13 = vpack.c.bf16 %v8764_v1, %v8762_v59  ;;  %v13443_v1 = vld [vmem:[%s12344_s29 + $0xa1] ss:$2 sm:$0xff] }
  0xd0   : > { %10167 = vmatprep.subr.bf16.mxu0 %v12609_v17  ;;  %10191 = vmatprep.subr.bf16.mxu1 %v12609_v17  ;;  %v8761_v17 = vld [vmem:[%s16338_s1 + $0xc0] sm:$0xff] }
  0xd1   : > { %2196 = vmatprep.mubr.f32.mxu0 %v13104_v47  ;;  %2313 = vmatprep.mubr.f32.mxu1 %v13104_v47 }
  0xd3   : > { %10169 = vmatpush1.bf16.msra.mxu0 %v12630_v25  ;;  %10193 = vmatpush1.bf16.msra.mxu1 %v12630_v25  ;;  %v8763_v25 = vld [vmem:[%s16338_s1 + $0xd0] sm:$0xff] }
  0xd4   : > { %10171 = vmatprep.subr.bf16.mxu0 %v12634_v30  ;;  %10195 = vmatprep.subr.bf16.mxu1 %v12634_v30  ;;  %v8766_v30 = vld [vmem:[%s16338_s1 + $0xe8] sm:$0xff] }
  0xd7   : > { %10173 = vmatpush1.bf16.msra.mxu0 %v12652_v36  ;;  %10197 = vmatpush1.bf16.msra.mxu1 %v12652_v36  ;;  %v8768_v36 = vld [vmem:[%s16338_s1 + $0xf8] sm:$0xff] }
  0xd8   : > { %10199 = vmatprep.subr.bf16.mxu0 %v12656_v41  ;;  %10223 = vmatprep.subr.bf16.mxu1 %v12656_v41  ;;  %v8745_v41 = vld [vmem:[%s12344_s29 + $0x45] ss:$2 sm:$0xff] }
  0xda   : > { %8669 = vmatmul.mubr.msk.f32.vlgmr.msra.gmra.mrb[8].mxu0 %vm496_vm0, %v13010_v14  ;;  %8677 = vmatmul.mubr.msk.f32.vlgmr.msra.gmra.mrb[8].mxu1 %vm496_vm0, %v8673_v52  ;;  %v8783_v14 = vld [vmem:[%s16338_s1 + $0x170] sm:$0xff] }
  0xdb   : > { %10201 = vmatpush1.bf16.msra.mxu0 %v12675_v44  ;;  %10225 = vmatpush1.bf16.msra.mxu1 %v12675_v44  ;;  %v13236_v44 = vpack.c.bf16 %v8763_v25, %v8761_v17  ;;  %v13358_v21 = vpack.c.bf16 %v8783_v14, %v8781_v9  ;;  %v13446_v17 = vld [vmem:[%s12344_s29 + $0xa2] ss:$2 sm:$0xff]  ;;  %v8812_v14 = vld [vmem:[%s16338_s1 + $0x1b8] sm:$0xff] }
  0xdc   : > { %10203 = vmatprep.subr.bf16.mxu0 %v12679_v57  ;;  %10227 = vmatprep.subr.bf16.mxu1 %v12679_v57  ;;  %v8765_v57 = vld [vmem:[%s16338_s1 + $0xe0] sm:$0xff]  ;;  %v8810_v9 = vld [vmem:[%s16338_s1 + $0x1a8] sm:$0xff] }
  0xdd   : > { %2202 = vmatprep.mubr.f32.mxu0 %v13104_v47  ;;  %2319 = vmatprep.mubr.f32.mxu1 %v13104_v47 }
  0xde   : > { %8670 = vmatmul.mubr.msk.f32.gmra.mrb[10].mxu0 %vm496_vm0, %v13021_v20  ;;  %8678 = vmatmul.mubr.msk.f32.gmra.mrb[10].mxu1 %vm496_vm0, %v8674_v55  ;;  %v2849_v20 = vld [vmem:[%s16338_s1 + $0x18] sm:$0xff] }
  0xdf   : > { %10205 = vmatpush1.bf16.msra.mxu0 %v12699_v4  ;;  %10229 = vmatpush1.bf16.msra.mxu1 %v12699_v4  ;;  %v8767_v4 = vld [vmem:[%s16338_s1 + $0xf0] sm:$0xff] }
  0xe0   : > { %10207 = vmatprep.subr.bf16.mxu0 %v12706_v16  ;;  %10231 = vmatprep.subr.bf16.mxu1 %v12706_v16  ;;  %v13246_v16 = vpack.c.bf16 %v8768_v36, %v8766_v30  ;;  %v2858_v30 = vld [vmem:[%s16338_s1 + $0x60] sm:$0xff]  ;;  %v2860_v36 = vld [vmem:[%s16338_s1 + $0x70] sm:$0xff] }
  0xe1   : > { %2208 = vmatprep.mubr.f32.mxu0 %v13104_v47  ;;  %2325 = vmatprep.mubr.f32.mxu1 %v13104_v47 }
  0xe2   : > { %8671 = vmatmul.mubr.msk.f32.gmra.mrb[12].mxu0 %vm496_vm0, %v13034_v26  ;;  %8679 = vmatmul.mubr.msk.f32.gmra.mrb[12].mxu1 %vm496_vm0, %v8675_v60  ;;  %v13362_v26 = vpack.c.bf16 %v2849_v20, %v2847_v15  ;;  %v8753_v15 = vld [vmem:[%s12344_s29 + $0x80] ss:$2 sm:$0xff]  ;;  %v13547_v20 = vpack.c.bf16 %v8807_v22, %v8805_v31 }
  0xe3   : > { %10209 = vmatpush1.bf16.msra.mxu0 %v12728_v24  ;;  %10233 = vmatpush1.bf16.msra.mxu1 %v12728_v24  ;;  %v8770_v24 = vld [vmem:[%s16338_s1 + $0x108] sm:$0xff]  ;;  %v8825_v22 = vld [vmem:[%s16338_s1 + $0x220] sm:$0xff] }
  0xe4   : > { %10211 = vmatprep.subr.bf16.mxu0 %v12735_v6  ;;  %10235 = vmatprep.subr.bf16.mxu1 %v12735_v6  ;;  %v8772_v6 = vld [vmem:[%s16338_s1 + $0x118] sm:$0xff] }
  0xe5   : > { %2214 = vmatprep.mubr.f32.mxu0 %v13104_v47  ;;  %2331 = vmatprep.mubr.f32.mxu1 %v13104_v47 }
  0xe6   : > { %8672 = vmatmul.mubr.msk.f32.gmra.mrb[14].mxu0 %vm496_vm0, %v13047_v32  ;;  %8680 = vmatmul.mubr.msk.f32.gmra.mrb[14].mxu1 %vm496_vm0, %v8676_v63  ;;  %v2848_v32 = vld [vmem:[%s16338_s1 + $0x10] sm:$0xff] }
  0xe7   : > { %10213 = vmatpush1.bf16.msra.mxu0 %v12757_v43  ;;  %10237 = vmatpush1.bf16.msra.mxu1 %v12757_v43  ;;  %v8746_v43 = vld [vmem:[%s12344_s29 + $0x55] ss:$2 sm:$0xff]  ;;  %v13381_v45 = vpack.c.bf16 %v2848_v32, %v2846_v27  ;;  %v13551_v27 = vpack.c.bf16 %v8812_v14, %v8810_v9  ;;  %v8842_v9 = vld [vmem:[%s16338_s1 + $0x248] sm:$0xff] }
  0xe8   : > { %10215 = vmatprep.subr.bf16.mxu0 %v12764_v50  ;;  %10239 = vmatprep.subr.bf16.mxu1 %v12764_v50  ;;  %v13259_v50 = vpack.c.bf16 %v8767_v4, %v8765_v57  ;;  %v2865_v57 = vld [vmem:[%s16338_s1 + $0x98] sm:$0xff]  ;;  %v13472_v4 = vpack.c.bf16 %v2860_v36, %v2858_v30  ;;  %v8809_v32 = vld [vmem:[%s16338_s1 + $0x1a0] sm:$0xff] }
  0xe9   : > { %2434 = vmatprep.mubr.f32.mxu0 %v13104_v47  ;;  %2551 = vmatprep.mubr.f32.mxu1 %v13104_v47  ;;  %v8755_v30 = vld [vmem:[%s12344_s29 + $0xa0] ss:$2 sm:$0xff]  ;;  %v8844_v14 = vld [vmem:[%s16338_s1 + $0x258] sm:$0xff] }
  0xeb   : > { %10217 = vmatpush1.bf16.msra.mxu0 %v12786_v53  ;;  %10241 = vmatpush1.bf16.msra.mxu1 %v12786_v53  ;;  %v8769_v53 = vld [vmem:[%s16338_s1 + $0x100] sm:$0xff] }
  0xec   : > { %10219 = vmatprep.subr.bf16.mxu0 %v12790_v46  ;;  %10243 = vmatprep.subr.bf16.mxu1 %v12790_v46  ;;  %v8771_v46 = vld [vmem:[%s16338_s1 + $0x110] sm:$0xff] }
  0xef   : > { %10221 = vmatpush1.bf16.msra.mxu0 %v12808_v54  ;;  %10245 = vmatpush1.bf16.msra.mxu1 %v12808_v54  ;;  %v13271_v54 = vpack.c.bf16 %v8772_v6, %v8770_v24  ;;  %v13475_v24 = vld [vmem:[%s12344_s29 + $0xb1] ss:$2 sm:$0x3f]  ;;  %v13478_v6 = vld [vmem:[%s12344_s29 + $0xb2] ss:$2 sm:$0x3f] }
  0xf0   : > { %10247 = vmatprep.subr.bf16.mxu0 %v16403_v11  ;;  %10271 = vmatprep.subr.bf16.mxu1 %v16403_v11  ;;  %v2857_v11 = vld [vmem:[%s16338_s1 + $0x58] sm:$0xff] }
  0xf2   : > { %8705 = vmatmul.mubr.msk.f32.vlgmr.msra.gmra.mrb[8].mxu0 %vm496_vm0, %v8673_v52  ;;  %8713 = vmatmul.mubr.msk.f32.vlgmr.msra.gmra.mrb[8].mxu1 %vm496_vm0, %v8709_v5  ;;  %v13384_v52 = vld [vmem:[%s12344_s29 + $0x82] ss:$2 sm:$0xff] }
  0xf3   : > { %10249 = vmatpush1.bf16.msra.mxu0 %v16404_v18  ;;  %10273 = vmatpush1.bf16.msra.mxu1 %v16404_v18 }
  0xf4   : > { %10251 = vmatprep.subr.bf16.mxu0 %v16405_v28  ;;  %10275 = vmatprep.subr.bf16.mxu1 %v16405_v28  ;;  %v13414_v28 = vld [vmem:[%s12344_s29 + $0x92] ss:$2 sm:$0xff] }
  0xf5   : > { %2440 = vmatprep.mubr.f32.mxu0 %v13104_v47  ;;  %2557 = vmatprep.mubr.f32.mxu1 %v13104_v47 }
  0xf6   : > { %8706 = vmatmul.mubr.msk.f32.gmra.mrb[10].mxu0 %vm496_vm0, %v8674_v55  ;;  %8714 = vmatmul.mubr.msk.f32.gmra.mrb[10].mxu1 %vm496_vm0, %v13170_v19  ;;  %v13388_v55 = vpack.c.bf16 %v2853_v38, %v2851_v33  ;;  %v8811_v33 = vld [vmem:[%s16338_s1 + $0x1b0] sm:$0xff]  ;;  %v8814_v38 = vld [vmem:[%s16338_s1 + $0x1c8] sm:$0xff] }
  0xf7   : > { %10253 = vmatpush1.bf16.msra.mxu0 %v16406_v29  ;;  %10277 = vmatpush1.bf16.msra.mxu1 %v16406_v29 }
  0xf8   : > { %10255 = vmatprep.subr.bf16.mxu0 %v16407_v40  ;;  %10279 = vmatprep.subr.bf16.mxu1 %v16407_v40  ;;  %v2856_v40 = vld [vmem:[%s16338_s1 + $0x50] sm:$0xff] }
  0xf9   : > { %2446 = vmatprep.mubr.f32.mxu0 %v13104_v47  ;;  %2563 = vmatprep.mubr.f32.mxu1 %v13104_v47 }
  0xfa   : > { %8707 = vmatmul.mubr.msk.f32.gmra.mrb[12].mxu0 %vm496_vm0, %v8675_v60  ;;  %8715 = vmatmul.mubr.msk.f32.gmra.mrb[12].mxu1 %vm496_vm0, %v13182_v37  ;;  %v2850_v60 = vld [vmem:[%s16338_s1 + $0x20] sm:$0xff] }
  0xfb   : > { %10257 = vmatpush1.bf16.msra.mxu0 %v12884_v23  ;;  %10281 = vmatpush1.bf16.msra.mxu1 %v12884_v23  ;;  %v8773_v23 = vld [vmem:[%s16338_s1 + $0x120] sm:$0xff] }
  0xfc   : > { %10259 = vmatprep.subr.bf16.mxu0 %v16408_v51  ;;  %10283 = vmatprep.subr.bf16.mxu1 %v16408_v51  ;;  %v2861_v51 = vld [vmem:[%s16338_s1 + $0x78] sm:$0xff] }
  0xfd   : > { %2452 = vmatprep.mubr.f32.mxu0 %v13104_v47  ;;  %2569 = vmatprep.mubr.f32.mxu1 %v13104_v47 }
  0xfe   : > { %8708 = vmatmul.mubr.msk.f32.gmra.mrb[14].mxu0 %vm496_vm0, %v8676_v63  ;;  %8716 = vmatmul.mubr.msk.f32.gmra.mrb[14].mxu1 %vm496_vm0, %v13194_v49  ;;  %v2852_v63 = vld [vmem:[%s16338_s1 + $0x30] sm:$0xff] }
  0xff   : > { %10261 = vmatpush1.bf16.msra.mxu0 %v12913_v10  ;;  %10285 = vmatpush1.bf16.msra.mxu1 %v12913_v10  ;;  %v13297_v10 = vpack.c.bf16 %v8776_v2, %v8774_v0  ;;  %v13408_v18 = vpack.c.bf16 %v2852_v63, %v2850_v60  ;;  %v2867_v0 = vld [vmem:[%s16338_s1 + $0xa8] sm:$0xff]  ;;  %v2869_v2 = vld [vmem:[%s16338_s1 + $0xb8] sm:$0xff]  ;;  %v13570_v63 = vpack.c.bf16 %v8811_v33, %v8809_v32  ;;  %v8841_v33 = vld [vmem:[%s16338_s1 + $0x240] sm:$0xff] }
 0x100   : > { %10263 = vmatprep.subr.bf16.mxu0 %v12918_v58  ;;  %10287 = vmatprep.subr.bf16.mxu1 %v12918_v58  ;;  %v13285_v58 = vpack.c.bf16 %v8771_v46, %v8769_v53  ;;  %v2862_v53 = vld [vmem:[%s16338_s1 + $0x80] sm:$0xff]  ;;  %v2864_v46 = vld [vmem:[%s16338_s1 + $0x90] sm:$0xff]  ;;  %v8816_v60 = vld [vmem:[%s16338_s1 + $0x1d8] sm:$0xff]  ;;  %v13674_v32 = vpack.c.bf16 %v8844_v14, %v8842_v9 }
 0x101   : > { %2672 = vmatprep.mubr.f32.mxu0 %v13104_v47  ;;  %2789 = vmatprep.mubr.f32.mxu1 %v13104_v47  ;;  %v8855_v9 = vld [vmem:[%s16338_s1 + $0x2b0] sm:$0xff]  ;;  %v8858_v14 = vld [vmem:[%s16338_s1 + $0x2c8] sm:$0xff] }
 0x103   : > { %10265 = vmatpush1.bf16.msra.mxu0 %v12939_v7  ;;  %10289 = vmatpush1.bf16.msra.mxu1 %v12939_v7  ;;  %v13311_v7 = vpack.c.bf16 %v8775_v35, %v8773_v23  ;;  %v13508_v23 = vpack.c.bf16 %v2869_v2, %v2867_v0  ;;  %v2866_v35 = vld [vmem:[%s16338_s1 + $0xa0] sm:$0xff]  ;;  %v8756_v0 = vld [vmem:[%s12344_s29 + $0xb0] ss:$2 sm:$0x3f] }
 0x104   : > { %10267 = vmatprep.subr.bf16.mxu0 %v12943_v56  ;;  %10291 = vmatprep.subr.bf16.mxu1 %v12943_v56  ;;  %v13315_v56 = vpack.c.bf16 %v8780_v34, %v8778_v61  ;;  %v2868_v61 = vld [vmem:[%s16338_s1 + $0xb0] sm:$0xff]  ;;  %v8806_v34 = vld [vmem:[%s16338_s1 + $0x188] sm:$0xff] }
 0x107   : > { %10269 = vmatpush1.bf16.msra.mxu0 %v12955_v42  ;;  %10293 = vmatpush1.bf16.msra.mxu1 %v12955_v42  ;;  %v8779_v42 = vld [vmem:[%s16338_s1 + $0x150] sm:$0xff] }
 0x108   : > { %10295 = vmatprep.subr.bf16.mxu0 %v13219_v13  ;;  %10343 = vmatprep.subr.bf16.mxu1 %v13219_v13  ;;  %v13336_v3 = vpack.c.bf16 %v8779_v42, %v8777_v48  ;;  %v13526_v48 = vpack.c.bf16 %v2868_v61, %v2866_v35  ;;  %v8821_v35 = vld [vmem:[%s16338_s1 + $0x200] sm:$0xff]  ;;  %v8826_v61 = vld [vmem:[%s16338_s1 + $0x228] sm:$0xff] }
 0x10a   : > { %8741 = vmatmul.mubr.msk.f32.vlgmr.msra.gmra.mrb[8].mxu0 %vm496_vm0, %v8709_v5  ;;  %8749 = vmatmul.mubr.msk.f32.vlgmr.msra.gmra.mrb[8].mxu1 %vm496_vm0, %v8745_v41  ;;  %v2855_v5 = vld [vmem:[%s16338_s1 + $0x48] sm:$0xff] }
 0x10b   : > { %10297 = vmatpush1.bf16.msra.mxu0 %v13236_v44  ;;  %10345 = vmatpush1.bf16.msra.mxu1 %v13236_v44  ;;  %v13418_v29 = vpack.c.bf16 %v2857_v11, %v2855_v5  ;;  %v2863_v41 = vld [vmem:[%s16338_s1 + $0x88] sm:$0xff]  ;;  %v8754_v5 = vld [vmem:[%s12344_s29 + $0x90] ss:$2 sm:$0xff]  ;;  %v13575_v11 = vpack.c.bf16 %v8816_v60, %v8814_v38 }
 0x10c   : > { %2678 = vmatprep.mubr.f32.mxu0 %v13104_v47  ;;  %2795 = vmatprep.mubr.f32.mxu1 %v13104_v47  ;;  %v8843_v38 = vld [vmem:[%s16338_s1 + $0x250] sm:$0xff]  ;;  %v8846_v60 = vld [vmem:[%s16338_s1 + $0x268] sm:$0xff] }
 0x10d   : > { %10299 = vmatprep.subr.bf16.mxu0 %v13246_v16  ;;  %10347 = vmatprep.subr.bf16.mxu1 %v13246_v16 }
 0x10e   : > { %8742 = vmatmul.mubr.msk.f32.gmra.mrb[10].mxu0 %vm496_vm0, %v13170_v19  ;;  %8750 = vmatmul.mubr.msk.f32.gmra.mrb[10].mxu1 %vm496_vm0, %v8746_v43  ;;  %v13411_v19 = vld [vmem:[%s12344_s29 + $0x91] ss:$2 sm:$0xff]  ;;  %v13482_v43 = vpack.c.bf16 %v2865_v57, %v2863_v41  ;;  %v8817_v41 = vld [vmem:[%s16338_s1 + $0x1e0] sm:$0xff]  ;;  %v8822_v57 = vld [vmem:[%s16338_s1 + $0x208] sm:$0xff] }
 0x10f   : > { %10301 = vmatpush1.bf16.msra.mxu0 %v13259_v50  ;;  %10349 = vmatpush1.bf16.msra.mxu1 %v13259_v50 }
 0x110   : > { %2684 = vmatprep.mubr.f32.mxu0 %v13104_v47  ;;  %2801 = vmatprep.mubr.f32.mxu1 %v13104_v47 }
 0x111   : > { %10303 = vmatprep.subr.bf16.mxu0 %v13271_v54  ;;  %10351 = vmatprep.subr.bf16.mxu1 %v13271_v54 }
 0x112   : > { %8743 = vmatmul.mubr.msk.f32.gmra.mrb[12].mxu0 %vm496_vm0, %v13182_v37  ;;  %8751 = vmatmul.mubr.msk.f32.gmra.mrb[12].mxu1 %vm496_vm0, %v8747_v62  ;;  %v2854_v37 = vld [vmem:[%s16338_s1 + $0x40] sm:$0xff]  ;;  %v13504_v62 = vpack.c.bf16 %v2864_v46, %v2862_v53  ;;  %v8824_v53 = vld [vmem:[%s16338_s1 + $0x218] sm:$0xff] }
 0x113   : > { %10305 = vmatpush1.bf16.msra.mxu0 %v13285_v58  ;;  %10353 = vmatpush1.bf16.msra.mxu1 %v13285_v58  ;;  %v13440_v59 = vpack.c.bf16 %v2856_v40, %v2854_v37  ;;  %v8813_v37 = vld [vmem:[%s16338_s1 + $0x1c0] sm:$0xff]  ;;  %v8818_v40 = vld [vmem:[%s16338_s1 + $0x1e8] sm:$0xff]  ;;  %v13627_v2 = vpack.c.bf16 %v8824_v53, %v8822_v57 }
 0x114   : > { %2690 = vmatprep.mubr.f32.mxu0 %v13104_v47  ;;  %2807 = vmatprep.mubr.f32.mxu1 %v13104_v47  ;;  %v13720_v53 = vld [vmem:[%s12344_s29 + $0x93] ss:$2 sm:$0xff] }
 0x115   : > { %10307 = vmatprep.subr.bf16.mxu0 %v13297_v10  ;;  %10355 = vmatprep.subr.bf16.mxu1 %v13297_v10 }
 0x116   : > { %8744 = vmatmul.mubr.msk.f32.gmra.mrb[14].mxu0 %vm496_vm0, %v13194_v49  ;;  %8752 = vmatmul.mubr.msk.f32.gmra.mrb[14].mxu1 %vm496_vm0, %v8748_v12  ;;  %v2859_v49 = vld [vmem:[%s16338_s1 + $0x68] sm:$0xff]  ;;  %v8808_v12 = vld [vmem:[%s16338_s1 + $0x198] sm:$0xff] }
 0x117   : > { %10309 = vmatpush1.bf16.msra.mxu0 %v13311_v7  ;;  %10357 = vmatpush1.bf16.msra.mxu1 %v13311_v7  ;;  %v13450_v25 = vpack.c.bf16 %v2861_v51, %v2859_v49  ;;  %v13530_v42 = vpack.c.bf16 %v8808_v12, %v8806_v34  ;;  %v8820_v49 = vld [vmem:[%s16338_s1 + $0x1f8] sm:$0xff] }
 0x118   : > { %10311 = vmatprep.subr.bf16.mxu0 %v13315_v56  ;;  %10359 = vmatprep.subr.bf16.mxu1 %v13315_v56  ;;  %v13601_v36 = vpack.c.bf16 %v8820_v49, %v8818_v40  ;;  %v8828_v34 = vld [vmem:[%s16338_s1 + $0x238] sm:$0xff]  ;;  %v8845_v49 = vld [vmem:[%s16338_s1 + $0x260] sm:$0xff] }
 0x119   : > { %2986 = vmatprep.mubr.f32.mxu0 %v13104_v47  ;;  %3196 = vmatprep.mubr.f32.mxu1 %v13104_v47  ;;  %v13652_v31 = vpack.c.bf16 %v8828_v34, %v8826_v61  ;;  %v8856_v61 = vld [vmem:[%s16338_s1 + $0x2b8] sm:$0xff] }
 0x11b   : > { %10313 = vmatpush1.bf16.msra.mxu0 %v13336_v3  ;;  %10361 = vmatpush1.bf16.msra.mxu1 %v13336_v3 }
 0x11c   : > { %10315 = vmatprep.subr.bf16.mxu0 %v13340_v8  ;;  %10363 = vmatprep.subr.bf16.mxu1 %v13340_v8 }
 0x11f   : > { %10317 = vmatpush1.bf16.msra.mxu0 %v13358_v21  ;;  %10365 = vmatpush1.bf16.msra.mxu1 %v13358_v21 }
 0x120   : > { %10319 = vmatprep.subr.bf16.mxu0 %v13362_v26  ;;  %10367 = vmatprep.subr.bf16.mxu1 %v13362_v26 }
 0x122   : > { %8785 = vmatmul.mubr.msk.f32.vlgmr.msra.gmra.mrb[16].mxu0 %vm496_vm0, %v13379_v39  ;;  %8797 = vmatmul.mubr.msk.f32.vlgmr.msra.gmra.mrb[16].mxu1 %vm496_vm0, %v13384_v52 }
 0x123   : > { %10321 = vmatpush1.bf16.msra.mxu0 %v13381_v45  ;;  %10369 = vmatpush1.bf16.msra.mxu1 %v13381_v45 }
 0x124   : > { %10323 = vmatprep.subr.bf16.mxu0 %v13388_v55  ;;  %10371 = vmatprep.subr.bf16.mxu1 %v13388_v55 }
 0x125   : > { %2992 = vmatprep.mubr.f32.mxu0 %v13104_v47  ;;  %3202 = vmatprep.mubr.f32.mxu1 %v13104_v47 }
 0x126   : > { %8786 = vmatmul.mubr.msk.f32.gmra.mrb[18].mxu0 %vm496_vm0, %v13411_v19  ;;  %8798 = vmatmul.mubr.msk.f32.gmra.mrb[18].mxu1 %vm496_vm0, %v13414_v28 }
 0x127   : > { %10325 = vmatpush1.bf16.msra.mxu0 %v13408_v18  ;;  %10373 = vmatpush1.bf16.msra.mxu1 %v13408_v18 }
 0x128   : > { %10327 = vmatprep.subr.bf16.mxu0 %v13418_v29  ;;  %10375 = vmatprep.subr.bf16.mxu1 %v13418_v29 }
 0x129   : > { %2998 = vmatprep.mubr.f32.mxu0 %v13104_v47  ;;  %3208 = vmatprep.mubr.f32.mxu1 %v13104_v47 }
 0x12a   : > { %8787 = vmatmul.mubr.msk.f32.gmra.mrb[20].mxu0 %vm496_vm0, %v13443_v1  ;;  %8799 = vmatmul.mubr.msk.f32.gmra.mrb[20].mxu1 %vm496_vm0, %v13446_v17 }
 0x12b   : > { %10329 = vmatpush1.bf16.msra.mxu0 %v13440_v59  ;;  %10377 = vmatpush1.bf16.msra.mxu1 %v13440_v59 }
 0x12c   : > { %10331 = vmatprep.subr.bf16.mxu0 %v13450_v25  ;;  %10379 = vmatprep.subr.bf16.mxu1 %v13450_v25 }
 0x12d   : > { %3004 = vmatprep.mubr.f32.mxu0 %v13104_v47  ;;  %3214 = vmatprep.mubr.f32.mxu1 %v13104_v47 }
 0x12e   : > { %8788 = vmatmul.mubr.msk.f32.gmra.mrb[22].mxu0 %vm496_vm0, %v13475_v24  ;;  %8800 = vmatmul.mubr.msk.f32.gmra.mrb[22].mxu1 %vm496_vm0, %v13478_v6 }
 0x12f   : > { %10333 = vmatpush1.bf16.msra.mxu0 %v13472_v4  ;;  %10381 = vmatpush1.bf16.msra.mxu1 %v13472_v4 }
 0x130   : > { %10335 = vmatprep.subr.bf16.mxu0 %v13482_v43  ;;  %10383 = vmatprep.subr.bf16.mxu1 %v13482_v43 }
 0x131   : > { %3087 = vmatprep.mubr.f32.mxu0 %v13104_v47  ;;  %3285 = vmatprep.mubr.f32.mxu1 %v13104_v47 }
 0x133   : > { %10337 = vmatpush1.bf16.msra.mxu0 %v13504_v62  ;;  %10385 = vmatpush1.bf16.msra.mxu1 %v13504_v62 }
 0x134   : > { %10339 = vmatprep.subr.bf16.mxu0 %v13508_v23  ;;  %10387 = vmatprep.subr.bf16.mxu1 %v13508_v23 }
 0x137   : > { %10341 = vmatpush1.bf16.msra.mxu0 %v13526_v48  ;;  %10389 = vmatpush1.bf16.msra.mxu1 %v13526_v48 }
 0x138   : > { %10391 = vmatprep.subr.bf16.mxu0 %v13530_v42  ;;  %10415 = vmatprep.subr.bf16.mxu1 %v13530_v42 }
 0x13a   : > { %8789 = vmatmul.mubr.msk.f32.vlgmr.msra.gmra.mrb[16].mxu0 %vm496_vm0, %v8753_v15  ;;  %8801 = vmatmul.mubr.msk.f32.vlgmr.msra.gmra.mrb[16].mxu1 %vm496_vm0, %v13379_v39  ;;  %v8815_v39 = vld [vmem:[%s16338_s1 + $0x1d0] sm:$0xff] }
 0x13b   : > { %10393 = vmatpush1.bf16.msra.mxu0 %v13547_v20  ;;  %10417 = vmatpush1.bf16.msra.mxu1 %v13547_v20  ;;  %v13596_v51 = vpack.c.bf16 %v8815_v39, %v8813_v37  ;;  %v13691_v37 = vld [vmem:[%s12344_s29 + $0x83] ss:$2 sm:$0xff]  ;;  %v13693_v39 = vpack.c.bf16 %v8843_v38, %v8841_v33  ;;  %v8860_v33 = vld [vmem:[%s16338_s1 + $0x2d8] sm:$0xff] }
 0x13c   : > { %10395 = vmatprep.subr.bf16.mxu0 %v13551_v27  ;;  %10419 = vmatprep.subr.bf16.mxu1 %v13551_v27 }
 0x13d   : > { %3093 = vmatprep.mubr.f32.mxu0 %v13104_v47  ;;  %3291 = vmatprep.mubr.f32.mxu1 %v13104_v47 }
 0x13e   : > { %8790 = vmatmul.mubr.msk.f32.gmra.mrb[18].mxu0 %vm496_vm0, %v8754_v5  ;;  %8802 = vmatmul.mubr.msk.f32.gmra.mrb[18].mxu1 %vm496_vm0, %v13411_v19  ;;  %v8819_v19 = vld [vmem:[%s16338_s1 + $0x1f0] sm:$0xff]  ;;  %v8848_v5 = vld [vmem:[%s16338_s1 + $0x278] sm:$0xff] }
 0x13f   : > { %10397 = vmatpush1.bf16.msra.mxu0 %v13570_v63  ;;  %10421 = vmatpush1.bf16.msra.mxu1 %v13570_v63  ;;  %v13622_v46 = vpack.c.bf16 %v8819_v19, %v8817_v41  ;;  %v13697_v40 = vpack.c.bf16 %v8848_v5, %v8846_v60  ;;  %v8850_v41 = vld [vmem:[%s16338_s1 + $0x288] sm:$0xff]  ;;  %v8852_v19 = vld [vmem:[%s16338_s1 + $0x298] sm:$0xff]  ;;  %v13782_v5 = vpack.c.bf16 %v8860_v33, %v8858_v14  ;;  %v8877_v14 = vld [vmem:[%s16338_s1 + $0x300] sm:$0xff] }
 0x140   : > { %10399 = vmatprep.subr.bf16.mxu0 %v13575_v11  ;;  %10423 = vmatprep.subr.bf16.mxu1 %v13575_v11  ;;  %v13778_v60 = vld [vmem:[%s12344_s29 + $0xb3] ss:$2 sm:$0x3f] }
 0x141   : > { %3099 = vmatprep.mubr.f32.mxu0 %v13104_v47  ;;  %3297 = vmatprep.mubr.f32.mxu1 %v13104_v47  ;;  %16413 = vst [vmem:[#allocation14_spill] sm:$0xff] %v13782_v5  ;;  %v8879_v33 = vld [vmem:[%s16338_s1 + $0x310] sm:$0xff] }
 0x142   : > { %8791 = vmatmul.mubr.msk.f32.gmra.mrb[20].mxu0 %vm496_vm0, %v8755_v30  ;;  %8803 = vmatmul.mubr.msk.f32.gmra.mrb[20].mxu1 %vm496_vm0, %v13443_v1  ;;  %v8823_v1 = vld [vmem:[%s16338_s1 + $0x210] sm:$0xff] }
 0x143   : > { %10401 = vmatpush1.bf16.msra.mxu0 %v13596_v51  ;;  %10425 = vmatpush1.bf16.msra.mxu1 %v13596_v51  ;;  %v13648_v12 = vpack.c.bf16 %v8823_v1, %v8821_v35  ;;  %v8847_v30 = vld [vmem:[%s16338_s1 + $0x270] sm:$0xff]  ;;  %v8854_v1 = vld [vmem:[%s16338_s1 + $0x2a8] sm:$0xff] }
 0x144   : > { %10403 = vmatprep.subr.bf16.mxu0 %v13601_v36  ;;  %10427 = vmatprep.subr.bf16.mxu1 %v13601_v36  ;;  %v13717_v57 = vpack.c.bf16 %v8847_v30, %v8845_v49  ;;  %v8851_v35 = vld [vmem:[%s16338_s1 + $0x290] sm:$0xff]  ;;  %v8862_v30 = vld [vmem:[%s16338_s1 + $0x2e8] sm:$0xff] }
 0x145   : > { %3105 = vmatprep.mubr.f32.mxu0 %v13104_v47  ;;  %3303 = vmatprep.mubr.f32.mxu1 %v13104_v47  ;;  %v8859_v49 = vld [vmem:[%s16338_s1 + $0x2d0] sm:$0xff] }
 0x146   : > { %8792 = vmatmul.mubr.msk.f32.gmra.mrb[22].mxu0 %vm496_vm0, %v8756_v0  ;;  %8804 = vmatmul.mubr.msk.f32.gmra.mrb[22].mxu1 %vm496_vm0, %v13475_v24  ;;  %v8827_v24 = vld [vmem:[%s16338_s1 + $0x230] sm:$0xff]  ;;  %v13724_v0 = vpack.c.bf16 %v8852_v19, %v8850_v41  ;;  %v8864_v41 = vld [vmem:[%s16338_s1 + $0x2f8] sm:$0xff] }
 0x147   : > { %10405 = vmatpush1.bf16.msra.mxu0 %v13622_v46  ;;  %10429 = vmatpush1.bf16.msra.mxu1 %v13622_v46  ;;  %v13670_v15 = vpack.c.bf16 %v8827_v24, %v8825_v22  ;;  %v13749_v22 = vld [vmem:[%s12344_s29 + $0xa3] ss:$2 sm:$0xff]  ;;  %v13753_v24 = vpack.c.bf16 %v8856_v61, %v8854_v1  ;;  %v8880_v61 = vld [vmem:[%s16338_s1 + $0x318] sm:$0xff] }
 0x148   : > { %10407 = vmatprep.subr.bf16.mxu0 %v13627_v2  ;;  %10431 = vmatprep.subr.bf16.mxu1 %v13627_v2  ;;  %16409 = vst [vmem:[#allocation10_spill] sm:$0xff] %v13724_v0  ;;  %v8878_v1 = vld [vmem:[%s16338_s1 + $0x308] sm:$0xff] }
 0x149   : > { %3398 = vmatprep.mubr.f32.mxu0 %v13104_v47  ;;  %3515 = vmatprep.mubr.f32.mxu1 %v13104_v47  ;;  %16411 = vst [vmem:[#allocation12_spill] sm:$0xff] %v13753_v24 }
 0x14b   : > { %10409 = vmatpush1.bf16.msra.mxu0 %v13648_v12  ;;  %10433 = vmatpush1.bf16.msra.mxu1 %v13648_v12 }
 0x14c   : > { %10411 = vmatprep.subr.bf16.mxu0 %v13652_v31  ;;  %10435 = vmatprep.subr.bf16.mxu1 %v13652_v31 }
 0x14f   : > { %10413 = vmatpush1.bf16.msra.mxu0 %v13670_v15  ;;  %10437 = vmatpush1.bf16.msra.mxu1 %v13670_v15 }
 0x150   : > { %10439 = vmatprep.subr.bf16.mxu0 %v13674_v32  ;;  %10463 = vmatprep.subr.bf16.mxu1 %v13674_v32 }
 0x152   : > { %8829 = vmatmul.mubr.msk.f32.vlgmr.msra.gmra.mrb[16].mxu0 %vm496_vm0, %v13384_v52  ;;  %8837 = vmatmul.mubr.msk.f32.vlgmr.msra.gmra.mrb[16].mxu1 %vm496_vm0, %v13691_v37  ;;  %v8849_v52 = vld [vmem:[%s16338_s1 + $0x280] sm:$0xff] }
 0x153   : > { %10441 = vmatpush1.bf16.msra.mxu0 %v13693_v39  ;;  %10465 = vmatpush1.bf16.msra.mxu1 %v13693_v39  ;;  %v13746_v34 = vpack.c.bf16 %v8851_v35, %v8849_v52  ;;  %v13808_v52 = vpack.c.bf16 %v8864_v41, %v8862_v30  ;;  %v8861_v35 = vld [vmem:[%s16338_s1 + $0x2e0] sm:$0xff]  ;;  %v8882_v30 = vld [vmem:[%s16338_s1 + $0x328] sm:$0xff]  ;;  %v8884_v41 = vld [vmem:[%s16338_s1 + $0x338] sm:$0xff] }
 0x154   : > { %10443 = vmatprep.subr.bf16.mxu0 %v13697_v40  ;;  %10467 = vmatprep.subr.bf16.mxu1 %v13697_v40 }
 0x155   : > { %3404 = vmatprep.mubr.f32.mxu0 %v13104_v47  ;;  %3521 = vmatprep.mubr.f32.mxu1 %v13104_v47  ;;  %16410 = vst [vmem:[#allocation11_spill] sm:$0xff] %v13746_v34  ;;  %16415 = vst [vmem:[#allocation16_spill] sm:$0xff] %v13808_v52 }
 0x156   : > { %8830 = vmatmul.mubr.msk.f32.gmra.mrb[18].mxu0 %vm496_vm0, %v13414_v28  ;;  %8838 = vmatmul.mubr.msk.f32.gmra.mrb[18].mxu1 %vm496_vm0, %v13720_v53  ;;  %v8853_v28 = vld [vmem:[%s16338_s1 + $0x2a0] sm:$0xff] }
 0x157   : > { %10445 = vmatpush1.bf16.msra.mxu0 %v13717_v57  ;;  %10469 = vmatpush1.bf16.msra.mxu1 %v13717_v57  ;;  %v13775_v38 = vpack.c.bf16 %v8855_v9, %v8853_v28  ;;  %v13830_v9 = vpack.c.bf16 %v8880_v61, %v8878_v1 }
 0x158   : > { %10447 = vmatprep.subr.bf16.mxu0 %v13724_v0  ;;  %10471 = vmatprep.subr.bf16.mxu1 %v13724_v0  ;;  %v13888_v0 = vld [vmem:[%s12344_s29 + $0x94] ss:$2 sm:$0xff] }
 0x159   : > { %3410 = vmatprep.mubr.f32.mxu0 %v13104_v47  ;;  %3527 = vmatprep.mubr.f32.mxu1 %v13104_v47  ;;  %16412 = vst [vmem:[#allocation13_spill] sm:$0xff] %v13775_v38  ;;  %16417 = vst [vmem:[#allocation18_spill] sm:$0xff] %v13830_v9 }
 0x15a   : > { %8831 = vmatmul.mubr.msk.f32.gmra.mrb[20].mxu0 %vm496_vm0, %v13446_v17  ;;  %8839 = vmatmul.mubr.msk.f32.gmra.mrb[20].mxu1 %vm496_vm0, %v13749_v22  ;;  %v8857_v17 = vld [vmem:[%s16338_s1 + $0x2c0] sm:$0xff] }
 0x15b   : > { %10449 = vmatpush1.bf16.msra.mxu0 %v13746_v34  ;;  %10473 = vmatpush1.bf16.msra.mxu1 %v13746_v34  ;;  %v13804_v19 = vpack.c.bf16 %v8859_v49, %v8857_v17 }
 0x15c   : > { %10451 = vmatprep.subr.bf16.mxu0 %v13753_v24  ;;  %10475 = vmatprep.subr.bf16.mxu1 %v13753_v24 }
 0x15d   : > { %3416 = vmatprep.mubr.f32.mxu0 %v13104_v47  ;;  %3533 = vmatprep.mubr.f32.mxu1 %v13104_v47  ;;  %16414 = vst [vmem:[#allocation15_spill] sm:$0xff] %v13804_v19 }
 0x15e   : > { %8832 = vmatmul.mubr.msk.f32.gmra.mrb[22].mxu0 %vm496_vm0, %v13478_v6  ;;  %8840 = vmatmul.mubr.msk.f32.gmra.mrb[22].mxu1 %vm496_vm0, %v13778_v60  ;;  %v8863_v6 = vld [vmem:[%s16338_s1 + $0x2f0] sm:$0xff] }
 0x15f   : > { %10453 = vmatpush1.bf16.msra.mxu0 %v13775_v38  ;;  %10477 = vmatpush1.bf16.msra.mxu1 %v13775_v38  ;;  %v13826_v28 = vpack.c.bf16 %v8863_v6, %v8861_v35  ;;  %v8883_v38 = vld [vmem:[%s16338_s1 + $0x330] sm:$0xff] }
 0x160   : > { %10455 = vmatprep.subr.bf16.mxu0 %v13782_v5  ;;  %10479 = vmatprep.subr.bf16.mxu1 %v13782_v5  ;;  %v8881_v5 = vld [vmem:[%s16338_s1 + $0x320] sm:$0xff] }
 0x161   : > { %3636 = vmatprep.mubr.f32.mxu0 %v13104_v47  ;;  %3753 = vmatprep.mubr.f32.mxu1 %v13104_v47  ;;  %16416 = vst [vmem:[#allocation17_spill] sm:$0xff] %v13826_v28 }
 0x163   : > { %10457 = vmatpush1.bf16.msra.mxu0 %v13804_v19  ;;  %10481 = vmatpush1.bf16.msra.mxu1 %v13804_v19  ;;  %v13849_v19 = vpack.c.bf16 %v8879_v33, %v8877_v14 }
 0x164   : > { %10459 = vmatprep.subr.bf16.mxu0 %v13808_v52  ;;  %10483 = vmatprep.subr.bf16.mxu1 %v13808_v52  ;;  %v13847_v52 = vld [vmem:[%s12344_s29 + $0x84] ss:$2 sm:$0xff] }
 0x165   : > { %v1466_v17 = vpop.f32.mrb[0].mxu0  ;;  %v1583_v49 = vpop.f32.mrb[0].mxu1 }
 0x166   : > { %v1468_v35 = vpop.f32.mrb[1].mxu0  ;;  %v1585_v6 = vpop.f32.mrb[1].mxu1 }
 0x167   : > { %v1614_v1 = vmax.f32 %v1466_v17, %v1468_v35  ;;  %v1618_v61 = vmax.f32 %v1583_v49, %v1585_v6  ;;  %10461 = vmatpush1.bf16.msra.mxu0 %v13826_v28  ;;  %10485 = vmatpush1.bf16.msra.mxu1 %v13826_v28  ;;  %v13860_v17 = vld [vmem:[%s16339_s2] ss:$0 sm:$0xff]  ;;  %v13864_v49 = vpack.c.bf16 %v8884_v41, %v8882_v30  ;;  %v8886_v6 = vld [vmem:[%s16338_s1 + $0x348] sm:$0xff]  ;;  %v8888_v28 = vld [vmem:[%s16338_s1 + $0x358] sm:$0xff] }
 0x168   : > { %10487 = vmatprep.subr.bf16.mxu0 %v13830_v9  ;;  %10511 = vmatprep.subr.bf16.mxu1 %v13830_v9  ;;  %v13876_v30 = vpack.c.bf16 %v8883_v38, %v8881_v5  ;;  %v8885_v9 = vld [vmem:[%s16338_s1 + $0x340] sm:$0xff] }
 0x169   : > { %16418 = vst [vmem:[#allocation19_spill] sm:$0xff] %v13864_v49  ;;  %v1622_v14 = vmax.f32 %v1614_v1, %v1618_v61  ;;  %v1472_v33 = vpop.f32.mrb[2].mxu0  ;;  %v1589_v35 = vpop.f32.mrb[2].mxu1 }
 0x16a   : > { %v1474_v24 = vpop.f32.mrb[3].mxu0  ;;  %v1591_v34 = vpop.f32.mrb[3].mxu1  ;;  %8865 = vmatmul.mubr.msk.f32.vlgmr.msra.gmra.mrb[16].mxu0 %vm496_vm0, %v13691_v37  ;;  %8873 = vmatmul.mubr.msk.f32.vlgmr.msra.gmra.mrb[16].mxu1 %vm496_vm0, %v13847_v52  ;;  %16419 = vst [vmem:[#allocation20_spill] sm:$0xff] %v13876_v30  ;;  %v8887_v37 = vld [vmem:[%s16338_s1 + $0x350] sm:$0xff] }
 0x16b   : > { %v1632_v41 = vadd.f32 %v13860_v17, %v1622_v14  ;;  %v1615_v1 = vmax.f32 %v1472_v33, %v1474_v24  ;;  %v1619_v61 = vmax.f32 %v1589_v35, %v1591_v34  ;;  %10489 = vmatpush1.bf16.msra.mxu0 %v13849_v19  ;;  %10513 = vmatpush1.bf16.msra.mxu1 %v13849_v19  ;;  %v8890_v33 = vld [vmem:[%s16338_s1 + $0x368] sm:$0xff]  ;;  %v8892_v35 = vld [vmem:[%s16338_s1 + $0x378] sm:$0xff] }
 0x16c   : > { %10491 = vmatprep.subr.bf16.mxu0 %v13864_v49  ;;  %10515 = vmatprep.subr.bf16.mxu1 %v13864_v49  ;;  %v13892_v24 = vpack.c.bf16 %v8888_v28, %v8886_v6  ;;  %v13902_v6 = vpack.c.bf16 %v8887_v37, %v8885_v9  ;;  %v8889_v9 = vld [vmem:[%s16338_s1 + $0x360] sm:$0xff] }
 0x16d   : > { %v1636_v34 = vmax.f32 %v1632_v41, 0.0  ;;  %v1623_v38 = vmax.f32 %v1615_v1, %v1619_v61  ;;  %v1478_v5 = vpop.f32.mrb[4].mxu0  ;;  %v1595_v14 = vpop.f32.mrb[4].mxu1  ;;  %3642 = vmatprep.mubr.f32.mxu0 %v13104_v47  ;;  %3759 = vmatprep.mubr.f32.mxu1 %v13104_v47  ;;  %v13918_v37 = vld [vmem:[%s12344_s29 + $0xa4] ss:$2 sm:$0xff] }
 0x16e   : > { %16420 = vst [vmem:[#allocation21_spill] sm:$0xff] %v13892_v24  ;;  %v1480_v49 = vpop.f32.mrb[5].mxu0  ;;  %v1597_v28 = vpop.f32.mrb[5].mxu1  ;;  %8866 = vmatmul.mubr.msk.f32.gmra.mrb[18].mxu0 %vm496_vm0, %v13720_v53  ;;  %8874 = vmatmul.mubr.msk.f32.gmra.mrb[18].mxu1 %vm496_vm0, %v13888_v0  ;;  %v8891_v53 = vld [vmem:[%s16338_s1 + $0x370] sm:$0xff] }
 0x16f   : > { %1640 = vst [vmem:[#allocation2] sm:$0xff] %v1636_v34  ;;  %v1633_v41 = vadd.f32 %v13860_v17, %v1623_v38  ;;  %v1616_v1 = vmax.f32 %v1478_v5, %v1480_v49  ;;  %v1620_v61 = vmax.f32 %v1595_v14, %v1597_v28  ;;  %10493 = vmatpush1.bf16.msra.mxu0 %v13876_v30  ;;  %v8894_v28 = vld [vmem:[%s16338_s1 + $0x388] sm:$0xff] }
 0x170   : > { %10517 = vmatpush1.bf16.msra.mxu1 %v13876_v30  ;;  %10495 = vmatprep.subr.bf16.mxu0 %v13892_v24  ;;  %v13922_v49 = vpack.c.bf16 %v8892_v35, %v8890_v33  ;;  %v8896_v30 = vld [vmem:[%s16338_s1 + $0x398] sm:$0xff]  ;;  %v13932_v35 = vpack.c.bf16 %v8891_v53, %v8889_v9 }
 0x171   : > { %10519 = vmatprep.subr.bf16.mxu1 %v13892_v24  ;;  %v1637_v34 = vmax.f32 %v1633_v41, 0.0  ;;  %v1624_v38 = vmax.f32 %v1616_v1, %v1620_v61  ;;  %v1484_v5 = vpop.f32.mrb[6].mxu0  ;;  %v1601_v14 = vpop.f32.mrb[6].mxu1  ;;  %3648 = vmatprep.mubr.f32.mxu0 %v13104_v47  ;;  %v13942_v61 = vld [vmem:[%s12344_s29 + $0xb4] ss:$2 sm:$0x3f]  ;;  %v13946_v9 = vpack.c.bf16 %v8896_v30, %v8894_v28 }
 0x172   : > { %3765 = vmatprep.mubr.f32.mxu1 %v13104_v47  ;;  %v1486_v24 = vpop.f32.mrb[7].mxu0  ;;  %v1603_v33 = vpop.f32.mrb[7].mxu1  ;;  %8867 = vmatmul.mubr.msk.f32.gmra.mrb[20].mxu0 %vm496_vm0, %v13749_v22  ;;  %v8893_v22 = vld [vmem:[%s16338_s1 + $0x380] sm:$0xff]  ;;  %v8898_v30 = vld [vmem:[%s16338_s1 + $0x3a8] sm:$0xff] }
 0x173   : > { %8875 = vmatmul.mubr.msk.f32.gmra.mrb[20].mxu1 %vm496_vm0, %v13918_v37  ;;  %1641 = vst [vmem:[#allocation2 + $0x8] sm:$0xff] %v1637_v34  ;;  %v1634_v47 = vadd.f32 %v13860_v17, %v1624_v38  ;;  %v1617_v41 = vmax.f32 %v1484_v5, %v1486_v24  ;;  %v1621_v1 = vmax.f32 %v1601_v14, %v1603_v33  ;;  %v8895_v24 = vld [vmem:[%s16338_s1 + $0x390] sm:$0xff]  ;;  %v13954_v38 = vld [vmem:[#allocation2 + $0x18] sm:$0xff] }
 0x174   : > { %10497 = vmatpush1.bf16.msra.mxu0 %v13902_v6  ;;  %10521 = vmatpush1.bf16.msra.mxu1 %v13902_v6  ;;  %v8900_v5 = vld [vmem:[%s16338_s1 + $0x3b8] sm:$0xff]  ;;  %v13971_v28 = vpack.c.bf16 %v8895_v24, %v8893_v22  ;;  %v8905_v22 = vld [vmem:[%s12344_s29 + $0x85] ss:$2 sm:$0xff] }
 0x175   : > { %10499 = vmatprep.subr.bf16.mxu0 %v13922_v49  ;;  %10523 = vmatprep.subr.bf16.mxu1 %v13922_v49  ;;  %v1638_v53 = vmax.f32 %v1634_v47, 0.0  ;;  %v1625_v34 = vmax.f32 %v1617_v41, %v1621_v1  ;;  %v13975_v33 = vpack.c.bf16 %v8900_v5, %v8898_v30  ;;  %v8899_v47 = vld [vmem:[%s16338_s1 + $0x3b0] sm:$0xff] }
 0x176   : > { %3654 = vmatprep.mubr.f32.mxu0 %v13954_v38  ;;  %3771 = vmatprep.mubr.f32.mxu1 %v13954_v38  ;;  %v8906_v24 = vld [vmem:[%s12344_s29 + $0x95] ss:$2 sm:$0xff] }
 0x177   : > { %8868 = vmatmul.mubr.msk.f32.gmra.mrb[22].mxu0 %vm496_vm0, %v13778_v60  ;;  %8876 = vmatmul.mubr.msk.f32.gmra.mrb[22].mxu1 %vm496_vm0, %v13942_v61  ;;  %1642 = vst [vmem:[#allocation2 + $0x10] sm:$0xff] %v1638_v53  ;;  %v1635_v14 = vadd.f32 %v13860_v17, %v1625_v34  ;;  %v8897_v60 = vld [vmem:[%s16338_s1 + $0x3a0] sm:$0xff] }
 0x178   : > { %10501 = vmatpush1.bf16.msra.mxu0 %v13932_v35  ;;  %10525 = vmatpush1.bf16.msra.mxu1 %v13932_v35  ;;  %v13987_v1 = vpack.c.bf16 %v8899_v47, %v8897_v60 }
 0x179   : > { %10503 = vmatprep.subr.bf16.mxu0 %v13946_v9  ;;  %10527 = vmatprep.subr.bf16.mxu1 %v13946_v9  ;;  %v1639_v41 = vmax.f32 %v1635_v14, 0.0 }
 0x17a   : > { %3874 = vmatprep.mubr.f32.mxu0 %v13954_v38  ;;  %3991 = vmatprep.mubr.f32.mxu1 %v13954_v38 }
 0x17b   : > { %1643 = vst [vmem:[#allocation2 + $0x18] sm:$0x3f] %v1639_v41 }
 0x17c   : > { %10505 = vmatpush1.bf16.msra.mxu0 %v13971_v28  ;;  %10529 = vmatpush1.bf16.msra.mxu1 %v13971_v28 }
 0x17d   : > { %10507 = vmatprep.subr.bf16.mxu0 %v13975_v33  ;;  %10531 = vmatprep.subr.bf16.mxu1 %v13975_v33 }
 0x180   : > { %10509 = vmatpush1.bf16.msra.mxu0 %v13987_v1  ;;  %10533 = vmatpush1.bf16.msra.mxu1 %v13987_v1 }
 0x181   : > { %10535 = vmatprep.subr.bf16.mxu0 %v13219_v13  ;;  %10583 = vmatprep.subr.bf16.mxu1 %v13219_v13  ;;  %v8907_v13 = vld [vmem:[%s12344_s29 + $0xa5] ss:$2 sm:$0xff] }
 0x183   : > { %8901 = vmatmul.mubr.msk.f32.vlgmr.msra.gmra.mrb[16].mxu0 %vm496_vm0, %v13847_v52  ;;  %8909 = vmatmul.mubr.msk.f32.vlgmr.msra.gmra.mrb[16].mxu1 %vm496_vm0, %v8905_v22  ;;  %v16431_v22 = vld [vmem:[#allocation20_spill] sm:$0xff] }
 0x184   : > { %10537 = vmatpush1.bf16.msra.mxu0 %v13236_v44  ;;  %10585 = vmatpush1.bf16.msra.mxu1 %v13236_v44  ;;  %v8908_v44 = vld [vmem:[%s12344_s29 + $0xb5] ss:$2 sm:$0x3f] }
 0x185   : > { %3880 = vmatprep.mubr.f32.mxu0 %v13954_v38  ;;  %3997 = vmatprep.mubr.f32.mxu1 %v13954_v38 }
 0x186   : > { %10539 = vmatprep.subr.bf16.mxu0 %v13246_v16  ;;  %10587 = vmatprep.subr.bf16.mxu1 %v13246_v16  ;;  %v8917_v16 = vld [vmem:[%s12344_s29 + $0xc1] ss:$2 sm:$0xff] }
 0x187   : > { %8902 = vmatmul.mubr.msk.f32.gmra.mrb[18].mxu0 %vm496_vm0, %v13888_v0  ;;  %8910 = vmatmul.mubr.msk.f32.gmra.mrb[18].mxu1 %vm496_vm0, %v8906_v24  ;;  %v14228_v24 = vld [vmem:[%s12344_s29 + $0xe4] ss:$2 sm:$0xff] }
 0x188   : > { %10541 = vmatpush1.bf16.msra.mxu0 %v13259_v50  ;;  %10589 = vmatpush1.bf16.msra.mxu1 %v13259_v50  ;;  %v14043_v50 = vld [vmem:[%s12344_s29 + $0xc2] ss:$2 sm:$0xff] }
 0x189   : > { %3886 = vmatprep.mubr.f32.mxu0 %v13954_v38  ;;  %4003 = vmatprep.mubr.f32.mxu1 %v13954_v38 }
 0x18a   : > { %10543 = vmatprep.subr.bf16.mxu0 %v13271_v54  ;;  %10591 = vmatprep.subr.bf16.mxu1 %v13271_v54  ;;  %v8918_v54 = vld [vmem:[%s12344_s29 + $0xd1] ss:$2 sm:$0xff] }
 0x18b   : > { %8903 = vmatmul.mubr.msk.f32.gmra.mrb[20].mxu0 %vm496_vm0, %v13918_v37  ;;  %8911 = vmatmul.mubr.msk.f32.gmra.mrb[20].mxu1 %vm496_vm0, %v8907_v13  ;;  %v14214_v37 = vld [vmem:[%s12344_s29 + $0xd4] ss:$2 sm:$0xff] }
 0x18c   : > { %10545 = vmatpush1.bf16.msra.mxu0 %v13285_v58  ;;  %10593 = vmatpush1.bf16.msra.mxu1 %v13285_v58  ;;  %v14054_v58 = vld [vmem:[%s12344_s29 + $0xd2] ss:$2 sm:$0xff] }
 0x18d   : > { %3892 = vmatprep.mubr.f32.mxu0 %v13954_v38  ;;  %4009 = vmatprep.mubr.f32.mxu1 %v13954_v38  ;;  %v16432_v13 = vld [vmem:[#allocation21_spill] sm:$0xff] }
 0x18e   : > { %10547 = vmatprep.subr.bf16.mxu0 %v13297_v10  ;;  %10595 = vmatprep.subr.bf16.mxu1 %v13297_v10  ;;  %v8919_v10 = vld [vmem:[%s12344_s29 + $0xe1] ss:$2 sm:$0xff] }
 0x18f   : > { %8904 = vmatmul.mubr.msk.f32.gmra.mrb[22].mxu0 %vm496_vm0, %v13942_v61  ;;  %8912 = vmatmul.mubr.msk.f32.gmra.mrb[22].mxu1 %vm496_vm0, %v8908_v44  ;;  %v16430_v61 = vld [vmem:[#allocation19_spill] sm:$0xff] }
 0x190   : > { %10549 = vmatpush1.bf16.msra.mxu0 %v13311_v7  ;;  %10597 = vmatpush1.bf16.msra.mxu1 %v13311_v7  ;;  %v14067_v7 = vld [vmem:[%s12344_s29 + $0xe2] ss:$2 sm:$0xff] }
 0x191   : > { %10551 = vmatprep.subr.bf16.mxu0 %v13315_v56  ;;  %10599 = vmatprep.subr.bf16.mxu1 %v13315_v56  ;;  %v8920_v56 = vld [vmem:[%s12344_s29 + $0xf1] ss:$2 sm:$0x3f] }
 0x192   : > { %4188 = vmatprep.mubr.f32.mxu0 %v13954_v38  ;;  %4398 = vmatprep.mubr.f32.mxu1 %v13954_v38 }
 0x194   : > { %10553 = vmatpush1.bf16.msra.mxu0 %v13336_v3  ;;  %10601 = vmatpush1.bf16.msra.mxu1 %v13336_v3  ;;  %v14080_v3 = vld [vmem:[%s12344_s29 + $0xf2] ss:$2 sm:$0x3f] }
 0x195   : > { %10555 = vmatprep.subr.bf16.mxu0 %v13340_v8  ;;  %10603 = vmatprep.subr.bf16.mxu1 %v13340_v8  ;;  %v8913_v8 = vld [vmem:[%s12344_s29 + $0xc0] ss:$2 sm:$0xff] }
 0x198   : > { %10557 = vmatpush1.bf16.msra.mxu0 %v13358_v21  ;;  %10605 = vmatpush1.bf16.msra.mxu1 %v13358_v21  ;;  %v8914_v21 = vld [vmem:[%s12344_s29 + $0xd0] ss:$2 sm:$0xff] }
 0x199   : > { %10559 = vmatprep.subr.bf16.mxu0 %v13362_v26  ;;  %10607 = vmatprep.subr.bf16.mxu1 %v13362_v26  ;;  %v8915_v26 = vld [vmem:[%s12344_s29 + $0xe0] ss:$2 sm:$0xff] }
 0x19b   : > { %8945 = vmatmul.mubr.msk.f32.vlgmr.msra.gmra.mrb[24].mxu0 %vm496_vm0, %v8917_v16  ;;  %8957 = vmatmul.mubr.msk.f32.vlgmr.msra.gmra.mrb[24].mxu1 %vm496_vm0, %v14043_v50 }
 0x19c   : > { %10561 = vmatpush1.bf16.msra.mxu0 %v13381_v45  ;;  %10609 = vmatpush1.bf16.msra.mxu1 %v13381_v45  ;;  %v8916_v45 = vld [vmem:[%s12344_s29 + $0xf0] ss:$2 sm:$0x3f] }
 0x19d   : > { %10563 = vmatprep.subr.bf16.mxu0 %v13388_v55  ;;  %10611 = vmatprep.subr.bf16.mxu1 %v13388_v55  ;;  %v8993_v55 = vld [vmem:[%s12344_s29 + $0xc3] ss:$2 sm:$0xff] }
 0x19e   : > { %4194 = vmatprep.mubr.f32.mxu0 %v13954_v38  ;;  %4404 = vmatprep.mubr.f32.mxu1 %v13954_v38 }
 0x19f   : > { %8946 = vmatmul.mubr.msk.f32.gmra.mrb[26].mxu0 %vm496_vm0, %v8918_v54  ;;  %8958 = vmatmul.mubr.msk.f32.gmra.mrb[26].mxu1 %vm496_vm0, %v14054_v58 }
 0x1a0   : > { %10565 = vmatpush1.bf16.msra.mxu0 %v13408_v18  ;;  %10613 = vmatpush1.bf16.msra.mxu1 %v13408_v18  ;;  %v14154_v18 = vld [vmem:[%s12344_s29 + $0xd3] ss:$2 sm:$0xff] }
 0x1a1   : > { %10567 = vmatprep.subr.bf16.mxu0 %v13418_v29  ;;  %10615 = vmatprep.subr.bf16.mxu1 %v13418_v29  ;;  %v14167_v29 = vld [vmem:[%s12344_s29 + $0xe3] ss:$2 sm:$0xff] }
 0x1a2   : > { %4200 = vmatprep.mubr.f32.mxu0 %v13954_v38  ;;  %4410 = vmatprep.mubr.f32.mxu1 %v13954_v38 }
 0x1a3   : > { %8947 = vmatmul.mubr.msk.f32.gmra.mrb[28].mxu0 %vm496_vm0, %v8919_v10  ;;  %8959 = vmatmul.mubr.msk.f32.gmra.mrb[28].mxu1 %vm496_vm0, %v14067_v7 }
 0x1a4   : > { %10569 = vmatpush1.bf16.msra.mxu0 %v13440_v59  ;;  %10617 = vmatpush1.bf16.msra.mxu1 %v13440_v59  ;;  %v16421_v59 = vld [vmem:[#allocation10_spill] sm:$0xff] }
 0x1a5   : > { %10571 = vmatprep.subr.bf16.mxu0 %v13450_v25  ;;  %10619 = vmatprep.subr.bf16.mxu1 %v13450_v25  ;;  %v16422_v25 = vld [vmem:[#allocation11_spill] sm:$0xff] }
 0x1a6   : > { %4206 = vmatprep.mubr.f32.mxu0 %v13954_v38  ;;  %4416 = vmatprep.mubr.f32.mxu1 %v13954_v38 }
 0x1a7   : > { %8948 = vmatmul.mubr.msk.f32.gmra.mrb[30].mxu0 %vm496_vm0, %v8920_v56  ;;  %8960 = vmatmul.mubr.msk.f32.gmra.mrb[30].mxu1 %vm496_vm0, %v14080_v3 }
 0x1a8   : > { %10573 = vmatpush1.bf16.msra.mxu0 %v13472_v4  ;;  %10621 = vmatpush1.bf16.msra.mxu1 %v13472_v4  ;;  %v14180_v4 = vld [vmem:[%s12344_s29 + $0xf3] ss:$2 sm:$0x3f] }
 0x1a9   : > { %10575 = vmatprep.subr.bf16.mxu0 %v13482_v43  ;;  %10623 = vmatprep.subr.bf16.mxu1 %v13482_v43  ;;  %v16423_v43 = vld [vmem:[#allocation12_spill] sm:$0xff] }
 0x1aa   : > { %4289 = vmatprep.mubr.f32.mxu0 %v13954_v38  ;;  %4487 = vmatprep.mubr.f32.mxu1 %v13954_v38 }
 0x1ac   : > { %10577 = vmatpush1.bf16.msra.mxu0 %v13504_v62  ;;  %10625 = vmatpush1.bf16.msra.mxu1 %v13504_v62  ;;  %v16424_v62 = vld [vmem:[#allocation13_spill] sm:$0xff] }
 0x1ad   : > { %10579 = vmatprep.subr.bf16.mxu0 %v13508_v23  ;;  %10627 = vmatprep.subr.bf16.mxu1 %v13508_v23  ;;  %v16425_v23 = vld [vmem:[#allocation14_spill] sm:$0xff] }
 0x1b0   : > { %10581 = vmatpush1.bf16.msra.mxu0 %v13526_v48  ;;  %10629 = vmatpush1.bf16.msra.mxu1 %v13526_v48  ;;  %v16426_v48 = vld [vmem:[#allocation15_spill] sm:$0xff] }
 0x1b1   : > { %10631 = vmatprep.subr.bf16.mxu0 %v13530_v42  ;;  %10655 = vmatprep.subr.bf16.mxu1 %v13530_v42  ;;  %v16427_v42 = vld [vmem:[#allocation16_spill] sm:$0xff] }
 0x1b3   : > { %8949 = vmatmul.mubr.msk.f32.vlgmr.msra.gmra.mrb[24].mxu0 %vm496_vm0, %v8913_v8  ;;  %8961 = vmatmul.mubr.msk.f32.vlgmr.msra.gmra.mrb[24].mxu1 %vm496_vm0, %v8917_v16  ;;  %v14242_v8 = vld [vmem:[%s12344_s29 + $0xf4] ss:$2 sm:$0x3f] }
 0x1b4   : > { %10633 = vmatpush1.bf16.msra.mxu0 %v13547_v20  ;;  %10657 = vmatpush1.bf16.msra.mxu1 %v13547_v20 }
 0x1b5   : > { %10635 = vmatprep.subr.bf16.mxu0 %v13551_v27  ;;  %10659 = vmatprep.subr.bf16.mxu1 %v13551_v27 }
 0x1b6   : > { %4295 = vmatprep.mubr.f32.mxu0 %v13954_v38  ;;  %4493 = vmatprep.mubr.f32.mxu1 %v13954_v38 }
 0x1b7   : > { %8950 = vmatmul.mubr.msk.f32.gmra.mrb[26].mxu0 %vm496_vm0, %v8914_v21  ;;  %8962 = vmatmul.mubr.msk.f32.gmra.mrb[26].mxu1 %vm496_vm0, %v8918_v54 }
 0x1b8   : > { %10637 = vmatpush1.bf16.msra.mxu0 %v13570_v63  ;;  %10661 = vmatpush1.bf16.msra.mxu1 %v13570_v63 }
 0x1b9   : > { %10639 = vmatprep.subr.bf16.mxu0 %v13575_v11  ;;  %10663 = vmatprep.subr.bf16.mxu1 %v13575_v11 }
 0x1ba   : > { %4301 = vmatprep.mubr.f32.mxu0 %v13954_v38  ;;  %4499 = vmatprep.mubr.f32.mxu1 %v13954_v38 }
 0x1bb   : > { %8951 = vmatmul.mubr.msk.f32.gmra.mrb[28].mxu0 %vm496_vm0, %v8915_v26  ;;  %8963 = vmatmul.mubr.msk.f32.gmra.mrb[28].mxu1 %vm496_vm0, %v8919_v10 }
 0x1bc   : > { %10641 = vmatpush1.bf16.msra.mxu0 %v13596_v51  ;;  %10665 = vmatpush1.bf16.msra.mxu1 %v13596_v51 }
 0x1bd   : > { %10643 = vmatprep.subr.bf16.mxu0 %v13601_v36  ;;  %10667 = vmatprep.subr.bf16.mxu1 %v13601_v36 }
 0x1be   : > { %4307 = vmatprep.mubr.f32.mxu0 %v13954_v38  ;;  %4505 = vmatprep.mubr.f32.mxu1 %v13954_v38 }
 0x1bf   : > { %8952 = vmatmul.mubr.msk.f32.gmra.mrb[30].mxu0 %vm496_vm0, %v8916_v45  ;;  %8964 = vmatmul.mubr.msk.f32.gmra.mrb[30].mxu1 %vm496_vm0, %v8920_v56  ;;  %v9074_v45 = vld [vmem:[%s16340_s3 + $0x108] sm:$0xff] }
 0x1c0   : > { %10645 = vmatpush1.bf16.msra.mxu0 %v13622_v46  ;;  %10669 = vmatpush1.bf16.msra.mxu1 %v13622_v46  ;;  %v16428_v46 = vld [vmem:[#allocation17_spill] sm:$0xff] }
 0x1c1   : > { %10647 = vmatprep.subr.bf16.mxu0 %v13627_v2  ;;  %10671 = vmatprep.subr.bf16.mxu1 %v13627_v2  ;;  %v14203_v2 = vld [vmem:[%s12344_s29 + $0xc4] ss:$2 sm:$0xff] }
 0x1c2   : > { %4600 = vmatprep.mubr.f32.mxu0 %v13954_v38  ;;  %4717 = vmatprep.mubr.f32.mxu1 %v13954_v38 }
 0x1c4   : > { %10649 = vmatpush1.bf16.msra.mxu0 %v13648_v12  ;;  %10673 = vmatpush1.bf16.msra.mxu1 %v13648_v12  ;;  %v16429_v12 = vld [vmem:[#allocation18_spill] sm:$0xff] }
 0x1c5   : > { %10651 = vmatprep.subr.bf16.mxu0 %v13652_v31  ;;  %10675 = vmatprep.subr.bf16.mxu1 %v13652_v31 }
 0x1c8   : > { %10653 = vmatpush1.bf16.msra.mxu0 %v13670_v15  ;;  %10677 = vmatpush1.bf16.msra.mxu1 %v13670_v15 }
 0x1c9   : > { %10679 = vmatprep.subr.bf16.mxu0 %v13674_v32  ;;  %10703 = vmatprep.subr.bf16.mxu1 %v13674_v32 }
 0x1cb   : > { %8989 = vmatmul.mubr.msk.f32.vlgmr.msra.gmra.mrb[24].mxu0 %vm496_vm0, %v14043_v50  ;;  %8997 = vmatmul.mubr.msk.f32.vlgmr.msra.gmra.mrb[24].mxu1 %vm496_vm0, %v8993_v55 }
 0x1cc   : > { %10681 = vmatpush1.bf16.msra.mxu0 %v13693_v39  ;;  %10705 = vmatpush1.bf16.msra.mxu1 %v13693_v39 }
 0x1cd   : > { %10683 = vmatprep.subr.bf16.mxu0 %v13697_v40  ;;  %10707 = vmatprep.subr.bf16.mxu1 %v13697_v40 }
 0x1ce   : > { %4606 = vmatprep.mubr.f32.mxu0 %v13954_v38  ;;  %4723 = vmatprep.mubr.f32.mxu1 %v13954_v38 }
 0x1cf   : > { %8990 = vmatmul.mubr.msk.f32.gmra.mrb[26].mxu0 %vm496_vm0, %v14054_v58  ;;  %8998 = vmatmul.mubr.msk.f32.gmra.mrb[26].mxu1 %vm496_vm0, %v14154_v18 }
 0x1d0   : > { %10685 = vmatpush1.bf16.msra.mxu0 %v13717_v57  ;;  %10709 = vmatpush1.bf16.msra.mxu1 %v13717_v57 }
 0x1d1   : > { %10687 = vmatprep.subr.bf16.mxu0 %v16421_v59  ;;  %10711 = vmatprep.subr.bf16.mxu1 %v16421_v59  ;;  %v9077_v59 = vld [vmem:[%s16340_s3 + $0x120] sm:$0xff] }
 0x1d2   : > { %4612 = vmatprep.mubr.f32.mxu0 %v13954_v38  ;;  %4729 = vmatprep.mubr.f32.mxu1 %v13954_v38 }
 0x1d3   : > { %8991 = vmatmul.mubr.msk.f32.gmra.mrb[28].mxu0 %vm496_vm0, %v14067_v7  ;;  %8999 = vmatmul.mubr.msk.f32.gmra.mrb[28].mxu1 %vm496_vm0, %v14167_v29 }
 0x1d4   : > { %10689 = vmatpush1.bf16.msra.mxu0 %v16422_v25  ;;  %10713 = vmatpush1.bf16.msra.mxu1 %v16422_v25  ;;  %v9079_v25 = vld [vmem:[%s16340_s3 + $0x130] sm:$0xff] }
 0x1d5   : > { %10691 = vmatprep.subr.bf16.mxu0 %v16423_v43  ;;  %10715 = vmatprep.subr.bf16.mxu1 %v16423_v43  ;;  %v9084_v43 = vld [vmem:[%s16340_s3 + $0x158] sm:$0xff] }
 0x1d6   : > { %4618 = vmatprep.mubr.f32.mxu0 %v13954_v38  ;;  %4735 = vmatprep.mubr.f32.mxu1 %v13954_v38 }
 0x1d7   : > { %8992 = vmatmul.mubr.msk.f32.gmra.mrb[30].mxu0 %vm496_vm0, %v14080_v3  ;;  %9000 = vmatmul.mubr.msk.f32.gmra.mrb[30].mxu1 %vm496_vm0, %v14180_v4 }
 0x1d8   : > { %10693 = vmatpush1.bf16.msra.mxu0 %v16424_v62  ;;  %10717 = vmatpush1.bf16.msra.mxu1 %v16424_v62  ;;  %v9066_v62 = vld [vmem:[%s12344_s29 + $0xd5] ss:$2 sm:$0xff] }
 0x1d9   : > { %10695 = vmatprep.subr.bf16.mxu0 %v16425_v23  ;;  %10719 = vmatprep.subr.bf16.mxu1 %v16425_v23  ;;  %v14310_v23 = vpack.c.bf16 %v9079_v25, %v9077_v59  ;;  %v5259_v59 = vld [vmem:[%s16340_s3 + $0x40] sm:$0xff]  ;;  %v5261_v25 = vld [vmem:[%s16340_s3 + $0x50] sm:$0xff] }
 0x1da   : > { %4838 = vmatprep.mubr.f32.mxu0 %v13954_v38  ;;  %4955 = vmatprep.mubr.f32.mxu1 %v13954_v38 }
 0x1dc   : > { %10697 = vmatpush1.bf16.msra.mxu0 %v16426_v48  ;;  %10721 = vmatpush1.bf16.msra.mxu1 %v16426_v48  ;;  %v9081_v48 = vld [vmem:[%s16340_s3 + $0x140] sm:$0xff] }
 0x1dd   : > { %10699 = vmatprep.subr.bf16.mxu0 %v16427_v42  ;;  %10723 = vmatprep.subr.bf16.mxu1 %v16427_v42  ;;  %v2674_v20 = vpop.f32.mrb[8].mxu0  ;;  %v2791_v27 = vpop.f32.mrb[8].mxu1  ;;  %v9083_v42 = vld [vmem:[%s16340_s3 + $0x150] sm:$0xff] }
 0x1de   : > { %v2676_v63 = vpop.f32.mrb[9].mxu0  ;;  %v2793_v11 = vpop.f32.mrb[9].mxu1 }
 0x1df   : > { %v2822_v51 = vmax.f32 %v2674_v20, %v2676_v63  ;;  %v2826_v36 = vmax.f32 %v2791_v27, %v2793_v11  ;;  %v9086_v27 = vld [vmem:[%s16340_s3 + $0x168] sm:$0xff]  ;;  %v9088_v63 = vld [vmem:[%s16340_s3 + $0x178] sm:$0xff] }
 0x1e0   : > { %10701 = vmatpush1.bf16.msra.mxu0 %v16428_v46  ;;  %10725 = vmatpush1.bf16.msra.mxu1 %v16428_v46  ;;  %v9067_v11 = vld [vmem:[%s12344_s29 + $0xe5] ss:$2 sm:$0xff] }
 0x1e1   : > { %10727 = vmatprep.subr.bf16.mxu0 %v16429_v12  ;;  %10751 = vmatprep.subr.bf16.mxu1 %v16429_v12  ;;  %v2830_v31 = vmax.f32 %v2822_v51, %v2826_v36  ;;  %v2680_v15 = vpop.f32.mrb[10].mxu0  ;;  %v2797_v32 = vpop.f32.mrb[10].mxu1  ;;  %v14336_v51 = vpack.c.bf16 %v9083_v42, %v9081_v48  ;;  %v9085_v36 = vld [vmem:[%s16340_s3 + $0x160] sm:$0xff]  ;;  %v9087_v46 = vld [vmem:[%s16340_s3 + $0x170] sm:$0xff]  ;;  %v9090_v12 = vld [vmem:[%s16340_s3 + $0x188] sm:$0xff]  ;;  %v10816_v48 = vpack.c.bf16 %v5261_v25, %v5259_v59 }
 0x1e2   : > { %v2682_v39 = vpop.f32.mrb[11].mxu0  ;;  %v2799_v40 = vpop.f32.mrb[11].mxu1 }
 0x1e3   : > { %9025 = vmatmul.mubr.msk.f32.vlgmr.msra.gmra.mrb[24].mxu0 %vm496_vm0, %v8993_v55  ;;  %9033 = vmatmul.mubr.msk.f32.vlgmr.msra.gmra.mrb[24].mxu1 %vm496_vm0, %v14203_v2  ;;  %v2834_v57 = vadd.f32 %v13860_v17, %v2830_v31  ;;  %v2823_v0 = vmax.f32 %v2680_v15, %v2682_v39  ;;  %v2827_v52 = vmax.f32 %v2797_v32, %v2799_v40  ;;  %v9075_v55 = vld [vmem:[%s16340_s3 + $0x110] sm:$0xff]  ;;  %v9092_v31 = vld [vmem:[%s16340_s3 + $0x198] sm:$0xff]  ;;  %v9089_v40 = vld [vmem:[%s16340_s3 + $0x180] sm:$0xff] }
 0x1e4   : > { %10729 = vmatpush1.bf16.msra.mxu0 %v13849_v19  ;;  %10753 = vmatpush1.bf16.msra.mxu1 %v13849_v19  ;;  %v9068_v15 = vld [vmem:[%s12344_s29 + $0xf5] ss:$2 sm:$0x3f]  ;;  %v14362_v32 = vpack.c.bf16 %v9087_v46, %v9085_v36  ;;  %v14366_v39 = vpack.c.bf16 %v9092_v31, %v9090_v12 }
 0x1e5   : > { %10731 = vmatprep.subr.bf16.mxu0 %v16430_v61  ;;  %10755 = vmatprep.subr.bf16.mxu1 %v16430_v61  ;;  %v2838_v53 = vmax.f32 %v2834_v57, 0.0  ;;  %v2831_v34 = vmax.f32 %v2823_v0, %v2827_v52  ;;  %v2686_v30 = vpop.f32.mrb[12].mxu0  ;;  %v2803_v5 = vpop.f32.mrb[12].mxu1  ;;  %v9091_v57 = vld [vmem:[%s16340_s3 + $0x190] sm:$0xff]  ;;  %v9094_v0 = vld [vmem:[%s16340_s3 + $0x1a8] sm:$0xff]  ;;  %v9096_v52 = vld [vmem:[%s16340_s3 + $0x1b8] sm:$0xff] }
 0x1e6   : > { %4844 = vmatprep.mubr.f32.mxu0 %v13954_v38  ;;  %4961 = vmatprep.mubr.f32.mxu1 %v13954_v38  ;;  %v2688_v14 = vpop.f32.mrb[13].mxu0  ;;  %v2805_v60 = vpop.f32.mrb[13].mxu1  ;;  %v14391_v61 = vpack.c.bf16 %v9096_v52, %v9094_v0  ;;  %v5270_v12 = vld [vmem:[%s16340_s3 + $0x98] sm:$0xff]  ;;  %v5272_v52 = vld [vmem:[%s16340_s3 + $0xa8] sm:$0xff] }
 0x1e7   : > { %9026 = vmatmul.mubr.msk.f32.gmra.mrb[26].mxu0 %vm496_vm0, %v14154_v18  ;;  %9034 = vmatmul.mubr.msk.f32.gmra.mrb[26].mxu1 %vm496_vm0, %v14214_v37  ;;  %2842 = vst [vmem:[#allocation2 + $0x20] sm:$0xff] %v2838_v53  ;;  %v2835_v19 = vadd.f32 %v13860_v17, %v2831_v34  ;;  %v2824_v47 = vmax.f32 %v2686_v30, %v2688_v14  ;;  %v9078_v18 = vld [vmem:[%s16340_s3 + $0x128] sm:$0xff]  ;;  %v9093_v53 = vld [vmem:[%s16340_s3 + $0x1a0] sm:$0xff]  ;;  %v9095_v34 = vld [vmem:[%s16340_s3 + $0x1b0] sm:$0xff] }
 0x1e8   : > { %v2828_v41 = vmax.f32 %v2803_v5, %v2805_v60  ;;  %10733 = vmatpush1.bf16.msra.mxu0 %v16431_v22  ;;  %10757 = vmatpush1.bf16.msra.mxu1 %v16431_v22  ;;  %v9098_v30 = vld [vmem:[%s16340_s3 + $0x1c8] sm:$0xff]  ;;  %v9100_v5 = vld [vmem:[%s16340_s3 + $0x1d8] sm:$0xff]  ;;  %v14409_v14 = vpack.c.bf16 %v9095_v34, %v9093_v53 }
 0x1e9   : > { %10735 = vmatprep.subr.bf16.mxu0 %v16432_v13  ;;  %10759 = vmatprep.subr.bf16.mxu1 %v16432_v13  ;;  %v2839_v44 = vmax.f32 %v2835_v19, 0.0  ;;  %v2692_v50 = vpop.f32.mrb[14].mxu0  ;;  %v2809_v54 = vpop.f32.mrb[14].mxu1  ;;  %v14413_v60 = vpack.c.bf16 %v9100_v5, %v9098_v30  ;;  %v9097_v19 = vld [vmem:[%s16340_s3 + $0x1c0] sm:$0xff]  ;;  %v9104_v22 = vld [vmem:[%s16340_s3 + $0x1f8] sm:$0xff] }
 0x1ea   : > { %v2832_v16 = vmax.f32 %v2824_v47, %v2828_v41  ;;  %4850 = vmatprep.mubr.f32.mxu0 %v13954_v38  ;;  %4967 = vmatprep.mubr.f32.mxu1 %v13954_v38  ;;  %v2694_v58 = vpop.f32.mrb[15].mxu0  ;;  %v2811_v10 = vpop.f32.mrb[15].mxu1  ;;  %v9099_v47 = vld [vmem:[%s16340_s3 + $0x1d0] sm:$0xff]  ;;  %v9102_v41 = vld [vmem:[%s16340_s3 + $0x1e8] sm:$0xff]  ;;  %v5274_v53 = vld [vmem:[%s16340_s3 + $0xb8] sm:$0xff] }
 0x1eb   : > { %9027 = vmatmul.mubr.msk.f32.gmra.mrb[28].mxu0 %vm496_vm0, %v14167_v29  ;;  %9035 = vmatmul.mubr.msk.f32.gmra.mrb[28].mxu1 %vm496_vm0, %v14228_v24  ;;  %2843 = vst [vmem:[#allocation2 + $0x28] sm:$0xff] %v2839_v44  ;;  %v2825_v56 = vmax.f32 %v2692_v50, %v2694_v58  ;;  %v2829_v3 = vmax.f32 %v2809_v54, %v2811_v10  ;;  %v9101_v44 = vld [vmem:[%s16340_s3 + $0x1e0] sm:$0xff]  ;;  %v5252_v50 = vld [vmem:[%s16340_s3 + $0x8] sm:$0xff]  ;;  %v5254_v54 = vld [vmem:[%s16340_s3 + $0x18] sm:$0xff] }
 0x1ec   : > { %v2836_v7 = vadd.f32 %v13860_v17, %v2832_v16  ;;  %10737 = vmatpush1.bf16.msra.mxu0 %v13902_v6  ;;  %10761 = vmatpush1.bf16.msra.mxu1 %v13902_v6  ;;  %v14433_v13 = vpack.c.bf16 %v9104_v22, %v9102_v41  ;;  %v9103_v16 = vld [vmem:[%s16340_s3 + $0x1f0] sm:$0xff]  ;;  %v10806_v10 = vpack.c.bf16 %v5254_v54, %v5252_v50  ;;  %v5271_v5 = vld [vmem:[%s16340_s3 + $0xa0] sm:$0xff]  ;;  %v5278_v41 = vld [vmem:[%s16340_s3 + $0xd8] sm:$0xff] }
 0x1ed   : > { %10739 = vmatprep.subr.bf16.mxu0 %v13922_v49  ;;  %10763 = vmatprep.subr.bf16.mxu1 %v13922_v49  ;;  %v2833_v26 = vmax.f32 %v2825_v56, %v2829_v3  ;;  %v14449_v58 = vpack.c.bf16 %v9103_v16, %v9101_v44  ;;  %v5253_v56 = vld [vmem:[%s16340_s3 + $0x10] sm:$0xff]  ;;  %v5256_v3 = vld [vmem:[%s16340_s3 + $0x28] sm:$0xff]  ;;  %v10826_v30 = vpack.c.bf16 %v5274_v53, %v5272_v52  ;;  %v5275_v16 = vld [vmem:[%s16340_s3 + $0xc0] sm:$0xff] }
 0x1ee   : > { %v2840_v21 = vmax.f32 %v2836_v7, 0.0  ;;  %4856 = vmatprep.mubr.f32.mxu0 %v13954_v38  ;;  %4973 = vmatprep.mubr.f32.mxu1 %v13954_v38  ;;  %v5251_v7 = vld [vmem:[%s16340_s3] sm:$0xff]  ;;  %v5277_v50 = vld [vmem:[%s16340_s3 + $0xd0] sm:$0xff]  ;;  %v5280_v54 = vld [vmem:[%s16340_s3 + $0xe8] sm:$0xff] }
 0x1ef   : > { %9028 = vmatmul.mubr.msk.f32.gmra.mrb[30].mxu0 %vm496_vm0, %v14180_v4  ;;  %9036 = vmatmul.mubr.msk.f32.gmra.mrb[30].mxu1 %vm496_vm0, %v14242_v8  ;;  %v2837_v6 = vadd.f32 %v13860_v17, %v2833_v26  ;;  %v9076_v17 = vld [vmem:[%s16340_s3 + $0x118] sm:$0xff]  ;;  %v14467_v26 = vld [vmem:[#allocation2 + $0x1] ss:$2 sm:$0xff] }
 0x1f0   : > { %2844 = vst [vmem:[#allocation2 + $0x30] sm:$0xff] %v2840_v21  ;;  %10741 = vmatpush1.bf16.msra.mxu0 %v13932_v35  ;;  %10765 = vmatpush1.bf16.msra.mxu1 %v13932_v35  ;;  %v14269_v35 = vpack.c.bf16 %v9076_v17, %v9074_v45  ;;  %v10808_v21 = vpack.c.bf16 %v5253_v56, %v5251_v7  ;;  %v5257_v45 = vld [vmem:[%s16340_s3 + $0x30] sm:$0xff] }
 0x1f1   : > { %10743 = vmatprep.subr.bf16.mxu0 %v13946_v9  ;;  %10767 = vmatprep.subr.bf16.mxu1 %v13946_v9  ;;  %v2841_v49 = vmax.f32 %v2837_v6, 0.0  ;;  %v9073_v9 = vld [vmem:[%s16340_s3 + $0x100] sm:$0xff]  ;;  %v10832_v7 = vpack.c.bf16 %v5277_v50, %v5275_v16  ;;  %v9123_v16 = vld [vmem:[%s16340_s3 + $0x290] sm:$0xff] }
 0x1f2   : > { %5076 = vmatprep.mubr.f32.mxu0 %v13954_v38  ;;  %5193 = vmatprep.mubr.f32.mxu1 %v13954_v38  ;;  %v14286_v29 = vpack.c.bf16 %v9075_v55, %v9073_v9  ;;  %v14475_v17 = vld [vmem:[#allocation2 + $0x2] ss:$2 sm:$0xff]  ;;  %v5262_v55 = vld [vmem:[%s16340_s3 + $0x58] sm:$0xff]  ;;  %v14516_v36 = vld [vmem:[#allocation2 + $0x21] ss:$2 sm:$0xff] }
 0x1f3   : > { %2845 = vst [vmem:[#allocation2 + $0x38] sm:$0x3f] %v2841_v49  ;;  %v5255_v49 = vld [vmem:[%s16340_s3 + $0x20] sm:$0xff]  ;;  %v5260_v9 = vld [vmem:[%s16340_s3 + $0x48] sm:$0xff] }
 0x1f4   : > { %10745 = vmatpush1.bf16.msra.mxu0 %v13971_v28  ;;  %10769 = vmatpush1.bf16.msra.mxu1 %v13971_v28  ;;  %v9080_v28 = vld [vmem:[%s16340_s3 + $0x138] sm:$0xff] }
 0x1f5   : > { %10747 = vmatprep.subr.bf16.mxu0 %v13975_v33  ;;  %10771 = vmatprep.subr.bf16.mxu1 %v13975_v33  ;;  %v9065_v33 = vld [vmem:[%s12344_s29 + $0xc5] ss:$2 sm:$0xff]  ;;  %v14296_v4 = vpack.c.bf16 %v9080_v28, %v9078_v18  ;;  %v10812_v18 = vpack.c.bf16 %v5257_v45, %v5255_v49  ;;  %s12032_s29 = scalar_lea.vmem %s12031_s18, 256 }
 0x1f6   : > { %v14487_v28 = vld [vmem:[#allocation2 + $0x11] ss:$2 sm:$0xff]  ;;  %p12034_p1 = scmp.lt.s32.totalorder %s12032_s29, %s12026_s30 }
 0x1f7   : > { %v14518_v46 = vld [vmem:[#allocation2 + $0x22] ss:$2 sm:$0xff] }
 0x1f8   : > { %10749 = vmatpush1.bf16.msra.mxu0 %v13987_v1  ;;  %10773 = vmatpush1.bf16.msra.mxu1 %v13987_v1  ;;  %v9082_v1 = vld [vmem:[%s16340_s3 + $0x148] sm:$0xff]  ;;  %p12035_p2 = por %p12034_p1, %p12033_p0 }
 0x1f9   : > { %10775 = vmatprep.subr.bf16.mxu0 %v14269_v35  ;;  %10839 = vmatprep.subr.bf16.mxu1 %v14269_v35  ;;  %v14322_v20 = vpack.c.bf16 %v9084_v43, %v9082_v1  ;;  %v14495_v1 = vld [vmem:[#allocation2 + $0x12] ss:$2 sm:$0xff]  ;;  %v5264_v43 = vld [vmem:[%s16340_s3 + $0x68] sm:$0xff] }
 0x1fa   : > { %v14532_v0 = vld [vmem:[#allocation2 + $0x31] ss:$2 sm:$0xff]  ;;  %v5289_v50 = vld [vmem:[#allocation2 + $0x30] ss:$2 sm:$0xff]  ;;  %p12036_p3 = pnand %p12035_p2, %p12029_p13 }
 0x1fb   : > { %9061 = vmatmul.mubr.msk.f32.vlgmr.msra.gmra.mrb[24].mxu0 %vm496_vm0, %v14203_v2  ;;  %9069 = vmatmul.mubr.msk.f32.vlgmr.msra.gmra.mrb[24].mxu1 %vm496_vm0, %v9065_v33  ;;  %v14348_v2 = vpack.c.bf16 %v9088_v63, %v9086_v27  ;;  %v10814_v33 = vpack.c.bf16 %v5262_v55, %v5260_v9  ;;  %v5263_v27 = vld [vmem:[%s16340_s3 + $0x60] sm:$0xff]  ;;  %v5265_v63 = vld [vmem:[%s16340_s3 + $0x70] sm:$0xff] }
 0x1fc   : > { %10777 = vmatpush1.bf16.msra.mxu0 %v14286_v29  ;;  %10841 = vmatpush1.bf16.msra.mxu1 %v14286_v29  ;;  %v10820_v31 = vpack.c.bf16 %v5265_v63, %v5263_v27  ;;  %v9105_v9 = vld [vmem:[%s16340_s3 + $0x200] sm:$0xff]  ;;  %v9107_v55 = vld [vmem:[%s16340_s3 + $0x210] sm:$0xff]  ;;  %v9116_v27 = vld [vmem:[%s16340_s3 + $0x258] sm:$0xff] }
 0x1fd   : > { %5082 = vmatprep.mubr.f32.mxu0 %v13954_v38  ;;  %5199 = vmatprep.mubr.f32.mxu1 %v13954_v38  ;;  %v14591_v59 = vpack.c.bf16 %v9107_v55, %v9105_v9  ;;  %v9129_v9 = vld [vmem:[%s16340_s3 + $0x2c0] sm:$0xff]  ;;  %v9131_v55 = vld [vmem:[%s16340_s3 + $0x2d0] sm:$0xff] }
 0x1fe   : > { %10779 = vmatprep.subr.bf16.mxu0 %v14296_v4  ;;  %10843 = vmatprep.subr.bf16.mxu1 %v14296_v4 }
 0x1ff   : > { %9062 = vmatmul.mubr.msk.f32.gmra.mrb[26].mxu0 %vm496_vm0, %v14214_v37  ;;  %9070 = vmatmul.mubr.msk.f32.gmra.mrb[26].mxu1 %vm496_vm0, %v9066_v62  ;;  %v14387_v37 = vpack.c.bf16 %v9091_v57, %v9089_v40  ;;  %v5266_v62 = vld [vmem:[%s16340_s3 + $0x78] sm:$0xff]  ;;  %v5267_v40 = vld [vmem:[%s16340_s3 + $0x80] sm:$0xff]  ;;  %v5269_v57 = vld [vmem:[%s16340_s3 + $0x90] sm:$0xff] }
 0x200   : > { %10781 = vmatpush1.bf16.msra.mxu0 %v14310_v23  ;;  %10845 = vmatpush1.bf16.msra.mxu1 %v14310_v23  ;;  %v10818_v42 = vpack.c.bf16 %v5266_v62, %v5264_v43  ;;  %v10824_v34 = vpack.c.bf16 %v5269_v57, %v5267_v40  ;;  %v9109_v43 = vld [vmem:[%s16340_s3 + $0x220] sm:$0xff]  ;;  %v9111_v62 = vld [vmem:[%s16340_s3 + $0x230] sm:$0xff]  ;;  %v9120_v40 = vld [vmem:[%s16340_s3 + $0x278] sm:$0xff] }
 0x201   : > { %5088 = vmatprep.mubr.f32.mxu0 %v13954_v38  ;;  %5205 = vmatprep.mubr.f32.mxu1 %v13954_v38  ;;  %v14609_v63 = vpack.c.bf16 %v9111_v62, %v9109_v43  ;;  %v14627_v57 = vld [vmem:[#allocation2 + $0x58] sm:$0xff]  ;;  %v14704_v43 = vpack.c.bf16 %v9131_v55, %v9129_v9  ;;  %v9146_v55 = vld [vmem:[%s16340_s3 + $0x348] sm:$0xff] }
 0x202   : > { %10783 = vmatprep.subr.bf16.mxu0 %v14322_v20  ;;  %10847 = vmatprep.subr.bf16.mxu1 %v14322_v20 }
 0x203   : > { %9063 = vmatmul.mubr.msk.f32.gmra.mrb[28].mxu0 %vm496_vm0, %v14228_v24  ;;  %9071 = vmatmul.mubr.msk.f32.gmra.mrb[28].mxu1 %vm496_vm0, %v9067_v11  ;;  %v14429_v24 = vpack.c.bf16 %v9099_v47, %v9097_v19  ;;  %v5268_v11 = vld [vmem:[%s16340_s3 + $0x88] sm:$0xff]  ;;  %v5273_v19 = vld [vmem:[%s16340_s3 + $0xb0] sm:$0xff] }
 0x204   : > { %10785 = vmatpush1.bf16.msra.mxu0 %v14336_v51  ;;  %10849 = vmatpush1.bf16.msra.mxu1 %v14336_v51  ;;  %v5276_v47 = vld [vmem:[%s16340_s3 + $0xc8] sm:$0xff]  ;;  %v10828_v22 = vpack.c.bf16 %v5273_v19, %v5271_v5 }
 0x205   : > { %5094 = vmatprep.mubr.f32.mxu0 %v13954_v38  ;;  %5211 = vmatprep.mubr.f32.mxu1 %v13954_v38  ;;  %v10830_v44 = vpack.c.bf16 %v5278_v41, %v5276_v47  ;;  %v5287_v5 = vld [vmem:[#allocation2 + $0x20] ss:$2 sm:$0xff]  ;;  %v9124_v47 = vld [vmem:[%s16340_s3 + $0x298] sm:$0xff] }
 0x206   : > { %10787 = vmatprep.subr.bf16.mxu0 %v14348_v2  ;;  %10851 = vmatprep.subr.bf16.mxu1 %v14348_v2  ;;  %v9122_v19 = vld [vmem:[%s16340_s3 + $0x288] sm:$0xff] }
 0x207   : > { %9064 = vmatmul.mubr.msk.f32.gmra.mrb[30].mxu0 %vm496_vm0, %v14242_v8  ;;  %9072 = vmatmul.mubr.msk.f32.gmra.mrb[30].mxu1 %vm496_vm0, %v9068_v15  ;;  %v5258_v8 = vld [vmem:[%s16340_s3 + $0x38] sm:$0xff]  ;;  %v10822_v15 = vpack.c.bf16 %v5270_v12, %v5268_v11  ;;  %v9113_v12 = vld [vmem:[%s16340_s3 + $0x240] sm:$0xff] }
 0x208   : > { %10789 = vmatpush1.bf16.msra.mxu0 %v14362_v32  ;;  %10853 = vmatpush1.bf16.msra.mxu1 %v14362_v32  ;;  %v10810_v6 = vpack.c.bf16 %v5258_v8, %v5256_v3  ;;  %v5279_v3 = vld [vmem:[%s16340_s3 + $0xe0] sm:$0xff]  ;;  %v5281_v8 = vld [vmem:[%s16340_s3 + $0xf0] sm:$0xff] }
 0x209   : > { %10791 = vmatprep.subr.bf16.mxu0 %v14366_v39  ;;  %10855 = vmatprep.subr.bf16.mxu1 %v14366_v39  ;;  %v10836_v49 = vpack.c.bf16 %v5281_v8, %v5279_v3  ;;  %v9125_v3 = vld [vmem:[%s16340_s3 + $0x2a0] sm:$0xff]  ;;  %v9127_v8 = vld [vmem:[%s16340_s3 + $0x2b0] sm:$0xff] }
 0x20a   : > { %5395 = vmatprep.mubr.f32.mxu0 %v13954_v38  ;;  %5581 = vmatprep.mubr.f32.mxu1 %v13954_v38 }
 0x20c   : > { %10793 = vmatpush1.bf16.msra.mxu0 %v14387_v37  ;;  %10857 = vmatpush1.bf16.msra.mxu1 %v14387_v37 }
 0x20d   : > { %10795 = vmatprep.subr.bf16.mxu0 %v14391_v61  ;;  %10859 = vmatprep.subr.bf16.mxu1 %v14391_v61 }
 0x210   : > { %10797 = vmatpush1.bf16.msra.mxu0 %v14409_v14  ;;  %10861 = vmatpush1.bf16.msra.mxu1 %v14409_v14 }
 0x211   : > { %10799 = vmatprep.subr.bf16.mxu0 %v14413_v60  ;;  %10863 = vmatprep.subr.bf16.mxu1 %v14413_v60 }
 0x214   : > { %10801 = vmatpush1.bf16.msra.mxu0 %v14429_v24  ;;  %10865 = vmatpush1.bf16.msra.mxu1 %v14429_v24 }
 0x215   : > { %10803 = vmatprep.subr.bf16.mxu0 %v14433_v13  ;;  %10867 = vmatprep.subr.bf16.mxu1 %v14433_v13 }
 0x218   : > { %10805 = vmatpush1.bf16.msra.mxu0 %v14449_v58  ;;  %10869 = vmatpush1.bf16.msra.mxu1 %v14449_v58 }
 0x219   : > { %10807 = vmatprep.subr.bf16.mxu0 %v10806_v10  ;;  %10871 = vmatprep.subr.bf16.mxu1 %v10806_v10  ;;  %v5282_v10 = vld [vmem:[%s16340_s3 + $0xf8] sm:$0xff] }
 0x21a   : > { %v10834_v56 = vpack.c.bf16 %v5282_v10, %v5280_v54  ;;  %v9126_v54 = vld [vmem:[%s16340_s3 + $0x2a8] sm:$0xff]  ;;  %v9128_v10 = vld [vmem:[%s16340_s3 + $0x2b8] sm:$0xff] }
 0x21b   : > { %5396 = vmatmul.mubr.f32.vlgmr.msra.gmra.mrb[32].mxu0 %v14467_v26  ;;  %5582 = vmatmul.mubr.f32.vlgmr.msra.gmra.mrb[32].mxu1 %v14475_v17 }
 0x21c   : > { %10809 = vmatpush1.bf16.msra.mxu0 %v10808_v21  ;;  %5401 = vmatprep.mubr.f32.mxu0 %v13954_v38 }
 0x21d   : > { %5587 = vmatprep.mubr.f32.mxu1 %v13954_v38  ;;  %10811 = vmatprep.subr.bf16.mxu0 %v10810_v6 }
 0x21e   : > { %10873 = vmatpush1.bf16.msra.mxu1 %v10808_v21  ;;  %v9106_v21 = vld [vmem:[%s16340_s3 + $0x208] sm:$0xff] }
 0x21f   : > { %5402 = vmatmul.mubr.f32.gmra.mrb[34].mxu0 %v14487_v28  ;;  %5588 = vmatmul.mubr.f32.gmra.mrb[34].mxu1 %v14495_v1 }
 0x220   : > { %10813 = vmatpush1.bf16.msra.mxu0 %v10812_v18  ;;  %5407 = vmatprep.mubr.f32.mxu0 %v13954_v38 }
 0x221   : > { %5593 = vmatprep.mubr.f32.mxu1 %v13954_v38  ;;  %10815 = vmatprep.subr.bf16.mxu0 %v10814_v33 }
 0x222   : > { %10875 = vmatprep.subr.bf16.mxu1 %v10810_v6  ;;  %v9108_v6 = vld [vmem:[%s16340_s3 + $0x218] sm:$0xff] }
 0x223   : > { %5408 = vmatmul.mubr.f32.gmra.mrb[36].mxu0 %v14516_v36  ;;  %5594 = vmatmul.mubr.f32.gmra.mrb[36].mxu1 %v14518_v46  ;;  %v10902_v45 = vpack.c.bf16 %v9108_v6, %v9106_v21  ;;  %v9130_v21 = vld [vmem:[%s16340_s3 + $0x2c8] sm:$0xff]  ;;  %v9132_v6 = vld [vmem:[%s16340_s3 + $0x2d8] sm:$0xff] }
 0x224   : > { %10817 = vmatpush1.bf16.msra.mxu0 %v10816_v48  ;;  %5413 = vmatprep.mubr.f32.mxu0 %v13954_v38 }
 0x225   : > { %10819 = vmatprep.subr.bf16.mxu0 %v10818_v42  ;;  %10877 = vmatpush1.bf16.msra.mxu1 %v10812_v18  ;;  %v9110_v18 = vld [vmem:[%s16340_s3 + $0x228] sm:$0xff] }
 0x226   : > { %10879 = vmatprep.subr.bf16.mxu1 %v10814_v33  ;;  %5599 = vmatprep.mubr.f32.mxu1 %v13954_v38  ;;  %v9112_v33 = vld [vmem:[%s16340_s3 + $0x238] sm:$0xff] }
 0x227   : > { %5414 = vmatmul.mubr.f32.gmra.mrb[38].mxu0 %v14532_v0  ;;  %v14593_v25 = vpack.c.bf16 %v9112_v33, %v9110_v18  ;;  %v9134_v18 = vld [vmem:[%s16340_s3 + $0x2e8] sm:$0xff]  ;;  %v9136_v33 = vld [vmem:[%s16340_s3 + $0x2f8] sm:$0xff] }
 0x228   : > { %10821 = vmatpush1.bf16.msra.mxu0 %v10820_v31  ;;  %5484 = vmatprep.mubr.f32.mxu0 %v13954_v38  ;;  %v14707_v62 = vpack.c.bf16 %v9136_v33, %v9134_v18  ;;  %v9148_v18 = vld [vmem:[%s16340_s3 + $0x358] sm:$0xff] }
 0x229   : > { %10823 = vmatprep.subr.bf16.mxu0 %v10822_v15  ;;  %10881 = vmatpush1.bf16.msra.mxu1 %v10816_v48  ;;  %v5283_v48 = vld [vmem:[#allocation2] ss:$2 sm:$0xff] }
 0x22a   : > { %10883 = vmatprep.subr.bf16.mxu1 %v10818_v42  ;;  %v9114_v42 = vld [vmem:[%s16340_s3 + $0x248] sm:$0xff] }
 0x22b   : > { %v14612_v11 = vpack.c.bf16 %v9116_v27, %v9114_v42  ;;  %v9135_v42 = vld [vmem:[%s16340_s3 + $0x2f0] sm:$0xff]  ;;  %v9138_v27 = vld [vmem:[%s16340_s3 + $0x308] sm:$0xff] }
 0x22c   : > { %10825 = vmatpush1.bf16.msra.mxu0 %v10824_v34 }
 0x22d   : > { %10827 = vmatprep.subr.bf16.mxu0 %v10826_v30  ;;  %10885 = vmatpush1.bf16.msra.mxu1 %v10820_v31  ;;  %v9115_v31 = vld [vmem:[%s16340_s3 + $0x250] sm:$0xff] }
 0x22e   : > { %10887 = vmatprep.subr.bf16.mxu1 %v10822_v15  ;;  %v5285_v15 = vld [vmem:[#allocation2 + $0x10] ss:$2 sm:$0xff]  ;;  %v14630_v52 = vpack.c.bf16 %v9115_v31, %v9113_v12 }
 0x22f   : > { %v9140_v12 = vld [vmem:[%s16340_s3 + $0x318] sm:$0xff] }
 0x230   : > { %10829 = vmatpush1.bf16.msra.mxu0 %v10828_v22 }
 0x231   : > { %10831 = vmatprep.subr.bf16.mxu0 %v10830_v44  ;;  %10889 = vmatpush1.bf16.msra.mxu1 %v10824_v34  ;;  %v9117_v34 = vld [vmem:[%s16340_s3 + $0x260] sm:$0xff] }
 0x232   : > { %10891 = vmatprep.subr.bf16.mxu1 %v10826_v30  ;;  %v9119_v30 = vld [vmem:[%s16340_s3 + $0x270] sm:$0xff] }
 0x233   : > { %v14649_v41 = vpack.c.bf16 %v9119_v30, %v9117_v34 }
 0x234   : > { %10833 = vmatpush1.bf16.msra.mxu0 %v10832_v7 }
 0x235   : > { %10835 = vmatprep.subr.bf16.mxu0 %v10834_v56  ;;  %10893 = vmatpush1.bf16.msra.mxu1 %v10828_v22  ;;  %v14652_v22 = vpack.c.bf16 %v9124_v47, %v9122_v19  ;;  %v9144_v19 = vld [vmem:[%s16340_s3 + $0x338] sm:$0xff] }
 0x236   : > { %10895 = vmatprep.subr.bf16.mxu1 %v10830_v44  ;;  %v9121_v44 = vld [vmem:[%s16340_s3 + $0x280] sm:$0xff] }
 0x238   : > { %10837 = vmatpush1.bf16.msra.mxu0 %v10836_v49 }
 0x239   : > { %10903 = vmatprep.subr.bf16.mxu0 %v10902_v45  ;;  %10897 = vmatpush1.bf16.msra.mxu1 %v10832_v7  ;;  %v14667_v7 = vpack.c.bf16 %v9123_v16, %v9121_v44 }
 0x23a   : > { %10899 = vmatprep.subr.bf16.mxu1 %v10834_v56  ;;  %v14671_v56 = vpack.c.bf16 %v9128_v10, %v9126_v54  ;;  %v9141_v10 = vld [vmem:[%s16340_s3 + $0x320] sm:$0xff] }
 0x23b   : > { %5485 = vmatmul.mubr.f32.vlgmr.msra.gmra.mrb[32].mxu0 %v5283_v48  ;;  %v9133_v48 = vld [vmem:[%s16340_s3 + $0x2e0] sm:$0xff] }
 0x23c   : > { %10905 = vmatpush1.bf16.msra.mxu0 %v14591_v59  ;;  %5490 = vmatprep.mubr.f32.mxu0 %v13954_v38  ;;  %v9118_v38 = vld [vmem:[%s16340_s3 + $0x268] sm:$0xff]  ;;  %v14722_v31 = vpack.c.bf16 %v9135_v42, %v9133_v48 }
 0x23d   : > { %10907 = vmatprep.subr.bf16.mxu0 %v14593_v25  ;;  %10901 = vmatpush1.bf16.msra.mxu1 %v10836_v49  ;;  %v14633_v53 = vpack.c.bf16 %v9120_v40, %v9118_v38  ;;  %v14686_v49 = vpack.c.bf16 %v9127_v8, %v9125_v3  ;;  %v9137_v38 = vld [vmem:[%s16340_s3 + $0x300] sm:$0xff]  ;;  %v9139_v40 = vld [vmem:[%s16340_s3 + $0x310] sm:$0xff] }
 0x23e   : > { %10935 = vmatprep.subr.bf16.mxu1 %v10902_v45  ;;  %v14689_v45 = vpack.c.bf16 %v9132_v6, %v9130_v21  ;;  %v14740_v54 = vpack.c.bf16 %v9139_v40, %v9137_v38  ;;  %v9143_v3 = vld [vmem:[%s16340_s3 + $0x330] sm:$0xff] }
 0x23f   : > { %5491 = vmatmul.mubr.f32.gmra.mrb[34].mxu0 %v5285_v15  ;;  %v14725_v15 = vpack.c.bf16 %v9140_v12, %v9138_v27  ;;  %v14758_v42 = vpack.c.bf16 %v9143_v3, %v9141_v10  ;;  %v14763_v27 = vld [vmem:[%s16339_s2] ss:$0 sm:$0xff] }
 0x240   : > { %10909 = vmatpush1.bf16.msra.mxu0 %v14609_v63  ;;  %5496 = vmatprep.mubr.f32.mxu0 %v14627_v57 }
 0x241   : > { %10911 = vmatprep.subr.bf16.mxu0 %v14612_v11 }
 0x243   : > { %5497 = vmatmul.mubr.f32.gmra.mrb[36].mxu0 %v5287_v5  ;;  %v9142_v5 = vld [vmem:[%s16340_s3 + $0x328] sm:$0xff] }
 0x244   : > { %10913 = vmatpush1.bf16.msra.mxu0 %v14630_v52  ;;  %5502 = vmatprep.mubr.f32.mxu0 %v14627_v57  ;;  %v14749_v8 = vpack.c.bf16 %v9144_v19, %v9142_v5 }
 0x245   : > { %10915 = vmatprep.subr.bf16.mxu0 %v14633_v53 }
 0x247   : > { %5503 = vmatmul.mubr.f32.gmra.mrb[38].mxu0 %v5289_v50 }
 0x248   : > { %10917 = vmatpush1.bf16.msra.mxu0 %v14649_v41  ;;  %5792 = vmatprep.mubr.f32.mxu0 %v14627_v57 }
 0x249   : > { %10919 = vmatprep.subr.bf16.mxu0 %v14652_v22 }
 0x24c   : > { %10921 = vmatpush1.bf16.msra.mxu0 %v14667_v7 }
 0x24d   : > { %10923 = vmatprep.subr.bf16.mxu0 %v14671_v56 }
 0x250   : > { %10925 = vmatpush1.bf16.msra.mxu0 %v14686_v49 }
 0x251   : > { %10927 = vmatprep.subr.bf16.mxu0 %v14689_v45 }
 0x254   : > { %10929 = vmatpush1.bf16.msra.mxu0 %v14704_v43 }
 0x255   : > { %10931 = vmatprep.subr.bf16.mxu0 %v14707_v62 }
 0x256   : > { %v3876_v34 = vpop.f32.mrb[16].mxu0  ;;  %v3993_v30 = vpop.f32.mrb[16].mxu1 }
 0x257   : > { %v3878_v47 = vpop.f32.mrb[17].mxu0  ;;  %v3995_v44 = vpop.f32.mrb[17].mxu1 }
 0x258   : > { %v4024_v16 = vmax.f32 %v3876_v34, %v3878_v47  ;;  %v4028_v50 = vmax.f32 %v3993_v30, %v3995_v44  ;;  %10933 = vmatpush1.bf16.msra.mxu0 %v14722_v31  ;;  %v9145_v34 = vld [vmem:[%s16340_s3 + $0x340] sm:$0xff]  ;;  %v14775_v30 = vpack.c.bf16 %v9148_v18, %v9146_v55 }
 0x259   : > { %10967 = vmatprep.subr.bf16.mxu0 %v14725_v15 }
 0x25a   : > { %v4032_v21 = vmax.f32 %v4024_v16, %v4028_v50  ;;  %v3882_v6 = vpop.f32.mrb[18].mxu0  ;;  %v3999_v9 = vpop.f32.mrb[18].mxu1  ;;  %v9150_v16 = vld [vmem:[%s16340_s3 + $0x368] sm:$0xff]  ;;  %v9152_v50 = vld [vmem:[%s16340_s3 + $0x378] sm:$0xff] }
 0x25b   : > { %v3884_v33 = vpop.f32.mrb[19].mxu0  ;;  %v4001_v48 = vpop.f32.mrb[19].mxu1  ;;  %5793 = vmatmul.mubr.f32.vlgmr.msra.gmra.mrb[32].mxu0 %v14475_v17  ;;  %v9147_v17 = vld [vmem:[%s16340_s3 + $0x350] sm:$0xff]  ;;  %v14790_v18 = vpack.c.bf16 %v9152_v50, %v9150_v16 }
 0x25c   : > { %v4036_v12 = vadd.f32 %v14763_v27, %v4032_v21  ;;  %v4025_v38 = vmax.f32 %v3882_v6, %v3884_v33  ;;  %v4029_v40 = vmax.f32 %v3999_v9, %v4001_v48  ;;  %10969 = vmatpush1.bf16.msra.mxu0 %v14740_v54  ;;  %5798 = vmatprep.mubr.f32.mxu0 %v14627_v57 }
 0x25d   : > { %10971 = vmatprep.subr.bf16.mxu0 %v14749_v8  ;;  %v14784_v21 = vpack.c.bf16 %v9147_v17, %v9145_v34 }
 0x25e   : > { %v4040_v5 = vmax.f32 %v4036_v12, 0.0  ;;  %v4033_v19 = vmax.f32 %v4025_v38, %v4029_v40  ;;  %v3888_v47 = vpop.f32.mrb[20].mxu0  ;;  %v4005_v44 = vpop.f32.mrb[20].mxu1  ;;  %v9151_v40 = vld [vmem:[%s16340_s3 + $0x370] sm:$0xff] }
 0x25f   : > { %v3890_v10 = vpop.f32.mrb[21].mxu0  ;;  %v4007_v3 = vpop.f32.mrb[21].mxu1  ;;  %5799 = vmatmul.mubr.f32.gmra.mrb[34].mxu0 %v14495_v1  ;;  %v9149_v1 = vld [vmem:[%s16340_s3 + $0x360] sm:$0xff] }
 0x260   : > { %4044 = vst [vmem:[#allocation2 + $0x40] sm:$0xff] %v4040_v5  ;;  %v4037_v6 = vadd.f32 %v14763_v27, %v4033_v19  ;;  %v4026_v9 = vmax.f32 %v3888_v47, %v3890_v10  ;;  %v4030_v55 = vmax.f32 %v4005_v44, %v4007_v3  ;;  %10973 = vmatpush1.bf16.msra.mxu0 %v14758_v42  ;;  %v9154_v5 = vld [vmem:[%s16340_s3 + $0x388] sm:$0xff]  ;;  %v9156_v19 = vld [vmem:[%s16340_s3 + $0x398] sm:$0xff] }
 0x261   : > { %5804 = vmatprep.mubr.f32.mxu0 %v14627_v57  ;;  %10975 = vmatprep.subr.bf16.mxu0 %v14775_v30  ;;  %v14811_v3 = vpack.c.bf16 %v9156_v19, %v9154_v5  ;;  %v9162_v5 = vld [vmem:[%s16340_s3 + $0x3c8] sm:$0xff]  ;;  %v9164_v19 = vld [vmem:[%s16340_s3 + $0x3d8] sm:$0xff] }
 0x262   : > { %v4041_v33 = vmax.f32 %v4037_v6, 0.0  ;;  %v4034_v48 = vmax.f32 %v4026_v9, %v4030_v55  ;;  %v3894_v12 = vpop.f32.mrb[22].mxu0  ;;  %v4011_v38 = vpop.f32.mrb[22].mxu1  ;;  %v9153_v6 = vld [vmem:[%s16340_s3 + $0x380] sm:$0xff]  ;;  %v9155_v9 = vld [vmem:[%s16340_s3 + $0x390] sm:$0xff] }
 0x263   : > { %v3896_v34 = vpop.f32.mrb[23].mxu0  ;;  %v4013_v17 = vpop.f32.mrb[23].mxu1  ;;  %5805 = vmatmul.mubr.f32.gmra.mrb[36].mxu0 %v14518_v46  ;;  %v14809_v46 = vpack.c.bf16 %v9151_v40, %v9149_v1  ;;  %v9157_v40 = vld [vmem:[%s16340_s3 + $0x3a0] sm:$0xff] }
 0x264   : > { %4045 = vst [vmem:[#allocation2 + $0x48] sm:$0xff] %v4041_v33  ;;  %v4038_v47 = vadd.f32 %v14763_v27, %v4034_v48  ;;  %v4027_v44 = vmax.f32 %v3894_v12, %v3896_v34  ;;  %v4031_v16 = vmax.f32 %v4011_v38, %v4013_v17  ;;  %10977 = vmatpush1.bf16.msra.mxu0 %v14784_v21  ;;  %v9158_v48 = vld [vmem:[%s16340_s3 + $0x3a8] sm:$0xff]  ;;  %v9160_v12 = vld [vmem:[%s16340_s3 + $0x3b8] sm:$0xff]  ;;  %v9159_v34 = vld [vmem:[%s16340_s3 + $0x3b0] sm:$0xff] }
 0x265   : > { %5810 = vmatprep.mubr.f32.mxu0 %v14627_v57  ;;  %10979 = vmatprep.subr.bf16.mxu0 %v14790_v18  ;;  %v14828_v38 = vpack.c.bf16 %v9155_v9, %v9153_v6  ;;  %v14838_v17 = vpack.c.bf16 %v9160_v12, %v9158_v48  ;;  %v9175_v12 = vld [vmem:[%s16340_s3 + $0x430] sm:$0xff] }
 0x266   : > { %v4042_v50 = vmax.f32 %v4038_v47, 0.0  ;;  %v4035_v10 = vmax.f32 %v4027_v44, %v4031_v16  ;;  %v14849_v47 = vpack.c.bf16 %v9159_v34, %v9157_v40  ;;  %v9163_v44 = vld [vmem:[%s16340_s3 + $0x3d0] sm:$0xff]  ;;  %v14860_v16 = vpack.c.bf16 %v9164_v19, %v9162_v5  ;;  %v9177_v5 = vld [vmem:[%s16340_s3 + $0x440] sm:$0xff] }
 0x267   : > { %v5516_v55 = vld [vmem:[#allocation2 + $0x32] ss:$2 sm:$0xff] }
 0x268   : > { %4046 = vst [vmem:[#allocation2 + $0x50] sm:$0xff] %v4042_v50  ;;  %v4039_v33 = vadd.f32 %v14763_v27, %v4035_v10  ;;  %5600 = vmatmul.mubr.f32.gmra.mrb[38].mxu1 %v5516_v55  ;;  %5811 = vmatmul.mubr.f32.gmra.mrb[38].mxu0 %v5516_v55  ;;  %v9167_v10 = vld [vmem:[%s16340_s3 + $0x3f0] sm:$0xff] }
 0x269   : > { %10981 = vmatpush1.bf16.msra.mxu0 %v14809_v46  ;;  %5670 = vmatprep.mubr.f32.mxu1 %v14627_v57  ;;  %v9179_v19 = vld [vmem:[%s16340_s3 + $0x450] sm:$0xff] }
 0x26a   : > { %v4043_v1 = vmax.f32 %v4039_v33, 0.0  ;;  %10983 = vmatprep.subr.bf16.mxu0 %v14811_v3  ;;  %6027 = vmatprep.mubr.f32.mxu0 %v14627_v57  ;;  %v9169_v33 = vld [vmem:[%s16340_s3 + $0x400] sm:$0xff] }
 0x26c   : > { %4047 = vst [vmem:[#allocation2 + $0x58] sm:$0x3f] %v4043_v1  ;;  %5671 = vmatmul.mubr.f32.vlgmr.msra.gmra.mrb[32].mxu1 %v14467_v26  ;;  %v9161_v26 = vld [vmem:[%s16340_s3 + $0x3c0] sm:$0xff] }
 0x26d   : > { %10937 = vmatpush1.bf16.msra.mxu1 %v14591_v59  ;;  %10985 = vmatpush1.bf16.msra.mxu0 %v14828_v38  ;;  %v9166_v59 = vld [vmem:[%s16340_s3 + $0x3e8] sm:$0xff]  ;;  %v14871_v50 = vpack.c.bf16 %v9163_v44, %v9161_v26  ;;  %v5828_v26 = vld [vmem:[#allocation2 + $0x13] ss:$2 sm:$0xff] }
 0x26e   : > { %5676 = vmatprep.mubr.f32.mxu1 %v14627_v57  ;;  %10939 = vmatprep.subr.bf16.mxu1 %v14593_v25  ;;  %v9168_v25 = vld [vmem:[%s16340_s3 + $0x3f8] sm:$0xff]  ;;  %v5826_v1 = vld [vmem:[#allocation2 + $0x3] ss:$2 sm:$0xff] }
 0x26f   : > { %10987 = vmatprep.subr.bf16.mxu0 %v14838_v17  ;;  %v14882_v6 = vpack.c.bf16 %v9168_v25, %v9166_v59  ;;  %v9182_v44 = vld [vmem:[%s16340_s3 + $0x468] sm:$0xff]  ;;  %v14957_v59 = vpack.c.bf16 %v9179_v19, %v9177_v5  ;;  %v9181_v25 = vld [vmem:[%s16340_s3 + $0x460] sm:$0xff]  ;;  %v9195_v19 = vld [vmem:[%s16340_s3 + $0x4d0] sm:$0xff] }
 0x270   : > { %5677 = vmatmul.mubr.f32.gmra.mrb[34].mxu1 %v14487_v28  ;;  %v9165_v28 = vld [vmem:[%s16340_s3 + $0x3e0] sm:$0xff] }
 0x271   : > { %10941 = vmatpush1.bf16.msra.mxu1 %v14609_v63  ;;  %10989 = vmatpush1.bf16.msra.mxu0 %v14849_v47  ;;  %v9170_v63 = vld [vmem:[%s16340_s3 + $0x408] sm:$0xff]  ;;  %v14893_v9 = vpack.c.bf16 %v9167_v10, %v9165_v28  ;;  %v9183_v28 = vld [vmem:[%s16340_s3 + $0x470] sm:$0xff] }
 0x272   : > { %5682 = vmatprep.mubr.f32.mxu1 %v14627_v57  ;;  %10943 = vmatprep.subr.bf16.mxu1 %v14612_v11  ;;  %v9172_v11 = vld [vmem:[%s16340_s3 + $0x418] sm:$0xff]  ;;  %v5830_v10 = vld [vmem:[#allocation2 + $0x23] ss:$2 sm:$0xff] }
 0x273   : > { %10991 = vmatprep.subr.bf16.mxu0 %v14860_v16  ;;  %v14897_v55 = vpack.c.bf16 %v9172_v11, %v9170_v63  ;;  %v9186_v63 = vld [vmem:[%s16340_s3 + $0x488] sm:$0xff]  ;;  %v14978_v11 = vpack.c.bf16 %v9183_v28, %v9181_v25  ;;  %v9199_v25 = vld [vmem:[%s16340_s3 + $0x4f0] sm:$0xff] }
 0x274   : > { %5683 = vmatmul.mubr.f32.gmra.mrb[36].mxu1 %v14516_v36  ;;  %v9171_v36 = vld [vmem:[%s16340_s3 + $0x410] sm:$0xff] }
 0x275   : > { %10945 = vmatpush1.bf16.msra.mxu1 %v14630_v52  ;;  %10993 = vmatpush1.bf16.msra.mxu0 %v14871_v50  ;;  %v9174_v52 = vld [vmem:[%s16340_s3 + $0x428] sm:$0xff]  ;;  %v14915_v48 = vpack.c.bf16 %v9171_v36, %v9169_v33  ;;  %v9185_v36 = vld [vmem:[%s16340_s3 + $0x480] sm:$0xff] }
 0x276   : > { %5688 = vmatprep.mubr.f32.mxu1 %v14627_v57  ;;  %10947 = vmatprep.subr.bf16.mxu1 %v14633_v53  ;;  %v9176_v53 = vld [vmem:[%s16340_s3 + $0x438] sm:$0xff] }
 0x277   : > { %10995 = vmatprep.subr.bf16.mxu0 %v14882_v6  ;;  %v14925_v40 = vpack.c.bf16 %v9176_v53, %v9174_v52  ;;  %v9187_v52 = vld [vmem:[%s16340_s3 + $0x490] sm:$0xff] }
 0x278   : > { %5689 = vmatmul.mubr.f32.gmra.mrb[38].mxu1 %v14532_v0  ;;  %v9173_v0 = vld [vmem:[%s16340_s3 + $0x420] sm:$0xff] }
 0x279   : > { %10949 = vmatpush1.bf16.msra.mxu1 %v14649_v41  ;;  %10997 = vmatpush1.bf16.msra.mxu0 %v14893_v9  ;;  %v9178_v41 = vld [vmem:[%s16340_s3 + $0x448] sm:$0xff]  ;;  %v14936_v34 = vpack.c.bf16 %v9175_v12, %v9173_v0  ;;  %v5832_v53 = vld [vmem:[#allocation2 + $0x33] ss:$2 sm:$0xff]  ;;  %v14999_v0 = vpack.c.bf16 %v9187_v52, %v9185_v36 }
 0x27a   : > { %10951 = vmatprep.subr.bf16.mxu1 %v14652_v22  ;;  %11031 = vmatprep.subr.bf16.mxu0 %v14897_v55  ;;  %v9180_v22 = vld [vmem:[%s16340_s3 + $0x458] sm:$0xff]  ;;  %v9189_v12 = vld [vmem:[%s16340_s3 + $0x4a0] sm:$0xff] }
 0x27b   : > { %5897 = vmatprep.mubr.f32.mxu1 %v14627_v57  ;;  %v6445_v36 = vld [vmem:[%s16340_s3 + $0x78] sm:$0xff] }
 0x27c   : > { %6028 = vmatmul.mubr.f32.vlgmr.msra.gmra.mrb[32].mxu0 %v5826_v1 }
 0x27d   : > { %10953 = vmatpush1.bf16.msra.mxu1 %v14667_v7  ;;  %11033 = vmatpush1.bf16.msra.mxu0 %v14915_v48  ;;  %v14947_v7 = vpack.c.bf16 %v9180_v22, %v9178_v41  ;;  %v9191_v41 = vld [vmem:[%s16340_s3 + $0x4b0] sm:$0xff] }
 0x27e   : > { %6033 = vmatprep.mubr.f32.mxu0 %v14627_v57  ;;  %10955 = vmatprep.subr.bf16.mxu1 %v14671_v56  ;;  %v9184_v56 = vld [vmem:[%s16340_s3 + $0x478] sm:$0xff]  ;;  %v15020_v5 = vpack.c.bf16 %v9191_v41, %v9189_v12 }
 0x27f   : > { %11035 = vmatprep.subr.bf16.mxu0 %v14925_v40  ;;  %v6449_v12 = vld [vmem:[%s16340_s3 + $0x98] sm:$0xff] }
 0x280   : > { %6034 = vmatmul.mubr.f32.gmra.mrb[34].mxu0 %v5828_v26 }
 0x281   : > { %10957 = vmatpush1.bf16.msra.mxu1 %v14686_v49  ;;  %11037 = vmatpush1.bf16.msra.mxu0 %v14936_v34  ;;  %v14968_v49 = vpack.c.bf16 %v9184_v56, %v9182_v44 }
 0x282   : > { %6039 = vmatprep.mubr.f32.mxu0 %v14627_v57  ;;  %10959 = vmatprep.subr.bf16.mxu1 %v14689_v45  ;;  %v9188_v45 = vld [vmem:[%s16340_s3 + $0x498] sm:$0xff] }
 0x283   : > { %11039 = vmatprep.subr.bf16.mxu0 %v14947_v7  ;;  %v14982_v33 = vpack.c.bf16 %v9188_v45, %v9186_v63  ;;  %v6438_v45 = vld [vmem:[%s16340_s3 + $0x40] sm:$0xff] }
 0x284   : > { %6040 = vmatmul.mubr.f32.gmra.mrb[36].mxu0 %v5830_v10 }
 0x285   : > { %10961 = vmatpush1.bf16.msra.mxu1 %v14704_v43  ;;  %11041 = vmatpush1.bf16.msra.mxu0 %v14957_v59  ;;  %v9190_v43 = vld [vmem:[%s16340_s3 + $0x4a8] sm:$0xff] }
 0x286   : > { %6045 = vmatprep.mubr.f32.mxu0 %v14627_v57  ;;  %10963 = vmatprep.subr.bf16.mxu1 %v14707_v62  ;;  %v9192_v62 = vld [vmem:[%s16340_s3 + $0x4b8] sm:$0xff] }
 0x287   : > { %11043 = vmatprep.subr.bf16.mxu0 %v14968_v49  ;;  %v15009_v22 = vpack.c.bf16 %v9192_v62, %v9190_v43  ;;  %v6442_v43 = vld [vmem:[%s16340_s3 + $0x60] sm:$0xff]  ;;  %v6444_v62 = vld [vmem:[%s16340_s3 + $0x70] sm:$0xff] }
 0x288   : > { %6046 = vmatmul.mubr.f32.gmra.mrb[38].mxu0 %v5832_v53  ;;  %v15193_v41 = vpack.c.bf16 %v6444_v62, %v6442_v43  ;;  %v9235_v62 = vld [vmem:[%s16340_s3 + $0x208] sm:$0xff] }
 0x289   : > { %10965 = vmatpush1.bf16.msra.mxu1 %v14722_v31  ;;  %11045 = vmatpush1.bf16.msra.mxu0 %v14978_v11  ;;  %v9194_v31 = vld [vmem:[%s16340_s3 + $0x4c8] sm:$0xff] }
 0x28a   : > { %10999 = vmatprep.subr.bf16.mxu1 %v14725_v15  ;;  %11047 = vmatprep.subr.bf16.mxu0 %v14982_v33  ;;  %v9196_v15 = vld [vmem:[%s16340_s3 + $0x4d8] sm:$0xff] }
 0x28b   : > { %6262 = vmatprep.mubr.f32.mxu0 %v14627_v57  ;;  %v15031_v44 = vpack.c.bf16 %v9196_v15, %v9194_v31  ;;  %v6446_v31 = vld [vmem:[%s16340_s3 + $0x80] sm:$0xff]  ;;  %v6448_v15 = vld [vmem:[%s16340_s3 + $0x90] sm:$0xff] }
 0x28c   : > { %5898 = vmatmul.mubr.f32.vlgmr.msra.gmra.mrb[32].mxu1 %v5826_v1  ;;  %v9193_v1 = vld [vmem:[%s16340_s3 + $0x4c0] sm:$0xff] }
 0x28d   : > { %11001 = vmatpush1.bf16.msra.mxu1 %v14740_v54  ;;  %11049 = vmatpush1.bf16.msra.mxu0 %v14999_v0  ;;  %v9198_v54 = vld [vmem:[%s16340_s3 + $0x4e8] sm:$0xff]  ;;  %v15041_v56 = vpack.c.bf16 %v9195_v19, %v9193_v1  ;;  %v6453_v1 = vld [vmem:[%s16340_s3 + $0xb8] sm:$0xff]  ;;  %v15213_v19 = vpack.c.bf16 %v6448_v15, %v6446_v31 }
 0x28e   : > { %5903 = vmatprep.mubr.f32.mxu1 %v14627_v57  ;;  %11003 = vmatprep.subr.bf16.mxu1 %v14749_v8  ;;  %v9200_v8 = vld [vmem:[%s16340_s3 + $0x4f8] sm:$0xff] }
 0x28f   : > { %11051 = vmatprep.subr.bf16.mxu0 %v15009_v22  ;;  %v15052_v28 = vpack.c.bf16 %v9200_v8, %v9198_v54  ;;  %v6450_v8 = vld [vmem:[%s16340_s3 + $0xa0] sm:$0xff] }
 0x290   : > { %5904 = vmatmul.mubr.f32.gmra.mrb[34].mxu1 %v5828_v26  ;;  %v9197_v26 = vld [vmem:[%s16340_s3 + $0x4e0] sm:$0xff] }
 0x291   : > { %11005 = vmatpush1.bf16.msra.mxu1 %v14758_v42  ;;  %11053 = vmatpush1.bf16.msra.mxu0 %v15020_v5  ;;  %v15056_v42 = vpack.c.bf16 %v9199_v25, %v9197_v26  ;;  %v6457_v26 = vld [vmem:[%s16340_s3 + $0xd8] sm:$0xff] }
 0x292   : > { %5909 = vmatprep.mubr.f32.mxu1 %v14627_v57  ;;  %11007 = vmatprep.subr.bf16.mxu1 %v14775_v30  ;;  %v6061_v30 = vld [vmem:[#allocation2 + $0x4] ss:$2 sm:$0xff] }
 0x293   : > { %11055 = vmatprep.subr.bf16.mxu0 %v15031_v44 }
 0x294   : > { %5910 = vmatmul.mubr.f32.gmra.mrb[36].mxu1 %v5830_v10 }
 0x295   : > { %11009 = vmatpush1.bf16.msra.mxu1 %v14784_v21  ;;  %11057 = vmatpush1.bf16.msra.mxu0 %v15041_v56  ;;  %v6063_v21 = vld [vmem:[#allocation2 + $0x14] ss:$2 sm:$0xff] }
 0x296   : > { %5915 = vmatprep.mubr.f32.mxu1 %v14627_v57  ;;  %11011 = vmatprep.subr.bf16.mxu1 %v14790_v18  ;;  %v6065_v18 = vld [vmem:[#allocation2 + $0x24] ss:$2 sm:$0xff] }
 0x297   : > { %11059 = vmatprep.subr.bf16.mxu0 %v15052_v28 }
 0x298   : > { %5916 = vmatmul.mubr.f32.gmra.mrb[38].mxu1 %v5832_v53 }
 0x299   : > { %11013 = vmatpush1.bf16.msra.mxu1 %v14809_v46  ;;  %11061 = vmatpush1.bf16.msra.mxu0 %v15056_v42  ;;  %v6067_v46 = vld [vmem:[#allocation2 + $0x34] ss:$2 sm:$0xff] }
 0x29a   : > { %11015 = vmatprep.subr.bf16.mxu1 %v14811_v3  ;;  %11095 = vmatprep.subr.bf16.mxu0 %v14269_v35  ;;  %v6431_v3 = vld [vmem:[%s16340_s3 + $0x8] sm:$0xff] }
 0x29b   : > { %6132 = vmatprep.mubr.f32.mxu1 %v14627_v57 }
 0x29c   : > { %6263 = vmatmul.mubr.f32.vlgmr.msra.gmra.mrb[32].mxu0 %v6061_v30 }
 0x29d   : > { %11017 = vmatpush1.bf16.msra.mxu1 %v14828_v38  ;;  %11097 = vmatpush1.bf16.msra.mxu0 %v14286_v29  ;;  %v6433_v38 = vld [vmem:[%s16340_s3 + $0x18] sm:$0xff] }
 0x29e   : > { %6268 = vmatprep.mubr.f32.mxu0 %v14627_v57  ;;  %11019 = vmatprep.subr.bf16.mxu1 %v14838_v17  ;;  %v15107_v17 = vpack.c.bf16 %v6433_v38, %v6431_v3  ;;  %v6456_v3 = vld [vmem:[%s16340_s3 + $0xd0] sm:$0xff] }
 0x29f   : > { %11099 = vmatprep.subr.bf16.mxu0 %v14296_v4 }
 0x2a0   : > { %6269 = vmatmul.mubr.f32.gmra.mrb[34].mxu0 %v6063_v21 }
 0x2a1   : > { %11021 = vmatpush1.bf16.msra.mxu1 %v14849_v47  ;;  %11101 = vmatpush1.bf16.msra.mxu0 %v14310_v23  ;;  %v6430_v47 = vld [vmem:[%s16340_s3] sm:$0xff] }
 0x2a2   : > { %6274 = vmatprep.mubr.f32.mxu0 %v14627_v57  ;;  %11023 = vmatprep.subr.bf16.mxu1 %v14860_v16  ;;  %v6432_v16 = vld [vmem:[%s16340_s3 + $0x10] sm:$0xff] }
 0x2a3   : > { %11103 = vmatprep.subr.bf16.mxu0 %v14322_v20 }
 0x2a4   : > { %6275 = vmatmul.mubr.f32.gmra.mrb[36].mxu0 %v6065_v18 }
 0x2a5   : > { %11025 = vmatpush1.bf16.msra.mxu1 %v14871_v50  ;;  %11105 = vmatpush1.bf16.msra.mxu0 %v14336_v51  ;;  %v6435_v50 = vld [vmem:[%s16340_s3 + $0x28] sm:$0xff] }
 0x2a6   : > { %6280 = vmatprep.mubr.f32.mxu0 %v14627_v57  ;;  %11027 = vmatprep.subr.bf16.mxu1 %v14882_v6  ;;  %v6437_v6 = vld [vmem:[%s16340_s3 + $0x38] sm:$0xff] }
 0x2a7   : > { %11107 = vmatprep.subr.bf16.mxu0 %v14348_v2 }
 0x2a8   : > { %6281 = vmatmul.mubr.f32.gmra.mrb[38].mxu0 %v6067_v46 }
 0x2a9   : > { %11029 = vmatpush1.bf16.msra.mxu1 %v14893_v9  ;;  %11109 = vmatpush1.bf16.msra.mxu0 %v14362_v32  ;;  %v15125_v9 = vpack.c.bf16 %v6432_v16, %v6430_v47  ;;  %v6459_v47 = vld [vmem:[%s16340_s3 + $0xe8] sm:$0xff]  ;;  %v6461_v16 = vld [vmem:[%s16340_s3 + $0xf8] sm:$0xff] }
 0x2aa   : > { %11063 = vmatprep.subr.bf16.mxu1 %v14897_v55  ;;  %11111 = vmatprep.subr.bf16.mxu0 %v14366_v39  ;;  %v15127_v55 = vld [vmem:[#allocation2 + $0x41] ss:$2 sm:$0xff] }
 0x2ab   : > { %6574 = vmatprep.mubr.f32.mxu0 %v14627_v57 }
 0x2ac   : > { %6133 = vmatmul.mubr.f32.vlgmr.msra.gmra.mrb[32].mxu1 %v6061_v30 }
 0x2ad   : > { %11065 = vmatpush1.bf16.msra.mxu1 %v14915_v48  ;;  %11113 = vmatpush1.bf16.msra.mxu0 %v14387_v37  ;;  %v15130_v48 = vpack.c.bf16 %v6437_v6, %v6435_v50 }
 0x2ae   : > { %6138 = vmatprep.mubr.f32.mxu1 %v14627_v57  ;;  %11067 = vmatprep.subr.bf16.mxu1 %v14925_v40  ;;  %v6434_v40 = vld [vmem:[%s16340_s3 + $0x20] sm:$0xff] }
 0x2af   : > { %11115 = vmatprep.subr.bf16.mxu0 %v14391_v61 }
 0x2b0   : > { %6139 = vmatmul.mubr.f32.gmra.mrb[34].mxu1 %v6063_v21 }
 0x2b1   : > { %11069 = vmatpush1.bf16.msra.mxu1 %v14936_v34  ;;  %11117 = vmatpush1.bf16.msra.mxu0 %v14409_v14  ;;  %v6436_v34 = vld [vmem:[%s16340_s3 + $0x30] sm:$0xff] }
 0x2b2   : > { %6144 = vmatprep.mubr.f32.mxu1 %v14627_v57  ;;  %11071 = vmatprep.subr.bf16.mxu1 %v14947_v7  ;;  %v6439_v7 = vld [vmem:[%s16340_s3 + $0x48] sm:$0xff]  ;;  %v15149_v10 = vpack.c.bf16 %v6436_v34, %v6434_v40 }
 0x2b3   : > { %11119 = vmatprep.subr.bf16.mxu0 %v14413_v60 }
 0x2b4   : > { %6145 = vmatmul.mubr.f32.gmra.mrb[36].mxu1 %v6065_v18  ;;  %v6298_v18 = vld [vmem:[#allocation2 + $0x15] ss:$2 sm:$0xff] }
 0x2b5   : > { %11073 = vmatpush1.bf16.msra.mxu1 %v14957_v59  ;;  %11121 = vmatpush1.bf16.msra.mxu0 %v14429_v24  ;;  %v6441_v59 = vld [vmem:[%s16340_s3 + $0x58] sm:$0xff] }
 0x2b6   : > { %6150 = vmatprep.mubr.f32.mxu1 %v14627_v57  ;;  %11075 = vmatprep.subr.bf16.mxu1 %v14968_v49  ;;  %v15151_v49 = vld [vmem:[#allocation2 + $0x51] ss:$2 sm:$0xff]  ;;  %v15154_v63 = vpack.c.bf16 %v6441_v59, %v6439_v7 }
 0x2b7   : > { %11123 = vmatprep.subr.bf16.mxu0 %v14433_v13 }
 0x2b8   : > { %6151 = vmatmul.mubr.f32.gmra.mrb[38].mxu1 %v6067_v46 }
 0x2b9   : > { %11077 = vmatpush1.bf16.msra.mxu1 %v14978_v11  ;;  %11125 = vmatpush1.bf16.msra.mxu0 %v14449_v58  ;;  %v6440_v11 = vld [vmem:[%s16340_s3 + $0x50] sm:$0xff] }
 0x2ba   : > { %11079 = vmatprep.subr.bf16.mxu1 %v14982_v33  ;;  %6367 = vmatprep.mubr.f32.mxu1 %v14627_v57  ;;  %v6443_v33 = vld [vmem:[%s16340_s3 + $0x68] sm:$0xff]  ;;  %v15173_v52 = vpack.c.bf16 %v6440_v11, %v6438_v45  ;;  %v15258_v11 = vpack.c.bf16 %v6461_v16, %v6459_v47 }
 0x2bb   : > { %11127 = vmatprep.subr.bf16.mxu0 %v15107_v17  ;;  %v15176_v53 = vpack.c.bf16 %v6445_v36, %v6443_v33  ;;  %v6300_v45 = vld [vmem:[#allocation2 + $0x25] ss:$2 sm:$0xff] }
 0x2bc   : > { %6575 = vmatmul.mubr.f32.vlgmr.msra.gmra.mrb[40].mxu0 %v15127_v55  ;;  %v6460_v33 = vld [vmem:[%s16340_s3 + $0xf0] sm:$0xff] }
 0x2bd   : > { %11081 = vmatpush1.bf16.msra.mxu1 %v14999_v0  ;;  %6580 = vmatprep.mubr.f32.mxu0 %v14627_v57  ;;  %v6447_v0 = vld [vmem:[%s16340_s3 + $0x88] sm:$0xff] }
 0x2be   : > { %11083 = vmatprep.subr.bf16.mxu1 %v15009_v22  ;;  %11129 = vmatpush1.bf16.msra.mxu0 %v15125_v9  ;;  %v15196_v22 = vpack.c.bf16 %v6449_v12, %v6447_v0  ;;  %v9237_v0 = vld [vmem:[%s16340_s3 + $0x218] sm:$0xff] }
 0x2bf   : > { %11131 = vmatprep.subr.bf16.mxu0 %v15130_v48 }
 0x2c0   : > { %6581 = vmatmul.mubr.f32.gmra.mrb[42].mxu0 %v15151_v49 }
 0x2c1   : > { %11085 = vmatpush1.bf16.msra.mxu1 %v15020_v5  ;;  %6586 = vmatprep.mubr.f32.mxu0 %v14627_v57  ;;  %v6451_v5 = vld [vmem:[%s16340_s3 + $0xa8] sm:$0xff] }
 0x2c2   : > { %11087 = vmatprep.subr.bf16.mxu1 %v15031_v44  ;;  %11133 = vmatpush1.bf16.msra.mxu0 %v15149_v10  ;;  %v6296_v44 = vld [vmem:[#allocation2 + $0x5] ss:$2 sm:$0xff]  ;;  %v15216_v54 = vpack.c.bf16 %v6453_v1, %v6451_v5 }
 0x2c3   : > { %11135 = vmatprep.subr.bf16.mxu0 %v15154_v63 }
 0x2c5   : > { %11089 = vmatpush1.bf16.msra.mxu1 %v15041_v56  ;;  %v6452_v56 = vld [vmem:[%s16340_s3 + $0xb0] sm:$0xff] }
 0x2c6   : > { %11091 = vmatprep.subr.bf16.mxu1 %v15052_v28  ;;  %11137 = vmatpush1.bf16.msra.mxu0 %v15173_v52 }
 0x2c7   : > { %11139 = vmatprep.subr.bf16.mxu0 %v15176_v53 }
 0x2c9   : > { %11093 = vmatpush1.bf16.msra.mxu1 %v15056_v42  ;;  %v15234_v42 = vpack.c.bf16 %v6452_v56, %v6450_v8  ;;  %v6302_v56 = vld [vmem:[#allocation2 + $0x35] ss:$2 sm:$0xff] }
 0x2ca   : > { %11159 = vmatprep.subr.bf16.mxu1 %v14269_v35  ;;  %11141 = vmatpush1.bf16.msra.mxu0 %v15193_v41  ;;  %v6455_v35 = vld [vmem:[%s16340_s3 + $0xc8] sm:$0xff] }
 0x2cb   : > { %11143 = vmatprep.subr.bf16.mxu0 %v15196_v22  ;;  %v15237_v46 = vpack.c.bf16 %v6457_v26, %v6455_v35  ;;  %v15280_v35 = vpack.c.bf16 %v9237_v0, %v9235_v62  ;;  %v9246_v62 = vld [vmem:[%s16340_s3 + $0x260] sm:$0xff]  ;;  %v9248_v0 = vld [vmem:[%s16340_s3 + $0x270] sm:$0xff] }
 0x2cc   : > { %6368 = vmatmul.mubr.f32.vlgmr.msra.gmra.mrb[32].mxu1 %v6296_v44 }
 0x2cd   : > { %11161 = vmatpush1.bf16.msra.mxu1 %v14286_v29  ;;  %6373 = vmatprep.mubr.f32.mxu1 %v14627_v57  ;;  %v6454_v29 = vld [vmem:[%s16340_s3 + $0xc0] sm:$0xff] }
 0x2ce   : > { %v5078_v25 = vpop.f32.mrb[24].mxu0  ;;  %v5195_v28 = vpop.f32.mrb[24].mxu1  ;;  %11163 = vmatprep.subr.bf16.mxu1 %v14296_v4  ;;  %11145 = vmatpush1.bf16.msra.mxu0 %v15213_v19  ;;  %v15255_v34 = vpack.c.bf16 %v6456_v3, %v6454_v29 }
 0x2cf   : > { %v5080_v30 = vpop.f32.mrb[25].mxu0  ;;  %v5197_v21 = vpop.f32.mrb[25].mxu1  ;;  %11147 = vmatprep.subr.bf16.mxu0 %v15216_v54 }
 0x2d0   : > { %v5226_v4 = vmax.f32 %v5078_v25, %v5080_v30  ;;  %v5230_v38 = vmax.f32 %v5195_v28, %v5197_v21  ;;  %6374 = vmatmul.mubr.f32.gmra.mrb[34].mxu1 %v6298_v18 }
 0x2d1   : > { %11165 = vmatpush1.bf16.msra.mxu1 %v14310_v23  ;;  %6379 = vmatprep.mubr.f32.mxu1 %v14627_v57  ;;  %v6458_v23 = vld [vmem:[%s16340_s3 + $0xe0] sm:$0xff] }
 0x2d2   : > { %v5234_v50 = vmax.f32 %v5226_v4, %v5230_v38  ;;  %v5084_v6 = vpop.f32.mrb[26].mxu0  ;;  %v5201_v40 = vpop.f32.mrb[26].mxu1  ;;  %11167 = vmatprep.subr.bf16.mxu1 %v14322_v20  ;;  %11149 = vmatpush1.bf16.msra.mxu0 %v15234_v42  ;;  %v15277_v1 = vpack.c.bf16 %v6460_v33, %v6458_v23  ;;  %v9244_v23 = vld [vmem:[%s16340_s3 + $0x250] sm:$0xff] }
 0x2d3   : > { %v5086_v7 = vpop.f32.mrb[27].mxu0  ;;  %v5203_v59 = vpop.f32.mrb[27].mxu1  ;;  %11151 = vmatprep.subr.bf16.mxu0 %v15237_v46 }
 0x2d4   : > { %v5238_v20 = vadd.f32 %v14763_v27, %v5234_v50  ;;  %v5227_v36 = vmax.f32 %v5084_v6, %v5086_v7  ;;  %v5231_v43 = vmax.f32 %v5201_v40, %v5203_v59  ;;  %6380 = vmatmul.mubr.f32.gmra.mrb[36].mxu1 %v6300_v45  ;;  %v6463_v40 = vld [vmem:[#allocation2 + $0x40] ss:$2 sm:$0xff]  ;;  %v9245_v7 = vld [vmem:[%s16340_s3 + $0x258] sm:$0xff] }
 0x2d5   : > { %11169 = vmatpush1.bf16.msra.mxu1 %v14336_v51  ;;  %6385 = vmatprep.mubr.f32.mxu1 %v14627_v57  ;;  %v9242_v45 = vld [vmem:[%s16340_s3 + $0x240] sm:$0xff] }
 0x2d6   : > { %v5242_v12 = vmax.f32 %v5238_v20, 0.0  ;;  %v5235_v31 = vmax.f32 %v5227_v36, %v5231_v43  ;;  %v5090_v15 = vpop.f32.mrb[28].mxu0  ;;  %v5207_v5 = vpop.f32.mrb[28].mxu1  ;;  %11171 = vmatprep.subr.bf16.mxu1 %v14348_v2  ;;  %11153 = vmatpush1.bf16.msra.mxu0 %v15255_v34  ;;  %v9249_v36 = vld [vmem:[%s16340_s3 + $0x278] sm:$0xff]  ;;  %v15372_v43 = vld [vmem:[#allocation2 + $0x80] sm:$0xff] }
 0x2d7   : > { %v5092_v44 = vpop.f32.mrb[29].mxu0  ;;  %v5209_v8 = vpop.f32.mrb[29].mxu1  ;;  %11155 = vmatprep.subr.bf16.mxu0 %v15258_v11 }
 0x2d8   : > { %5246 = vst [vmem:[#allocation2 + $0x60] sm:$0xff] %v5242_v12  ;;  %v5239_v51 = vadd.f32 %v14763_v27, %v5235_v31  ;;  %v5228_v26 = vmax.f32 %v5090_v15, %v5092_v44  ;;  %v5232_v25 = vmax.f32 %v5207_v5, %v5209_v8  ;;  %6386 = vmatmul.mubr.f32.gmra.mrb[38].mxu1 %v6302_v56  ;;  %v9253_v5 = vld [vmem:[%s16340_s3 + $0x298] sm:$0xff]  ;;  %v9250_v8 = vld [vmem:[%s16340_s3 + $0x280] sm:$0xff]  ;;  %v9252_v56 = vld [vmem:[%s16340_s3 + $0x290] sm:$0xff] }
 0x2d9   : > { %11173 = vmatpush1.bf16.msra.mxu1 %v14362_v32  ;;  %6760 = vmatprep.mubr.f32.mxu1 %v14627_v57  ;;  %v15397_v44 = vpack.c.bf16 %v9248_v0, %v9246_v62  ;;  %v9286_v0 = vld [vmem:[%s16340_s3 + $0x3a0] sm:$0xff] }
 0x2da   : > { %v5243_v2 = vmax.f32 %v5239_v51, 0.0  ;;  %v5236_v28 = vmax.f32 %v5228_v26, %v5232_v25  ;;  %v5096_v30 = vpop.f32.mrb[30].mxu0  ;;  %v5213_v21 = vpop.f32.mrb[30].mxu1  ;;  %11175 = vmatprep.subr.bf16.mxu1 %v14366_v39  ;;  %11157 = vmatpush1.bf16.msra.mxu0 %v15277_v1  ;;  %v9255_v51 = vld [vmem:[%s16340_s3 + $0x2a8] sm:$0xff]  ;;  %v15419_v26 = vpack.c.bf16 %v9252_v56, %v9250_v8  ;;  %v9297_v56 = vld [vmem:[%s16340_s3 + $0x3f8] sm:$0xff] }
 0x2db   : > { %v5098_v18 = vpop.f32.mrb[31].mxu0  ;;  %v5215_v29 = vpop.f32.mrb[31].mxu1  ;;  %11223 = vmatprep.subr.bf16.mxu0 %v15280_v35  ;;  %v9295_v8 = vld [vmem:[%s16340_s3 + $0x3e8] sm:$0xff] }
 0x2dc   : > { %5247 = vst [vmem:[#allocation2 + $0x68] sm:$0xff] %v5243_v2  ;;  %v5240_v3 = vadd.f32 %v14763_v27, %v5236_v28  ;;  %v5229_v4 = vmax.f32 %v5096_v30, %v5098_v18  ;;  %v5233_v38 = vmax.f32 %v5213_v21, %v5215_v29  ;;  %v9254_v2 = vld [vmem:[%s16340_s3 + $0x2a0] sm:$0xff]  ;;  %v9256_v28 = vld [vmem:[%s16340_s3 + $0x2b0] sm:$0xff] }
 0x2dd   : > { %11177 = vmatpush1.bf16.msra.mxu1 %v14387_v37  ;;  %v9234_v37 = vld [vmem:[%s16340_s3 + $0x200] sm:$0xff]  ;;  %v15440_v30 = vpack.c.bf16 %v9256_v28, %v9254_v2  ;;  %v9260_v29 = vld [vmem:[%s16340_s3 + $0x2d0] sm:$0xff]  ;;  %v9301_v2 = vld [vmem:[%s16340_s3 + $0x418] sm:$0xff] }
 0x2de   : > { %v5244_v32 = vmax.f32 %v5240_v3, 0.0  ;;  %v5237_v47 = vmax.f32 %v5229_v4, %v5233_v38  ;;  %11179 = vmatprep.subr.bf16.mxu1 %v14391_v61  ;;  %v9236_v61 = vld [vmem:[%s16340_s3 + $0x210] sm:$0xff]  ;;  %v9258_v18 = vld [vmem:[%s16340_s3 + $0x2c0] sm:$0xff] }
 0x2df   : > { %v15332_v6 = vld [vmem:[#allocation2 + $0x52] ss:$2 sm:$0xff]  ;;  %v15460_v3 = vpack.c.bf16 %v9260_v29, %v9258_v18  ;;  %v9303_v18 = vld [vmem:[%s16340_s3 + $0x428] sm:$0xff] }
 0x2e0   : > { %5248 = vst [vmem:[#allocation2 + $0x70] sm:$0xff] %v5244_v32  ;;  %v5241_v39 = vadd.f32 %v14763_v27, %v5237_v47  ;;  %v9238_v27 = vld [vmem:[%s16340_s3 + $0x220] sm:$0xff]  ;;  %v9264_v32 = vld [vmem:[%s16340_s3 + $0x2f0] sm:$0xff]  ;;  %v9305_v29 = vld [vmem:[%s16340_s3 + $0x438] sm:$0xff] }
 0x2e1   : > { %11181 = vmatpush1.bf16.msra.mxu1 %v14409_v14  ;;  %v15308_v14 = vld [vmem:[#allocation2 + $0x42] ss:$2 sm:$0xff] }
 0x2e2   : > { %v5245_v16 = vmax.f32 %v5241_v39, 0.0  ;;  %11183 = vmatprep.subr.bf16.mxu1 %v14413_v60  ;;  %v9262_v38 = vld [vmem:[%s16340_s3 + $0x2e0] sm:$0xff] }
 0x2e3   : > { %v15294_v50 = vld [vmem:[#allocation2 + $0x61] ss:$2 sm:$0xff]  ;;  %v6467_v31 = vld [vmem:[#allocation2 + $0x60] ss:$2 sm:$0xff]  ;;  %v15480_v47 = vpack.c.bf16 %v9264_v32, %v9262_v38  ;;  %v15687_v38 = vpack.c.bf16 %v9305_v29, %v9303_v18 }
 0x2e4   : > { %5249 = vst [vmem:[#allocation2 + $0x78] sm:$0x3f] %v5245_v16  ;;  %6587 = vmatmul.mubr.f32.gmra.mrb[44].mxu0 %v15294_v50  ;;  %v9266_v39 = vld [vmem:[%s16340_s3 + $0x300] sm:$0xff]  ;;  %v9268_v16 = vld [vmem:[%s16340_s3 + $0x310] sm:$0xff]  ;;  %v9307_v32 = vld [vmem:[%s16340_s3 + $0x448] sm:$0xff] }
 0x2e5   : > { %11185 = vmatpush1.bf16.msra.mxu1 %v14429_v24  ;;  %6592 = vmatprep.mubr.f32.mxu0 %v14627_v57  ;;  %v9239_v24 = vld [vmem:[%s16340_s3 + $0x228] sm:$0xff] }
 0x2e6   : > { %11187 = vmatprep.subr.bf16.mxu1 %v14433_v13  ;;  %v9241_v13 = vld [vmem:[%s16340_s3 + $0x238] sm:$0xff] }
 0x2e7   : > { %v15355_v33 = vld [vmem:[#allocation2 + $0x62] ss:$2 sm:$0xff] }
 0x2e9   : > { %11189 = vmatpush1.bf16.msra.mxu1 %v14449_v58  ;;  %v15322_v58 = vpack.c.bf16 %v9236_v61, %v9234_v37  ;;  %v15501_v61 = vpack.c.bf16 %v9268_v16, %v9266_v39  ;;  %v9308_v39 = vld [vmem:[%s16340_s3 + $0x450] sm:$0xff] }
 0x2ea   : > { %11191 = vmatprep.subr.bf16.mxu1 %v15107_v17  ;;  %v9240_v17 = vld [vmem:[%s16340_s3 + $0x230] sm:$0xff] }
 0x2eb   : > { %v15310_v60 = vld [vmem:[#allocation2 + $0x71] ss:$2 sm:$0xff]  ;;  %v15345_v59 = vpack.c.bf16 %v9240_v17, %v9238_v27  ;;  %v15385_v12 = vld [vmem:[#allocation2 + $0x72] ss:$2 sm:$0xff] }
 0x2ec   : > { %6761 = vmatmul.mubr.f32.vlgmr.msra.gmra.mrb[40].mxu1 %v15308_v14  ;;  %6593 = vmatmul.mubr.f32.gmra.mrb[46].mxu0 %v15310_v60  ;;  %v9277_v27 = vld [vmem:[%s16340_s3 + $0x358] sm:$0xff]  ;;  %v7008_v16 = vld [vmem:[#allocation2 + $0x63] ss:$2 sm:$0xff] }
 0x2ed   : > { %11193 = vmatpush1.bf16.msra.mxu1 %v15125_v9  ;;  %6766 = vmatprep.mubr.f32.mxu1 %v14627_v57  ;;  %v15334_v9 = vpack.c.bf16 %v9241_v13, %v9239_v24  ;;  %v9272_v24 = vld [vmem:[%s16340_s3 + $0x330] sm:$0xff] }
 0x2ee   : > { %6663 = vmatprep.mubr.f32.mxu0 %v14627_v57  ;;  %11195 = vmatprep.subr.bf16.mxu1 %v15130_v48  ;;  %v9243_v48 = vld [vmem:[%s16340_s3 + $0x248] sm:$0xff] }
 0x2ef   : > { %v15359_v20 = vpack.c.bf16 %v9245_v7, %v9243_v48  ;;  %v9281_v48 = vld [vmem:[%s16340_s3 + $0x378] sm:$0xff] }
 0x2f0   : > { %6767 = vmatmul.mubr.f32.gmra.mrb[42].mxu1 %v15332_v6  ;;  %6664 = vmatmul.mubr.f32.vlgmr.msra.gmra.mrb[40].mxu0 %v6463_v40 }
 0x2f1   : > { %11197 = vmatpush1.bf16.msra.mxu1 %v15149_v10  ;;  %11225 = vmatpush1.bf16.msra.mxu0 %v15322_v58  ;;  %v6465_v10 = vld [vmem:[#allocation2 + $0x50] ss:$2 sm:$0xff] }
 0x2f2   : > { %6772 = vmatprep.mubr.f32.mxu1 %v14627_v57  ;;  %6669 = vmatprep.mubr.f32.mxu0 %v14627_v57  ;;  %v9247_v57 = vld [vmem:[%s16340_s3 + $0x268] sm:$0xff] }
 0x2f3   : > { %11199 = vmatprep.subr.bf16.mxu1 %v15154_v63  ;;  %11227 = vmatprep.subr.bf16.mxu0 %v15334_v9  ;;  %v15370_v63 = vpack.c.bf16 %v9244_v23, %v9242_v45  ;;  %v15389_v15 = vpack.c.bf16 %v9249_v36, %v9247_v57  ;;  %v9283_v45 = vld [vmem:[%s16340_s3 + $0x388] sm:$0xff]  ;;  %v9285_v23 = vld [vmem:[%s16340_s3 + $0x398] sm:$0xff]  ;;  %v9282_v57 = vld [vmem:[%s16340_s3 + $0x380] sm:$0xff] }
 0x2f4   : > { %6773 = vmatmul.mubr.f32.gmra.mrb[44].mxu1 %v15355_v33  ;;  %6670 = vmatmul.mubr.f32.gmra.mrb[42].mxu0 %v6465_v10  ;;  %v9289_v36 = vld [vmem:[%s16340_s3 + $0x3b8] sm:$0xff] }
 0x2f5   : > { %11201 = vmatpush1.bf16.msra.mxu1 %v15173_v52  ;;  %11229 = vmatpush1.bf16.msra.mxu0 %v15345_v59  ;;  %v9251_v52 = vld [vmem:[%s16340_s3 + $0x288] sm:$0xff] }
 0x2f6   : > { %6778 = vmatprep.mubr.f32.mxu1 %v15372_v43  ;;  %6675 = vmatprep.mubr.f32.mxu0 %v15372_v43 }
 0x2f7   : > { %11203 = vmatprep.subr.bf16.mxu1 %v15176_v53  ;;  %11231 = vmatprep.subr.bf16.mxu0 %v15359_v20  ;;  %v15401_v53 = vpack.c.bf16 %v9253_v5, %v9251_v52  ;;  %v9288_v52 = vld [vmem:[%s16340_s3 + $0x3b0] sm:$0xff] }
 0x2f8   : > { %6779 = vmatmul.mubr.f32.gmra.mrb[46].mxu1 %v15385_v12  ;;  %6676 = vmatmul.mubr.f32.gmra.mrb[44].mxu0 %v6467_v31  ;;  %v9293_v31 = vld [vmem:[%s16340_s3 + $0x3d8] sm:$0xff] }
 0x2f9   : > { %11205 = vmatpush1.bf16.msra.mxu1 %v15193_v41  ;;  %11233 = vmatpush1.bf16.msra.mxu0 %v15370_v63  ;;  %v6469_v41 = vld [vmem:[#allocation2 + $0x70] ss:$2 sm:$0xff] }
 0x2fa   : > { %6681 = vmatprep.mubr.f32.mxu0 %v15372_v43  ;;  %11207 = vmatprep.subr.bf16.mxu1 %v15196_v22  ;;  %v9257_v22 = vld [vmem:[%s16340_s3 + $0x2b8] sm:$0xff] }
 0x2fb   : > { %11235 = vmatprep.subr.bf16.mxu0 %v15389_v15  ;;  %6849 = vmatprep.mubr.f32.mxu1 %v15372_v43  ;;  %v15423_v25 = vpack.c.bf16 %v9257_v22, %v9255_v51  ;;  %v15640_v51 = vpack.c.bf16 %v9297_v56, %v9295_v8  ;;  %v9294_v22 = vld [vmem:[%s16340_s3 + $0x3e0] sm:$0xff] }
 0x2fc   : > { %6682 = vmatmul.mubr.f32.gmra.mrb[46].mxu0 %v6469_v41  ;;  %v7244_v8 = vld [vmem:[#allocation2 + $0x74] ss:$2 sm:$0xff]  ;;  %v7472_v56 = vld [vmem:[#allocation2 + $0x45] ss:$2 sm:$0xff] }
 0x2fd   : > { %11209 = vmatpush1.bf16.msra.mxu1 %v15213_v19  ;;  %11237 = vmatpush1.bf16.msra.mxu0 %v15397_v44  ;;  %v9259_v19 = vld [vmem:[%s16340_s3 + $0x2c8] sm:$0xff] }
 0x2fe   : > { %11211 = vmatprep.subr.bf16.mxu1 %v15216_v54  ;;  %11239 = vmatprep.subr.bf16.mxu0 %v15401_v53  ;;  %v9261_v54 = vld [vmem:[%s16340_s3 + $0x2d8] sm:$0xff] }
 0x2ff   : > { %6970 = vmatprep.mubr.f32.mxu0 %v15372_v43  ;;  %v15444_v21 = vpack.c.bf16 %v9261_v54, %v9259_v19  ;;  %v9298_v19 = vld [vmem:[%s16340_s3 + $0x400] sm:$0xff]  ;;  %v9300_v54 = vld [vmem:[%s16340_s3 + $0x410] sm:$0xff] }
 0x301   : > { %11213 = vmatpush1.bf16.msra.mxu1 %v15234_v42  ;;  %11241 = vmatpush1.bf16.msra.mxu0 %v15419_v26  ;;  %v9263_v42 = vld [vmem:[%s16340_s3 + $0x2e8] sm:$0xff] }
 0x302   : > { %11215 = vmatprep.subr.bf16.mxu1 %v15237_v46  ;;  %11243 = vmatprep.subr.bf16.mxu0 %v15423_v25  ;;  %v9265_v46 = vld [vmem:[%s16340_s3 + $0x2f8] sm:$0xff] }
 0x303   : > { %v15464_v4 = vpack.c.bf16 %v9265_v46, %v9263_v42  ;;  %v15676_v42 = vpack.c.bf16 %v9300_v54, %v9298_v19  ;;  %v9302_v46 = vld [vmem:[%s16340_s3 + $0x420] sm:$0xff] }
 0x305   : > { %11217 = vmatpush1.bf16.msra.mxu1 %v15255_v34  ;;  %11245 = vmatpush1.bf16.msra.mxu0 %v15440_v30  ;;  %v9267_v34 = vld [vmem:[%s16340_s3 + $0x308] sm:$0xff] }
 0x306   : > { %11219 = vmatprep.subr.bf16.mxu1 %v15258_v11  ;;  %11247 = vmatprep.subr.bf16.mxu0 %v15444_v21  ;;  %v9269_v11 = vld [vmem:[%s16340_s3 + $0x318] sm:$0xff] }
 0x307   : > { %v15490_v37 = vpack.c.bf16 %v9269_v11, %v9267_v34  ;;  %v9309_v34 = vld [vmem:[%s16340_s3 + $0x458] sm:$0xff] }
 0x309   : > { %11221 = vmatpush1.bf16.msra.mxu1 %v15277_v1  ;;  %11249 = vmatpush1.bf16.msra.mxu0 %v15460_v3  ;;  %v9271_v1 = vld [vmem:[%s16340_s3 + $0x328] sm:$0xff] }
 0x30a   : > { %11251 = vmatprep.subr.bf16.mxu0 %v15464_v4  ;;  %11255 = vmatprep.subr.bf16.mxu1 %v15280_v35  ;;  %v9273_v35 = vld [vmem:[%s16340_s3 + $0x338] sm:$0xff] }
 0x30b   : > { %v15512_v13 = vpack.c.bf16 %v9273_v35, %v9271_v1  ;;  %v9311_v1 = vld [vmem:[%s16340_s3 + $0x468] sm:$0xff]  ;;  %v9313_v35 = vld [vmem:[%s16340_s3 + $0x478] sm:$0xff] }
 0x30c   : > { %6850 = vmatmul.mubr.f32.vlgmr.msra.gmra.mrb[40].mxu1 %v15127_v55  ;;  %v9270_v55 = vld [vmem:[%s16340_s3 + $0x320] sm:$0xff] }
 0x30d   : > { %11253 = vmatpush1.bf16.msra.mxu0 %v15480_v47  ;;  %11257 = vmatpush1.bf16.msra.mxu1 %v15322_v58  ;;  %v9275_v58 = vld [vmem:[%s16340_s3 + $0x348] sm:$0xff]  ;;  %v15524_v17 = vpack.c.bf16 %v9272_v24, %v9270_v55  ;;  %v9310_v55 = vld [vmem:[%s16340_s3 + $0x460] sm:$0xff]  ;;  %v9312_v24 = vld [vmem:[%s16340_s3 + $0x470] sm:$0xff] }
 0x30e   : > { %6855 = vmatprep.mubr.f32.mxu1 %v15372_v43  ;;  %11259 = vmatprep.subr.bf16.mxu1 %v15334_v9  ;;  %v15536_v40 = vpack.c.bf16 %v9277_v27, %v9275_v58  ;;  %v9279_v9 = vld [vmem:[%s16340_s3 + $0x368] sm:$0xff]  ;;  %v15731_v58 = vpack.c.bf16 %v9313_v35, %v9311_v1 }
 0x30f   : > { %11287 = vmatprep.subr.bf16.mxu0 %v15490_v37  ;;  %v9315_v27 = vld [vmem:[%s16340_s3 + $0x488] sm:$0xff] }
 0x310   : > { %6856 = vmatmul.mubr.f32.gmra.mrb[42].mxu1 %v15151_v49  ;;  %6971 = vmatmul.mubr.f32.vlgmr.msra.gmra.mrb[40].mxu0 %v15308_v14  ;;  %v9274_v49 = vld [vmem:[%s16340_s3 + $0x340] sm:$0xff]  ;;  %v9276_v14 = vld [vmem:[%s16340_s3 + $0x350] sm:$0xff] }
 0x311   : > { %11261 = vmatpush1.bf16.msra.mxu1 %v15345_v59  ;;  %11289 = vmatpush1.bf16.msra.mxu0 %v15501_v61  ;;  %v15548_v7 = vpack.c.bf16 %v9276_v14, %v9274_v49  ;;  %v15560_v59 = vpack.c.bf16 %v9281_v48, %v9279_v9  ;;  %v15741_v49 = vpack.c.bf16 %v9312_v24, %v9310_v55  ;;  %v9316_v9 = vld [vmem:[%s16340_s3 + $0x490] sm:$0xff]  ;;  %v9319_v48 = vld [vmem:[%s16340_s3 + $0x4a8] sm:$0xff] }
 0x312   : > { %6861 = vmatprep.mubr.f32.mxu1 %v15372_v43  ;;  %6976 = vmatprep.mubr.f32.mxu0 %v15372_v43 }
 0x313   : > { %11263 = vmatprep.subr.bf16.mxu1 %v15359_v20  ;;  %11291 = vmatprep.subr.bf16.mxu0 %v15512_v13  ;;  %v15576_v20 = vpack.c.bf16 %v9285_v23, %v9283_v45  ;;  %v9320_v45 = vld [vmem:[%s16340_s3 + $0x4b0] sm:$0xff]  ;;  %v9323_v23 = vld [vmem:[%s16340_s3 + $0x4c8] sm:$0xff] }
 0x314   : > { %6862 = vmatmul.mubr.f32.gmra.mrb[44].mxu1 %v15294_v50  ;;  %6977 = vmatmul.mubr.f32.gmra.mrb[42].mxu0 %v15332_v6  ;;  %v9278_v50 = vld [vmem:[%s16340_s3 + $0x360] sm:$0xff]  ;;  %v9280_v6 = vld [vmem:[%s16340_s3 + $0x370] sm:$0xff] }
 0x315   : > { %11265 = vmatpush1.bf16.msra.mxu1 %v15370_v63  ;;  %11293 = vmatpush1.bf16.msra.mxu0 %v15524_v17  ;;  %v15572_v10 = vpack.c.bf16 %v9280_v6, %v9278_v50 }
 0x316   : > { %6867 = vmatprep.mubr.f32.mxu1 %v15372_v43  ;;  %6982 = vmatprep.mubr.f32.mxu0 %v15372_v43 }
 0x317   : > { %11267 = vmatprep.subr.bf16.mxu1 %v15389_v15  ;;  %11295 = vmatprep.subr.bf16.mxu0 %v15536_v40  ;;  %v15616_v15 = vpack.c.bf16 %v9288_v52, %v9286_v0  ;;  %v9326_v52 = vld [vmem:[%s16340_s3 + $0x4e0] sm:$0xff] }
 0x318   : > { %6868 = vmatmul.mubr.f32.gmra.mrb[46].mxu1 %v15310_v60  ;;  %6983 = vmatmul.mubr.f32.gmra.mrb[44].mxu0 %v15355_v33  ;;  %v9284_v60 = vld [vmem:[%s16340_s3 + $0x390] sm:$0xff]  ;;  %v9287_v33 = vld [vmem:[%s16340_s3 + $0x3a8] sm:$0xff] }
 0x319   : > { %11269 = vmatpush1.bf16.msra.mxu1 %v15397_v44  ;;  %11297 = vmatpush1.bf16.msra.mxu0 %v15548_v7  ;;  %v15595_v63 = vpack.c.bf16 %v9284_v60, %v9282_v57  ;;  %v15599_v62 = vpack.c.bf16 %v9289_v36, %v9287_v33  ;;  %v9290_v44 = vld [vmem:[%s16340_s3 + $0x3c0] sm:$0xff]  ;;  %v9324_v33 = vld [vmem:[%s16340_s3 + $0x4d0] sm:$0xff]  ;;  %v9327_v36 = vld [vmem:[%s16340_s3 + $0x4e8] sm:$0xff] }
 0x31a   : > { %6988 = vmatprep.mubr.f32.mxu0 %v15372_v43  ;;  %11271 = vmatprep.subr.bf16.mxu1 %v15401_v53  ;;  %v9292_v53 = vld [vmem:[%s16340_s3 + $0x3d0] sm:$0xff]  ;;  %v9322_v60 = vld [vmem:[%s16340_s3 + $0x4c0] sm:$0xff] }
 0x31b   : > { %11299 = vmatprep.subr.bf16.mxu0 %v15560_v59  ;;  %7075 = vmatprep.mubr.f32.mxu1 %v15372_v43  ;;  %v15636_v41 = vpack.c.bf16 %v9292_v53, %v9290_v44  ;;  %v12091_v44 = vmov 0.0|0.0   ;;  %v7242_v53 = vld [vmem:[#allocation2 + $0x64] ss:$2 sm:$0xff] }
 0x31c   : > { %6989 = vmatmul.mubr.f32.gmra.mrb[46].mxu0 %v15385_v12  ;;  %v9291_v12 = vld [vmem:[%s16340_s3 + $0x3c8] sm:$0xff] }
 0x31d   : > { %11273 = vmatpush1.bf16.msra.mxu1 %v15419_v26  ;;  %11301 = vmatpush1.bf16.msra.mxu0 %v15572_v10  ;;  %v15620_v5 = vpack.c.bf16 %v9293_v31, %v9291_v12  ;;  %v9296_v26 = vld [vmem:[%s16340_s3 + $0x3f0] sm:$0xff] }
 0x31e   : > { %11275 = vmatprep.subr.bf16.mxu1 %v15423_v25  ;;  %11303 = vmatprep.subr.bf16.mxu0 %v15576_v20  ;;  %v9299_v25 = vld [vmem:[%s16340_s3 + $0x408] sm:$0xff]  ;;  %v15656_v28 = vpack.c.bf16 %v9296_v26, %v9294_v22  ;;  %v9328_v12 = vld [vmem:[%s16340_s3 + $0x4f0] sm:$0xff] }
 0x31f   : > { %7204 = vmatprep.mubr.f32.mxu0 %v15372_v43  ;;  %v11380_v31 = vpack.c.bf16 %v9328_v12, %v9326_v52  ;;  %v9343_v52 = vld [vmem:[%s16343_s6 + $0xc0] sm:$0xff]  ;;  %v9344_v12 = vld [vmem:[%s16343_s6 + $0xc8] sm:$0xff] }
 0x321   : > { %11277 = vmatpush1.bf16.msra.mxu1 %v15440_v30  ;;  %11305 = vmatpush1.bf16.msra.mxu0 %v15595_v63  ;;  %v7004_v30 = vld [vmem:[#allocation2 + $0x43] ss:$2 sm:$0xff] }
 0x322   : > { %11279 = vmatprep.subr.bf16.mxu1 %v15444_v21  ;;  %11307 = vmatprep.subr.bf16.mxu0 %v15599_v62  ;;  %v15666_v21 = vpack.c.bf16 %v9301_v2, %v9299_v25  ;;  %v7476_v2 = vld [vmem:[#allocation2 + $0x65] ss:$2 sm:$0xff] }
 0x325   : > { %11281 = vmatpush1.bf16.msra.mxu1 %v15460_v3  ;;  %11309 = vmatpush1.bf16.msra.mxu0 %v15616_v15  ;;  %v9304_v3 = vld [vmem:[%s16340_s3 + $0x430] sm:$0xff] }
 0x326   : > { %11283 = vmatprep.subr.bf16.mxu1 %v15464_v4  ;;  %11311 = vmatprep.subr.bf16.mxu0 %v15620_v5  ;;  %v7006_v4 = vld [vmem:[#allocation2 + $0x53] ss:$2 sm:$0xff]  ;;  %v15697_v11 = vpack.c.bf16 %v9304_v3, %v9302_v46 }
 0x329   : > { %11285 = vmatpush1.bf16.msra.mxu1 %v15480_v47  ;;  %11313 = vmatpush1.bf16.msra.mxu0 %v15636_v41  ;;  %v9306_v47 = vld [vmem:[%s16340_s3 + $0x440] sm:$0xff] }
 0x32a   : > { %11315 = vmatprep.subr.bf16.mxu0 %v15640_v51  ;;  %11319 = vmatprep.subr.bf16.mxu1 %v15490_v37  ;;  %v15709_v37 = vpack.c.bf16 %v9309_v34, %v9307_v32 }
 0x32c   : > { %7076 = vmatmul.mubr.f32.vlgmr.msra.gmra.mrb[40].mxu1 %v7004_v30 }
 0x32d   : > { %11317 = vmatpush1.bf16.msra.mxu0 %v15656_v28  ;;  %11321 = vmatpush1.bf16.msra.mxu1 %v15501_v61  ;;  %v15719_v61 = vpack.c.bf16 %v9308_v39, %v9306_v47 }
 0x32e   : > { %7081 = vmatprep.mubr.f32.mxu1 %v15372_v43  ;;  %11323 = vmatprep.subr.bf16.mxu1 %v15512_v13  ;;  %v7010_v13 = vld [vmem:[#allocation2 + $0x73] ss:$2 sm:$0xff] }
 0x32f   : > { %11351 = vmatprep.subr.bf16.mxu0 %v15666_v21 }
 0x330   : > { %7082 = vmatmul.mubr.f32.gmra.mrb[42].mxu1 %v7006_v4  ;;  %7205 = vmatmul.mubr.f32.vlgmr.msra.gmra.mrb[40].mxu0 %v7004_v30  ;;  %v7478_v30 = vld [vmem:[#allocation2 + $0x75] ss:$2 sm:$0xff] }
 0x331   : > { %11325 = vmatpush1.bf16.msra.mxu1 %v15524_v17  ;;  %11353 = vmatpush1.bf16.msra.mxu0 %v15676_v42  ;;  %v9317_v17 = vld [vmem:[%s16340_s3 + $0x498] sm:$0xff] }
 0x332   : > { %7087 = vmatprep.mubr.f32.mxu1 %v15372_v43  ;;  %7210 = vmatprep.mubr.f32.mxu0 %v15372_v43  ;;  %v15745_v14 = vpack.c.bf16 %v9317_v17, %v9315_v27 }
 0x333   : > { %11327 = vmatprep.subr.bf16.mxu1 %v15536_v40  ;;  %11355 = vmatprep.subr.bf16.mxu0 %v15687_v38  ;;  %v9314_v40 = vld [vmem:[%s16340_s3 + $0x480] sm:$0xff] }
 0x334   : > { %7088 = vmatmul.mubr.f32.gmra.mrb[44].mxu1 %v7008_v16  ;;  %7211 = vmatmul.mubr.f32.gmra.mrb[42].mxu0 %v7006_v4  ;;  %v11368_v50 = vpack.c.bf16 %v9316_v9, %v9314_v40 }
 0x335   : > { %11329 = vmatpush1.bf16.msra.mxu1 %v15548_v7  ;;  %11357 = vmatpush1.bf16.msra.mxu0 %v15697_v11  ;;  %v9321_v7 = vld [vmem:[%s16340_s3 + $0x4b8] sm:$0xff] }
 0x336   : > { %7093 = vmatprep.mubr.f32.mxu1 %v15372_v43  ;;  %7216 = vmatprep.mubr.f32.mxu0 %v15372_v43  ;;  %v11370_v6 = vpack.c.bf16 %v9321_v7, %v9319_v48 }
 0x337   : > { %11331 = vmatprep.subr.bf16.mxu1 %v15560_v59  ;;  %11359 = vmatprep.subr.bf16.mxu0 %v15709_v37  ;;  %v9318_v59 = vld [vmem:[%s16340_s3 + $0x4a0] sm:$0xff] }
 0x338   : > { %7094 = vmatmul.mubr.f32.gmra.mrb[46].mxu1 %v7010_v13  ;;  %7217 = vmatmul.mubr.f32.gmra.mrb[44].mxu0 %v7008_v16 }
 0x339   : > { %11333 = vmatpush1.bf16.msra.mxu1 %v15572_v10  ;;  %11361 = vmatpush1.bf16.msra.mxu0 %v15719_v61  ;;  %v9325_v10 = vld [vmem:[%s16340_s3 + $0x4d8] sm:$0xff] }
 0x33a   : > { %7222 = vmatprep.mubr.f32.mxu0 %v15372_v43  ;;  %11335 = vmatprep.subr.bf16.mxu1 %v15576_v20  ;;  %v11372_v20 = vpack.c.bf16 %v9320_v45, %v9318_v59  ;;  %v11374_v57 = vpack.c.bf16 %v9325_v10, %v9323_v23  ;;  %v9335_v59 = vld [vmem:[%s16343_s6 + $0x80] sm:$0xff]  ;;  %v9336_v45 = vld [vmem:[%s16343_s6 + $0x88] sm:$0xff]  ;;  %v9337_v10 = vld [vmem:[%s16343_s6 + $0x90] sm:$0xff] }
 0x33b   : > { %11363 = vmatprep.subr.bf16.mxu0 %v15731_v58  ;;  %7309 = vmatprep.mubr.f32.mxu1 %v15372_v43  ;;  %v11427_v23 = vpack.c.bf16 %v9336_v45, %v9335_v59  ;;  %v7600_v59 = vld [vmem:[%s16342_s5] sm:$0xff] }
 0x33c   : > { %7223 = vmatmul.mubr.f32.gmra.mrb[46].mxu0 %v7010_v13 }
 0x33d   : > { %11337 = vmatpush1.bf16.msra.mxu1 %v15595_v63  ;;  %11365 = vmatpush1.bf16.msra.mxu0 %v15741_v49  ;;  %v9329_v63 = vld [vmem:[%s16340_s3 + $0x4f8] sm:$0xff] }
 0x33e   : > { %11339 = vmatprep.subr.bf16.mxu1 %v15599_v62  ;;  %11367 = vmatprep.subr.bf16.mxu0 %v15745_v14  ;;  %v11376_v62 = vpack.c.bf16 %v9324_v33, %v9322_v60  ;;  %v11378_v0 = vpack.c.bf16 %v9329_v63, %v9327_v36  ;;  %v9339_v60 = vld [vmem:[%s16343_s6 + $0xa0] sm:$0xff]  ;;  %v9340_v33 = vld [vmem:[%s16343_s6 + $0xa8] sm:$0xff]  ;;  %v9341_v63 = vld [vmem:[%s16343_s6 + $0xb0] sm:$0xff] }
 0x33f   : > { %7438 = vmatprep.mubr.f32.mxu0 %v15372_v43  ;;  %v11433_v36 = vpack.c.bf16 %v9340_v33, %v9339_v60  ;;  %v7724_v60 = vld [vmem:[%s16343_s6 + $0x28] sm:$0xff]  ;;  %v7602_v33 = vld [vmem:[%s16342_s5 + $0x10] sm:$0xff] }
 0x341   : > { %11341 = vmatpush1.bf16.msra.mxu1 %v15616_v15  ;;  %11369 = vmatpush1.bf16.msra.mxu0 %v11368_v50  ;;  %v7238_v15 = vld [vmem:[#allocation2 + $0x44] ss:$2 sm:$0xff] }
 0x342   : > { %11343 = vmatprep.subr.bf16.mxu1 %v15620_v5  ;;  %11371 = vmatprep.subr.bf16.mxu0 %v11370_v6  ;;  %v7240_v5 = vld [vmem:[#allocation2 + $0x54] ss:$2 sm:$0xff] }
 0x345   : > { %11345 = vmatpush1.bf16.msra.mxu1 %v15636_v41  ;;  %11373 = vmatpush1.bf16.msra.mxu0 %v11372_v20 }
 0x346   : > { %11347 = vmatprep.subr.bf16.mxu1 %v15640_v51  ;;  %11375 = vmatprep.subr.bf16.mxu0 %v11374_v57  ;;  %v7474_v51 = vld [vmem:[#allocation2 + $0x55] ss:$2 sm:$0xff] }
 0x349   : > { %11349 = vmatpush1.bf16.msra.mxu1 %v15656_v28  ;;  %11377 = vmatpush1.bf16.msra.mxu0 %v11376_v62 }
 0x34a   : > { %11379 = vmatprep.subr.bf16.mxu0 %v11378_v0  ;;  %11383 = vmatprep.subr.bf16.mxu1 %v15666_v21 }
 0x34c   : > { %7310 = vmatmul.mubr.f32.vlgmr.msra.gmra.mrb[40].mxu1 %v7238_v15 }
 0x34d   : > { %11381 = vmatpush1.bf16.msra.mxu0 %v11380_v31  ;;  %11385 = vmatpush1.bf16.msra.mxu1 %v15676_v42 }
 0x34e   : > { %7315 = vmatprep.mubr.f32.mxu1 %v15372_v43  ;;  %11387 = vmatprep.subr.bf16.mxu1 %v15687_v38 }
 0x34f   : > { %11414 = vmatprep.subr.bf16.mxu0 %v12091_v44 }
 0x350   : > { %7316 = vmatmul.mubr.f32.gmra.mrb[42].mxu1 %v7240_v5  ;;  %7439 = vmatmul.mubr.f32.vlgmr.msra.gmra.mrb[40].mxu0 %v7238_v15  ;;  %v9345_v15 = vld [vmem:[%s16343_s6 + $0xd0] sm:$0xff] }
 0x351   : > { %11389 = vmatpush1.bf16.msra.mxu1 %v15697_v11  ;;  %7321 = vmatprep.mubr.f32.mxu1 %v15372_v43  ;;  %v15825_v11 = vld [vmem:[%s16341_s4] ss:$0 sm:$0xff] }
 0x352   : > { %7444 = vmatprep.mubr.f32.mxu0 %v15372_v43  ;;  %11391 = vmatprep.subr.bf16.mxu1 %v15709_v37 }
 0x354   : > { %7322 = vmatmul.mubr.f32.gmra.mrb[44].mxu1 %v7242_v53  ;;  %7445 = vmatmul.mubr.f32.gmra.mrb[42].mxu0 %v7240_v5  ;;  %v9346_v5 = vld [vmem:[%s16343_s6 + $0xd8] sm:$0xff] }
 0x355   : > { %11393 = vmatpush1.bf16.msra.mxu1 %v15719_v61  ;;  %7327 = vmatprep.mubr.f32.mxu1 %v15372_v43 }
 0x356   : > { %7450 = vmatprep.mubr.f32.mxu0 %v15372_v43  ;;  %11395 = vmatprep.subr.bf16.mxu1 %v15731_v58 }
 0x358   : > { %7328 = vmatmul.mubr.f32.gmra.mrb[46].mxu1 %v7244_v8  ;;  %7451 = vmatmul.mubr.f32.gmra.mrb[44].mxu0 %v7242_v53  ;;  %v11442_v53 = vpack.c.bf16 %v9346_v5, %v9345_v15  ;;  %v7604_v15 = vld [vmem:[%s16342_s5 + $0x20] sm:$0xff] }
 0x359   : > { %11397 = vmatpush1.bf16.msra.mxu1 %v15741_v49  ;;  %7456 = vmatprep.mubr.f32.mxu0 %v15372_v43 }
 0x35a   : > { %11399 = vmatprep.subr.bf16.mxu1 %v15745_v14  ;;  %7543 = vmatprep.mubr.f32.mxu1 %v15372_v43 }
 0x35c   : > { %7457 = vmatmul.mubr.f32.gmra.mrb[46].mxu0 %v7244_v8  ;;  %v9347_v8 = vld [vmem:[%s16343_s6 + $0xe0] sm:$0xff] }
 0x35d   : > { %11401 = vmatpush1.bf16.msra.mxu1 %v11368_v50  ;;  %9554 = vmatprep.mubr.msk.f32.mxu0 %vm12092_vm1, %v15372_v43 }
 0x35e   : > { %11403 = vmatprep.subr.bf16.mxu1 %v11370_v6 }
 0x361   : > { %11405 = vmatpush1.bf16.msra.mxu1 %v11372_v20  ;;  %v9338_v20 = vld [vmem:[%s16343_s6 + $0x98] sm:$0xff] }
 0x362   : > { %11407 = vmatprep.subr.bf16.mxu1 %v11374_v57  ;;  %v11430_v57 = vpack.c.bf16 %v9338_v20, %v9337_v10  ;;  %v7601_v10 = vld [vmem:[%s16342_s5 + $0x8] sm:$0xff] }
 0x365   : > { %11409 = vmatpush1.bf16.msra.mxu1 %v11376_v62  ;;  %v9342_v62 = vld [vmem:[%s16343_s6 + $0xb8] sm:$0xff] }
 0x366   : > { %11411 = vmatprep.subr.bf16.mxu1 %v11378_v0  ;;  %v11436_v0 = vpack.c.bf16 %v9342_v62, %v9341_v63  ;;  %v7725_v63 = vld [vmem:[%s16343_s6 + $0x30] sm:$0xff]  ;;  %v7726_v62 = vld [vmem:[%s16343_s6 + $0x38] sm:$0xff] }
 0x369   : > { %11413 = vmatpush1.bf16.msra.mxu1 %v11380_v31  ;;  %v11439_v31 = vpack.c.bf16 %v9344_v12, %v9343_v52  ;;  %v11460_v52 = vpack.c.bf16 %v7726_v62, %v7725_v63  ;;  %v7727_v12 = vld [vmem:[%s16343_s6 + $0x40] sm:$0xff]  ;;  %v9361_v63 = vld [vmem:[%s16343_s6 + $0x150] sm:$0xff] }
 0x36a   : > { %11426 = vmatprep.subr.bf16.mxu1 %v12091_v44 }
 0x36c   : > { %7544 = vmatmul.mubr.f32.vlgmr.msra.gmra.mrb[40].mxu1 %v7472_v56  ;;  %v9348_v56 = vld [vmem:[%s16343_s6 + $0xe8] sm:$0xff] }
 0x36d   : > { %7549 = vmatprep.mubr.f32.mxu1 %v15372_v43  ;;  %11428 = vmatpush3.bf16.msra.mxu1 %v11427_v23  ;;  %v7722_v23 = vld [vmem:[%s16343_s6 + $0x18] sm:$0xff] }
 0x36e   : > { %11429 = vmatprep.subr.bf16.mxu1 %v12091_v44 }
 0x36f   : > { %v6264_v41 = vpop.f32.mrb[32].mxu0 }
 0x370   : > { %v6266_v22 = vpop.f32.mrb[33].mxu0  ;;  %7550 = vmatmul.mubr.f32.gmra.mrb[42].mxu1 %v7474_v51 }
 0x371   : > { %v6400_v26 = vmax.f32 %v6264_v41, %v6266_v22  ;;  %7555 = vmatprep.mubr.f32.mxu1 %v15372_v43  ;;  %11431 = vmatpush3.bf16.msra.mxu1 %v11430_v57  ;;  %v11445_v41 = vpack.c.bf16 %v9348_v56, %v9347_v8  ;;  %v7723_v57 = vld [vmem:[%s16343_s6 + $0x20] sm:$0xff]  ;;  %v7730_v8 = vld [vmem:[%s16343_s6 + $0x58] sm:$0xff] }
 0x372   : > { %11432 = vmatprep.subr.bf16.mxu1 %v12091_v44 }
 0x373   : > { %v6270_v25 = vpop.f32.mrb[34].mxu0 }
 0x374   : > { %v6272_v28 = vpop.f32.mrb[35].mxu0  ;;  %7556 = vmatmul.mubr.f32.gmra.mrb[44].mxu1 %v7476_v2 }
 0x375   : > { %v6401_v19 = vmax.f32 %v6270_v25, %v6272_v28  ;;  %7561 = vmatprep.mubr.f32.mxu1 %v15372_v43  ;;  %11434 = vmatpush3.bf16.msra.mxu1 %v11433_v36  ;;  %v11457_v36 = vpack.c.bf16 %v7724_v60, %v7723_v57  ;;  %v9378_v57 = vld [vmem:[%s16343_s6 + $0x1d8] sm:$0xff] }
 0x376   : > { %11435 = vmatprep.subr.bf16.mxu1 %v12091_v44 }
 0x377   : > { %v6276_v54 = vpop.f32.mrb[36].mxu0 }
 0x378   : > { %v6278_v21 = vpop.f32.mrb[37].mxu0  ;;  %7562 = vmatmul.mubr.f32.gmra.mrb[46].mxu1 %v7478_v30 }
 0x379   : > { %v6402_v18 = vmax.f32 %v6276_v54, %v6278_v21  ;;  %9601 = vmatprep.mubr.msk.f32.mxu1 %vm12092_vm1, %v15372_v43  ;;  %11437 = vmatpush3.bf16.msra.mxu1 %v11436_v0  ;;  %v7603_v0 = vld [vmem:[%s16342_s5 + $0x18] sm:$0xff] }
 0x37a   : > { %11438 = vmatprep.subr.bf16.mxu1 %v12091_v44 }
 0x37b   : > { %v6282_v29 = vpop.f32.mrb[38].mxu0 }
 0x37c   : > { %v6284_v42 = vpop.f32.mrb[39].mxu0 }
 0x37d   : > { %v6403_v46 = vmax.f32 %v6282_v29, %v6284_v42  ;;  %11440 = vmatpush3.bf16.msra.mxu1 %v11439_v31  ;;  %v7728_v31 = vld [vmem:[%s16343_s6 + $0x48] sm:$0xff] }
 0x37e   : > { %11441 = vmatprep.subr.bf16.mxu1 %v12091_v44  ;;  %v11463_v5 = vpack.c.bf16 %v7728_v31, %v7727_v12  ;;  %v9380_v12 = vld [vmem:[%s16343_s6 + $0x1e8] sm:$0xff] }
 0x381   : > { %11443 = vmatpush3.bf16.msra.mxu1 %v11442_v53  ;;  %v7729_v53 = vld [vmem:[%s16343_s6 + $0x50] sm:$0xff] }
 0x382   : > { %11444 = vmatprep.subr.bf16.mxu1 %v12091_v44  ;;  %v11466_v56 = vpack.c.bf16 %v7730_v8, %v7729_v53  ;;  %v9364_v53 = vld [vmem:[%s16343_s6 + $0x168] sm:$0xff]  ;;  %v9381_v8 = vld [vmem:[%s16343_s6 + $0x1f0] sm:$0xff] }
 0x385   : > { %11446 = vmatpush3.bf16.msra.mxu1 %v11445_v41  ;;  %v7731_v41 = vld [vmem:[%s16343_s6 + $0x60] sm:$0xff] }
 0x386   : > { %11447 = vmatprep.subr.bf16.mxu1 %v12091_v44 }
 0x39f   : > { %v6369_v3 = vpop.f32.mrb[32].mxu1 }
 0x3a0   : > { %v6371_v4 = vpop.f32.mrb[33].mxu1 }
 0x3a1   : > { %v6404_v38 = vmax.f32 %v6369_v3, %v6371_v4 }
 0x3a3   : > { %v6408_v32 = vmax.f32 %v6400_v26, %v6404_v38  ;;  %v6375_v34 = vpop.f32.mrb[34].mxu1 }
 0x3a4   : > { %v6377_v47 = vpop.f32.mrb[35].mxu1 }
 0x3a5   : > { %v6405_v39 = vmax.f32 %v6375_v34, %v6377_v47  ;;  %v6418_v16 = vadd.f32 %v15825_v11, %v6408_v32 }
 0x3a7   : > { %v6409_v37 = vmax.f32 %v6401_v19, %v6405_v39  ;;  %v6381_v1 = vpop.f32.mrb[36].mxu1  ;;  %v6422_v24 = vmax.f32 %v6418_v16, 0.0 }
 0x3a8   : > { %v6383_v35 = vpop.f32.mrb[37].mxu1 }
 0x3a9   : > { %v6419_v61 = vadd.f32 %v15825_v11, %v6409_v37  ;;  %v6406_v55 = vmax.f32 %v6381_v1, %v6383_v35 }
 0x3ab   : > { %v6423_v13 = vmax.f32 %v6419_v61, 0.0  ;;  %v6410_v58 = vmax.f32 %v6402_v18, %v6406_v55  ;;  %v6387_v27 = vpop.f32.mrb[38].mxu1 }
 0x3ac   : > { %v6389_v17 = vpop.f32.mrb[39].mxu1 }
 0x3ad   : > { %v11415_v49 = vpack.c.bf16 %v6423_v13, %v6422_v24  ;;  %v6407_v14 = vmax.f32 %v6387_v27, %v6389_v17  ;;  %v6420_v40 = vadd.f32 %v15825_v11, %v6410_v58 }
 0x3af   : > { %v6411_v9 = vmax.f32 %v6403_v46, %v6407_v14  ;;  %11416 = vmatpush3.bf16.msra.mxu0 %v11415_v49  ;;  %v6424_v7 = vmax.f32 %v6420_v40, 0.0 }
 0x3b0   : > { %11417 = vmatprep.subr.bf16.mxu0 %v12091_v44 }
 0x3b1   : > { %v6421_v48 = vadd.f32 %v15825_v11, %v6411_v9 }
 0x3b3   : > { %v6425_v50 = vmax.f32 %v6421_v48, 0.0 }
 0x3b5   : > { %v11418_v6 = vpack.c.bf16 %v6425_v50, %v6424_v7  ;;  %v7719_v7 = vld [vmem:[%s16343_s6] sm:$0xff]  ;;  %v7720_v50 = vld [vmem:[%s16343_s6 + $0x8] sm:$0xff] }
 0x3b6   : > { %v11451_v45 = vpack.c.bf16 %v7720_v50, %v7719_v7  ;;  %v9375_v7 = vld [vmem:[%s16343_s6 + $0x1c0] sm:$0xff]  ;;  %v9376_v50 = vld [vmem:[%s16343_s6 + $0x1c8] sm:$0xff] }
 0x3b7   : > { %11419 = vmatpush3.bf16.msra.mxu0 %v11418_v6 }
 0x3b8   : > { %11420 = vmatprep.subr.bf16.mxu0 %v12091_v44 }
 0x423   : > { %v7440_v51 = vpop.f32.mrb[40].mxu0 }
 0x424   : > { %v7442_v22 = vpop.f32.mrb[41].mxu0 }
 0x425   : > { %v7576_v26 = vmax.f32 %v7440_v51, %v7442_v22  ;;  %v7732_v51 = vld [vmem:[%s16343_s6 + $0x68] sm:$0xff] }
 0x426   : > { %v11469_v22 = vpack.c.bf16 %v7732_v51, %v7731_v41 }
 0x427   : > { %v7446_v25 = vpop.f32.mrb[42].mxu0 }
 0x428   : > { %v7448_v2 = vpop.f32.mrb[43].mxu0 }
 0x429   : > { %v7577_v28 = vmax.f32 %v7446_v25, %v7448_v2  ;;  %v7734_v25 = vld [vmem:[%s16343_s6 + $0x78] sm:$0xff] }
 0x42b   : > { %v7452_v19 = vpop.f32.mrb[44].mxu0 }
 0x42c   : > { %v7454_v54 = vpop.f32.mrb[45].mxu0 }
 0x42d   : > { %v7578_v30 = vmax.f32 %v7452_v19, %v7454_v54  ;;  %v9350_v19 = vld [vmem:[%s16343_s6 + $0xf8] sm:$0xff] }
 0x42f   : > { %v7458_v21 = vpop.f32.mrb[46].mxu0 }
 0x430   : > { %v7460_v18 = vpop.f32.mrb[47].mxu0 }
 0x431   : > { %v7579_v29 = vmax.f32 %v7458_v21, %v7460_v18  ;;  %v9368_v21 = vld [vmem:[%s16343_s6 + $0x188] sm:$0xff]  ;;  %v9351_v18 = vld [vmem:[%s16343_s6 + $0x100] sm:$0xff] }
 0x43f   : > { %v7545_v42 = vpop.f32.mrb[40].mxu1 }
 0x440   : > { %v7547_v46 = vpop.f32.mrb[41].mxu1 }
 0x441   : > { %v7580_v3 = vmax.f32 %v7545_v42, %v7547_v46  ;;  %v9352_v42 = vld [vmem:[%s16343_s6 + $0x108] sm:$0xff]  ;;  %v9369_v46 = vld [vmem:[%s16343_s6 + $0x190] sm:$0xff] }
 0x443   : > { %v7584_v4 = vmax.f32 %v7576_v26, %v7580_v3  ;;  %v7551_v38 = vpop.f32.mrb[42].mxu1  ;;  %v7733_v26 = vld [vmem:[%s16343_s6 + $0x70] sm:$0xff]  ;;  %v9370_v3 = vld [vmem:[%s16343_s6 + $0x198] sm:$0xff] }
 0x444   : > { %v7553_v32 = vpop.f32.mrb[43].mxu1  ;;  %v11472_v2 = vpack.c.bf16 %v7734_v25, %v7733_v26  ;;  %v9366_v26 = vld [vmem:[%s16343_s6 + $0x178] sm:$0xff] }
 0x445   : > { %v7581_v34 = vmax.f32 %v7551_v38, %v7553_v32  ;;  %v7588_v47 = vadd.f32 %v15825_v11, %v7584_v4  ;;  %v11475_v32 = vpack.c.bf16 %v9352_v42, %v9351_v18  ;;  %v9387_v18 = vld [vmem:[%s16343_s6 + $0x220] sm:$0xff] }
 0x447   : > { %v7585_v39 = vmax.f32 %v7577_v28, %v7581_v34  ;;  %v7557_v16 = vpop.f32.mrb[44].mxu1  ;;  %v7592_v61 = vmax.f32 %v7588_v47, 0.0  ;;  %v9349_v28 = vld [vmem:[%s16343_s6 + $0xf0] sm:$0xff]  ;;  %v11502_v47 = vpack.c.bf16 %v9370_v3, %v9369_v46  ;;  %v9390_v3 = vld [vmem:[%s16343_s6 + $0x238] sm:$0xff] }
 0x448   : > { %v7559_v37 = vpop.f32.mrb[45].mxu1  ;;  %v11448_v54 = vpack.c.bf16 %v9350_v19, %v9349_v28  ;;  %v9353_v34 = vld [vmem:[%s16343_s6 + $0x110] sm:$0xff]  ;;  %v9384_v28 = vld [vmem:[%s16343_s6 + $0x208] sm:$0xff] }
 0x449   : > { %v7589_v1 = vadd.f32 %v15825_v11, %v7585_v39  ;;  %v7582_v35 = vmax.f32 %v7557_v16, %v7559_v37  ;;  %v9354_v39 = vld [vmem:[%s16343_s6 + $0x118] sm:$0xff]  ;;  %v9371_v16 = vld [vmem:[%s16343_s6 + $0x1a0] sm:$0xff]  ;;  %v9372_v37 = vld [vmem:[%s16343_s6 + $0x1a8] sm:$0xff] }
 0x44a   : > { %11449 = vmatpush3.bf16.msra.mxu1 %v11448_v54  ;;  %v9385_v54 = vld [vmem:[%s16343_s6 + $0x210] sm:$0xff] }
 0x44b   : > { %v7593_v55 = vmax.f32 %v7589_v1, 0.0  ;;  %v7586_v24 = vmax.f32 %v7578_v30, %v7582_v35  ;;  %v7563_v13 = vpop.f32.mrb[46].mxu1  ;;  %11474 = vmatprep.subr.bf16.mxu1 %v12091_v44  ;;  %v9367_v30 = vld [vmem:[%s16343_s6 + $0x180] sm:$0xff]  ;;  %v9389_v46 = vld [vmem:[%s16343_s6 + $0x230] sm:$0xff] }
 0x44c   : > { %v7565_v58 = vpop.f32.mrb[47].mxu1 }
 0x44d   : > { %v11421_v27 = vpack.c.bf16 %v7593_v55, %v7592_v61  ;;  %v7583_v17 = vmax.f32 %v7563_v13, %v7565_v58  ;;  %v7590_v49 = vadd.f32 %v15825_v11, %v7586_v24  ;;  %v11478_v61 = vpack.c.bf16 %v9354_v39, %v9353_v34  ;;  %v9356_v24 = vld [vmem:[%s16343_s6 + $0x128] sm:$0xff]  ;;  %v9373_v13 = vld [vmem:[%s16343_s6 + $0x1b0] sm:$0xff]  ;;  %v9374_v58 = vld [vmem:[%s16343_s6 + $0x1b8] sm:$0xff] }
 0x44e   : > { %v11505_v55 = vpack.c.bf16 %v9372_v37, %v9371_v16  ;;  %v9394_v39 = vld [vmem:[%s16343_s6 + $0x258] sm:$0xff]  ;;  %v9395_v37 = vld [vmem:[%s16343_s6 + $0x260] sm:$0xff] }
 0x44f   : > { %v7587_v14 = vmax.f32 %v7579_v29, %v7583_v17  ;;  %11422 = vmatpush3.bf16.msra.mxu0 %v11421_v27  ;;  %v7594_v9 = vmax.f32 %v7590_v49, 0.0  ;;  %v11499_v29 = vpack.c.bf16 %v9368_v21, %v9367_v30  ;;  %v16034_v17 = vld [vmem:[#allocation2 + $0x80] sm:$0xff]  ;;  %v9386_v30 = vld [vmem:[%s16343_s6 + $0x218] sm:$0xff] }
 0x450   : > { %11423 = vmatprep.subr.bf16.mxu0 %v12091_v44  ;;  %v11526_v21 = vpack.c.bf16 %v9386_v30, %v9385_v54  ;;  %v8271_v54 = vld [vmem:[%s16347_s10 + $0x60] sm:$0xff]  ;;  %v8272_v30 = vld [vmem:[%s16347_s10 + $0x68] sm:$0xff] }
 0x451   : > { %v7591_v40 = vadd.f32 %v15825_v11, %v7587_v14  ;;  %v7721_v11 = vld [vmem:[%s16343_s6 + $0x10] sm:$0xff] }
 0x452   : > { %v11454_v20 = vpack.c.bf16 %v7722_v23, %v7721_v11  ;;  %v9359_v11 = vld [vmem:[%s16343_s6 + $0x140] sm:$0xff]  ;;  %v11511_v23 = vpack.c.bf16 %v9376_v50, %v9375_v7  ;;  %v8172_v7 = vld [vmem:[%s16345_s8 + $0x38] sm:$0xff] }
 0x453   : > { %v7595_v48 = vmax.f32 %v7591_v40, 0.0  ;;  %v9357_v40 = vld [vmem:[%s16343_s6 + $0x130] sm:$0xff] }
 0x455   : > { %v11424_v6 = vpack.c.bf16 %v7595_v48, %v7594_v9  ;;  %v11508_v9 = vpack.c.bf16 %v9374_v58, %v9373_v13  ;;  %v9358_v48 = vld [vmem:[%s16343_s6 + $0x138] sm:$0xff]  ;;  %v8166_v13 = vld [vmem:[%s16345_s8 + $0x8] sm:$0xff]  ;;  %v8167_v58 = vld [vmem:[%s16345_s8 + $0x10] sm:$0xff] }
 0x457   : > { %11425 = vmatpush3.bf16.msra.mxu0 %v11424_v6 }
 0x458   : > { %11450 = vmatprep.subr.bf16.mxu0 %v12091_v44 }
 0x45a   : > { %9555 = vmatmul.mubr.msk.f32.vlgmr.msra.gmra.mrb[48].mxu0 %vm7613_vm2, %v7600_v59 }
 0x45b   : > { %9557 = vmatprep.mubr.msk.f32.mxu0 %vm12092_vm1, %v15372_v43  ;;  %11452 = vmatpush3.bf16.msra.mxu0 %v11451_v45  ;;  %v11484_v45 = vpack.c.bf16 %v9358_v48, %v9357_v40  ;;  %v8170_v40 = vld [vmem:[%s16345_s8 + $0x28] sm:$0xff]  ;;  %v8171_v48 = vld [vmem:[%s16345_s8 + $0x30] sm:$0xff] }
 0x45c   : > { %11453 = vmatprep.subr.bf16.mxu0 %v12091_v44  ;;  %v11556_v50 = vpack.c.bf16 %v8172_v7, %v8171_v48 }
 0x45e   : > { %9558 = vmatmul.mubr.msk.f32.gmra.mrb[50].mxu0 %vm7613_vm2, %v7601_v10  ;;  %v9360_v10 = vld [vmem:[%s16343_s6 + $0x148] sm:$0xff] }
 0x45f   : > { %9560 = vmatprep.mubr.msk.f32.mxu0 %vm12092_vm1, %v15372_v43  ;;  %11455 = vmatpush3.bf16.msra.mxu0 %v11454_v20  ;;  %v9377_v20 = vld [vmem:[%s16343_s6 + $0x1d0] sm:$0xff] }
 0x460   : > { %11456 = vmatprep.subr.bf16.mxu0 %v12091_v44  ;;  %v11514_v62 = vpack.c.bf16 %v9378_v57, %v9377_v20  ;;  %v8177_v20 = vld [vmem:[%s16345_s8 + $0x60] sm:$0xff]  ;;  %v8178_v57 = vld [vmem:[%s16345_s8 + $0x68] sm:$0xff] }
 0x462   : > { %9561 = vmatmul.mubr.msk.f32.gmra.mrb[52].mxu0 %vm7613_vm2, %v7602_v33 }
 0x463   : > { %9563 = vmatprep.mubr.msk.f32.mxu0 %vm12092_vm1, %v15372_v43  ;;  %11458 = vmatpush3.bf16.msra.mxu0 %v11457_v36  ;;  %v11487_v36 = vpack.c.bf16 %v9360_v10, %v9359_v11  ;;  %v8175_v11 = vld [vmem:[%s16345_s8 + $0x50] sm:$0xff] }
 0x464   : > { %11459 = vmatprep.subr.bf16.mxu0 %v12091_v44 }
 0x466   : > { %9564 = vmatmul.mubr.msk.f32.gmra.mrb[54].mxu0 %vm7613_vm2, %v7603_v0  ;;  %v9362_v0 = vld [vmem:[%s16343_s6 + $0x158] sm:$0xff] }
 0x467   : > { %9566 = vmatprep.mubr.msk.f32.mxu0 %vm12092_vm1, %v15372_v43  ;;  %11461 = vmatpush3.bf16.msra.mxu0 %v11460_v52  ;;  %v9379_v52 = vld [vmem:[%s16343_s6 + $0x1e0] sm:$0xff]  ;;  %v11490_v31 = vpack.c.bf16 %v9362_v0, %v9361_v63  ;;  %v8260_v0 = vld [vmem:[%s16347_s10 + $0x8] sm:$0xff] }
 0x468   : > { %11462 = vmatprep.subr.bf16.mxu0 %v12091_v44 }
 0x46a   : > { %9567 = vmatmul.mubr.msk.f32.gmra.mrb[56].mxu0 %vm7613_vm2, %v7604_v15  ;;  %v9363_v15 = vld [vmem:[%s16343_s6 + $0x160] sm:$0xff] }
 0x46b   : > { %11464 = vmatpush3.bf16.msra.mxu0 %v11463_v5  ;;  %9636 = vmatprep.mubr.msk.f32.mxu0 %vm12092_vm1, %v15372_v43  ;;  %v11517_v5 = vpack.c.bf16 %v9380_v12, %v9379_v52  ;;  %v11493_v41 = vpack.c.bf16 %v9364_v53, %v9363_v15  ;;  %v8261_v52 = vld [vmem:[%s16347_s10 + $0x10] sm:$0xff]  ;;  %v8264_v53 = vld [vmem:[%s16347_s10 + $0x28] sm:$0xff] }
 0x46c   : > { %11465 = vmatprep.subr.bf16.mxu0 %v12091_v44 }
 0x46f   : > { %11467 = vmatpush3.bf16.msra.mxu0 %v11466_v56  ;;  %v9382_v56 = vld [vmem:[%s16343_s6 + $0x1f8] sm:$0xff] }
 0x470   : > { %11468 = vmatprep.subr.bf16.mxu0 %v12091_v44  ;;  %v11520_v51 = vpack.c.bf16 %v9382_v56, %v9381_v8  ;;  %v8265_v56 = vld [vmem:[%s16347_s10 + $0x30] sm:$0xff] }
 0x473   : > { %11470 = vmatpush3.bf16.msra.mxu0 %v11469_v22  ;;  %v9365_v22 = vld [vmem:[%s16343_s6 + $0x170] sm:$0xff] }
 0x474   : > { %11471 = vmatprep.subr.bf16.mxu0 %v12091_v44  ;;  %v11496_v25 = vpack.c.bf16 %v9366_v26, %v9365_v22  ;;  %v8267_v22 = vld [vmem:[%s16347_s10 + $0x40] sm:$0xff]  ;;  %v8268_v26 = vld [vmem:[%s16347_s10 + $0x48] sm:$0xff] }
 0x477   : > { %11473 = vmatpush3.bf16.msra.mxu0 %v11472_v2  ;;  %v9383_v2 = vld [vmem:[%s16343_s6 + $0x200] sm:$0xff] }
 0x478   : > { %11498 = vmatprep.subr.bf16.mxu0 %v12091_v44  ;;  %v11523_v19 = vpack.c.bf16 %v9384_v28, %v9383_v2  ;;  %v8269_v2 = vld [vmem:[%s16347_s10 + $0x50] sm:$0xff]  ;;  %v8270_v28 = vld [vmem:[%s16347_s10 + $0x58] sm:$0xff] }
 0x52d   : > { %v7695_v4 = vpop.f32.mrb[48].mxu0 }
 0x52e   : > { %v9556_v38 = vpop.f32.mrb[49].mxu0  ;;  %9637 = vmatmul.mubr.f32.vlgmr.msra.gmra.mrb[58].mxu0 %v7695_v4  ;;  %v11532_v4 = vpack.c.bf16 %v9390_v3, %v9389_v46 }
 0x52f   : > { %11500 = vmatpush3.bf16.msra.mxu0 %v11499_v29  ;;  %9706 = vmatprep.mubr.msk.f32.mxu0 %vm12092_vm1, %v15372_v43  ;;  %v9355_v43 = vld [vmem:[%s16343_s6 + $0x120] sm:$0xff]  ;;  %v9388_v29 = vld [vmem:[%s16343_s6 + $0x228] sm:$0xff] }
 0x530   : > { %11501 = vmatprep.subr.bf16.mxu0 %v12091_v44  ;;  %v11481_v14 = vpack.c.bf16 %v9356_v24, %v9355_v43  ;;  %v11529_v42 = vpack.c.bf16 %v9388_v29, %v9387_v18  ;;  %v9391_v38 = vld [vmem:[%s16343_s6 + $0x240] sm:$0xff]  ;;  %v9398_v43 = vld [vmem:[%s16343_s6 + $0x278] sm:$0xff] }
 0x531   : > { %v7700_v1 = vpop.f32.mrb[50].mxu0  ;;  %v8165_v24 = vld [vmem:[%s16345_s8] sm:$0xff] }
 0x532   : > { %v9559_v35 = vpop.f32.mrb[51].mxu0  ;;  %9602 = vmatmul.mubr.f32.vlgmr.msra.gmra.mrb[48].mxu1 %v7700_v1  ;;  %v9396_v1 = vld [vmem:[%s16343_s6 + $0x268] sm:$0xff] }
 0x533   : > { %11476 = vmatpush3.bf16.msra.mxu1 %v11475_v32  ;;  %11503 = vmatpush3.bf16.msra.mxu0 %v11502_v47  ;;  %v9392_v32 = vld [vmem:[%s16343_s6 + $0x248] sm:$0xff]  ;;  %v9393_v47 = vld [vmem:[%s16343_s6 + $0x250] sm:$0xff]  ;;  %v11541_v35 = vpack.c.bf16 %v9396_v1, %v9395_v37  ;;  %v9399_v37 = vld [vmem:[%s16344_s7] ss:$0 sm:$0xff] }
 0x534   : > { %11477 = vmatprep.subr.bf16.mxu1 %v12091_v44  ;;  %11504 = vmatprep.subr.bf16.mxu0 %v12091_v44  ;;  %v11535_v34 = vpack.c.bf16 %v9392_v32, %v9391_v38  ;;  %v11538_v16 = vpack.c.bf16 %v9394_v39, %v9393_v47 }
 0x535   : > { %v16032_v27 = vpop.f32.mrb[52].mxu0  ;;  %9671 = vmatprep.mubr.msk.f32.mxu1 %vm12092_vm1, %v16034_v17 }
 0x536   : > { %v9562_v49 = vpop.f32.mrb[53].mxu0 }
 0x537   : > { %11479 = vmatpush3.bf16.msra.mxu1 %v11478_v61  ;;  %11506 = vmatpush3.bf16.msra.mxu0 %v11505_v55  ;;  %v9397_v61 = vld [vmem:[%s16343_s6 + $0x270] sm:$0xff]  ;;  %v8168_v49 = vld [vmem:[%s16345_s8 + $0x18] sm:$0xff] }
 0x538   : > { %11480 = vmatprep.subr.bf16.mxu1 %v12091_v44  ;;  %11507 = vmatprep.subr.bf16.mxu0 %v12091_v44  ;;  %v11544_v55 = vpack.c.bf16 %v9398_v43, %v9397_v61  ;;  %v8273_v43 = vld [vmem:[%s16347_s10 + $0x70] sm:$0xff] }
 0x539   : > { %v7710_v6 = vpop.f32.mrb[54].mxu0 }
 0x53a   : > { %v9565_v59 = vpop.f32.mrb[55].mxu0 }
 0x53b   : > { %11482 = vmatpush3.bf16.msra.mxu1 %v11481_v14  ;;  %11509 = vmatpush3.bf16.msra.mxu0 %v11508_v9  ;;  %v11550_v14 = vpack.c.bf16 %v8168_v49, %v8167_v58  ;;  %v8174_v59 = vld [vmem:[%s16345_s8 + $0x48] sm:$0xff] }
 0x53c   : > { %11483 = vmatprep.subr.bf16.mxu1 %v12091_v44  ;;  %11510 = vmatprep.subr.bf16.mxu0 %v12091_v44 }
 0x53d   : > { %v16066_v60 = vpop.f32.mrb[56].mxu0 }
 0x53e   : > { %v9568_v33 = vpop.f32.mrb[57].mxu0 }
 0x53f   : > { %11485 = vmatpush3.bf16.msra.mxu1 %v11484_v45  ;;  %11512 = vmatpush3.bf16.msra.mxu0 %v11511_v23  ;;  %v8176_v23 = vld [vmem:[%s16345_s8 + $0x58] sm:$0xff]  ;;  %v8179_v33 = vld [vmem:[%s16345_s8 + $0x70] sm:$0xff] }
 0x540   : > { %11486 = vmatprep.subr.bf16.mxu1 %v12091_v44  ;;  %11513 = vmatprep.subr.bf16.mxu0 %v12091_v44  ;;  %v11562_v10 = vpack.c.bf16 %v8176_v23, %v8175_v11 }
 0x543   : > { %11488 = vmatpush3.bf16.msra.mxu1 %v11487_v36  ;;  %11515 = vmatpush3.bf16.msra.mxu0 %v11514_v62  ;;  %v8180_v36 = vld [vmem:[%s16345_s8 + $0x78] sm:$0xff]  ;;  %v8259_v62 = vld [vmem:[%s16347_s10] sm:$0xff] }
 0x544   : > { %11489 = vmatprep.subr.bf16.mxu1 %v12091_v44  ;;  %11516 = vmatprep.subr.bf16.mxu0 %v12091_v44  ;;  %v11568_v63 = vpack.c.bf16 %v8180_v36, %v8179_v33  ;;  %v11571_v12 = vpack.c.bf16 %v8260_v0, %v8259_v62 }
 0x547   : > { %11491 = vmatpush3.bf16.msra.mxu1 %v11490_v31  ;;  %11518 = vmatpush3.bf16.msra.mxu0 %v11517_v5  ;;  %v8262_v31 = vld [vmem:[%s16347_s10 + $0x18] sm:$0xff]  ;;  %v8263_v5 = vld [vmem:[%s16347_s10 + $0x20] sm:$0xff] }
 0x548   : > { %11492 = vmatprep.subr.bf16.mxu1 %v12091_v44  ;;  %11519 = vmatprep.subr.bf16.mxu0 %v12091_v44  ;;  %v11574_v15 = vpack.c.bf16 %v8262_v31, %v8261_v52  ;;  %v11577_v8 = vpack.c.bf16 %v8264_v53, %v8263_v5 }
 0x54b   : > { %11494 = vmatpush3.bf16.msra.mxu1 %v11493_v41  ;;  %11521 = vmatpush3.bf16.msra.mxu0 %v11520_v51  ;;  %v8266_v41 = vld [vmem:[%s16347_s10 + $0x38] sm:$0xff] }
 0x54c   : > { %11495 = vmatprep.subr.bf16.mxu1 %v12091_v44  ;;  %11546 = vmatprep.subr.bf16.mxu0 %v12091_v44  ;;  %v11580_v51 = vpack.c.bf16 %v8266_v41, %v8265_v56 }
 0x54e   : > { %9707 = vmatmul.mubr.f32.vlgmr.msra.gmra.mrb[60].mxu0 %v7710_v6  ;;  %v8173_v6 = vld [vmem:[%s16345_s8 + $0x40] sm:$0xff] }
 0x54f   : > { %11497 = vmatpush3.bf16.msra.mxu1 %v11496_v25  ;;  %9776 = vmatprep.mubr.msk.f32.mxu0 %vm12092_vm1, %v16034_v17  ;;  %v11559_v45 = vpack.c.bf16 %v8174_v59, %v8173_v6  ;;  %v11583_v25 = vpack.c.bf16 %v8268_v26, %v8267_v22 }
 0x550   : > { %11522 = vmatprep.subr.bf16.mxu1 %v12091_v44 }
 0x552   : > { %9672 = vmatmul.mubr.f32.vlgmr.msra.gmra.mrb[50].mxu1 %v16032_v27  ;;  %v11547_v27 = vpack.c.bf16 %v8166_v13, %v8165_v24  ;;  %v9400_v13 = vld [vmem:[%s16346_s9] ss:$0 sm:$0xff] }
 0x553   : > { %11524 = vmatpush3.bf16.msra.mxu1 %v11523_v19  ;;  %9741 = vmatprep.mubr.msk.f32.mxu1 %vm12092_vm1, %v16034_v17  ;;  %v11586_v19 = vpack.c.bf16 %v8270_v28, %v8269_v2 }
 0x554   : > { %11525 = vmatprep.subr.bf16.mxu1 %v12091_v44  ;;  %11548 = vmatpush3.bf16.msra.mxu0 %v11547_v27 }
 0x555   : > { %11549 = vmatprep.subr.bf16.mxu0 %v12091_v44 }
 0x557   : > { %11527 = vmatpush3.bf16.msra.mxu1 %v11526_v21  ;;  %v11589_v21 = vpack.c.bf16 %v8272_v30, %v8271_v54 }
 0x558   : > { %11528 = vmatprep.subr.bf16.mxu1 %v12091_v44  ;;  %11551 = vmatpush3.bf16.msra.mxu0 %v11550_v14 }
 0x559   : > { %11552 = vmatprep.subr.bf16.mxu0 %v12091_v44 }
 0x55b   : > { %11530 = vmatpush3.bf16.msra.mxu1 %v11529_v42 }
 0x55c   : > { %11531 = vmatprep.subr.bf16.mxu1 %v12091_v44 }
 0x55f   : > { %11533 = vmatpush3.bf16.msra.mxu1 %v11532_v4 }
 0x560   : > { %11534 = vmatprep.subr.bf16.mxu1 %v12091_v44 }
 0x563   : > { %11536 = vmatpush3.bf16.msra.mxu1 %v11535_v34 }
 0x564   : > { %11537 = vmatprep.subr.bf16.mxu1 %v12091_v44 }
 0x567   : > { %11539 = vmatpush3.bf16.msra.mxu1 %v11538_v16 }
 0x568   : > { %11540 = vmatprep.subr.bf16.mxu1 %v12091_v44 }
 0x56b   : > { %11542 = vmatpush3.bf16.msra.mxu1 %v11541_v35 }
 0x56c   : > { %11543 = vmatprep.subr.bf16.mxu1 %v12091_v44 }
 0x56f   : > { %11545 = vmatpush3.bf16.msra.mxu1 %v11544_v55  ;;  %v8274_v55 = vld [vmem:[%s16347_s10 + $0x78] sm:$0xff] }
 0x570   : > { %11570 = vmatprep.subr.bf16.mxu1 %v12091_v44  ;;  %v11592_v24 = vpack.c.bf16 %v8274_v55, %v8273_v43 }
 0x572   : > { %9742 = vmatmul.mubr.f32.vlgmr.msra.gmra.mrb[52].mxu1 %v16066_v60  ;;  %v11565_v60 = vpack.c.bf16 %v8178_v57, %v8177_v20 }
 0x573   : > { %9811 = vmatprep.mubr.msk.f32.mxu1 %vm12092_vm1, %v16034_v17  ;;  %v8169_v17 = vld [vmem:[%s16345_s8 + $0x20] sm:$0xff]  ;;  %11572 = vmatpush3.bf16.msra.mxu1 %v11571_v12 }
 0x574   : > { %v11553_v9 = vpack.c.bf16 %v8170_v40, %v8169_v17  ;;  %11573 = vmatprep.subr.bf16.mxu1 %v12091_v44  ;;  %v9401_v17 = vld [vmem:[%s16348_s11] ss:$0 sm:$0xff] }
 0x576   : > { %11554 = vmatpush3.bf16.msra.mxu0 %v11553_v9 }
 0x577   : > { %11555 = vmatprep.subr.bf16.mxu0 %v12091_v44  ;;  %11575 = vmatpush3.bf16.msra.mxu1 %v11574_v15 }
 0x578   : > { %11576 = vmatprep.subr.bf16.mxu1 %v12091_v44 }
 0x57a   : > { %11557 = vmatpush3.bf16.msra.mxu0 %v11556_v50 }
 0x57b   : > { %11558 = vmatprep.subr.bf16.mxu0 %v12091_v44  ;;  %11578 = vmatpush3.bf16.msra.mxu1 %v11577_v8 }
 0x57c   : > { %11579 = vmatprep.subr.bf16.mxu1 %v12091_v44 }
 0x57e   : > { %11560 = vmatpush3.bf16.msra.mxu0 %v11559_v45 }
 0x57f   : > { %11561 = vmatprep.subr.bf16.mxu0 %v12091_v44  ;;  %11581 = vmatpush3.bf16.msra.mxu1 %v11580_v51 }
 0x580   : > { %11582 = vmatprep.subr.bf16.mxu1 %v12091_v44 }
 0x582   : > { %11563 = vmatpush3.bf16.msra.mxu0 %v11562_v10 }
 0x583   : > { %11564 = vmatprep.subr.bf16.mxu0 %v12091_v44  ;;  %11584 = vmatpush3.bf16.msra.mxu1 %v11583_v25 }
 0x584   : > { %11585 = vmatprep.subr.bf16.mxu1 %v12091_v44 }
 0x586   : > { %11566 = vmatpush3.bf16.msra.mxu0 %v11565_v60 }
 0x587   : > { %11567 = vmatprep.subr.bf16.mxu0 %v12091_v44  ;;  %11587 = vmatpush3.bf16.msra.mxu1 %v11586_v19 }
 0x588   : > { %11588 = vmatprep.subr.bf16.mxu1 %v12091_v44 }
 0x58a   : > { %11569 = vmatpush3.bf16.msra.mxu0 %v11568_v63 }
 0x58b   : > { %11590 = vmatpush3.bf16.msra.mxu1 %v11589_v21 }
 0x58c   : > { %11591 = vmatprep.subr.bf16.mxu1 %v12091_v44 }
 0x58f   : > { %11593 = vmatpush3.bf16.msra.mxu1 %v11592_v24 }
 0x601   : > { %v7888_v18 = vpop.f32.mrb[58].mxu0 }
 0x602   : > { %v9638_v29 = vpop.f32.mrb[59].mxu0 }
 0x605   : > { %v7818_v42 = vpop.f32.mrb[48].mxu1 }
 0x606   : > { %v7889_v46 = vadd.f32 %v7888_v18, %v7818_v42  ;;  %v9603_v3 = vpop.f32.mrb[49].mxu1 }
 0x621   : > { %v8063_v4 = vpop.f32.mrb[60].mxu0 }
 0x622   : > { %v9708_v38 = vpop.f32.mrb[61].mxu0 }
 0x625   : > { %v7975_v32 = vpop.f32.mrb[50].mxu1 }
 0x626   : > { %v7979_v34 = vadd.f32 %v7975_v32, %v7889_v46  ;;  %v9673_v47 = vpop.f32.mrb[51].mxu1 }
 0x628   : > { %v8067_v39 = vadd.f32 %v8063_v4, %v7979_v34 }
 0x645   : > { %v8151_v16 = vpop.f32.mrb[52].mxu1 }
 0x646   : > { %v8155_v1 = vadd.f32 %v8151_v16, %v8067_v39  ;;  %v9743_v35 = vpop.f32.mrb[53].mxu1 }
 0x648   : > { %v8163_v44 = vadd.f32 %v9399_v37, %v8155_v1 }
 0x64a   : > { %v8164_v61 = vmax.f32 %v8163_v44, 0.0 }
 0x64c   : > { %9777 = vmatmul.mubr.f32.vlgmr.msra.gmra.mrb[62].mxu0 %v8164_v61 }
 0x71f   : > { %v8254_v58 = vpop.f32.mrb[62].mxu0 }
 0x720   : > { %v8255_v27 = vadd.f32 %v9400_v13, %v8254_v58  ;;  %v9778_v49 = vpop.f32.mrb[63].mxu0 }
 0x722   : > { %v8258_v14 = vmax.f32 %v8255_v27, 0.0 }
 0x724   : > { %9812 = vmatmul.mubr.f32.vlgmr.msra.gmra.mrb[54].mxu1 %v8258_v14 }
 0x7f7   : > { %v8348_v40 = vpop.f32.mrb[54].mxu1 }
 0x7f8   : > { %v8349_v9 = vadd.f32 %v9401_v17, %v8348_v40  ;;  %v9813_v48 = vpop.f32.mrb[55].mxu1 }
 0x7fa   : > { %8352 = vst [vmem:[%s407_s19] sm:$0xff] %v8349_v9 }
 0x7fb   : > { %12039 = shalt.err (!%p12036_p3)
}
 0x7fc   : > { %s12040_s17 = scalar_lea.hbm %s16295_s16, 128  ;;  %s12044_s19 = scalar_lea.hbm %s16349_s12, 256 }
 0x7fd   : > { %p12041_p4 = scmp.ne.s32.totalorder %s16295_s16, %s12040_s17  ;;  %p12045_p9 = scmp.lt.u32.totalorder %s16295_s16, %s16349_s12 }
 0x7fe   : > { %p12046_p10 = scmp.lt.u32.totalorder %s12044_s19, %s12040_s17  ;;  %p12048_p12 = scmp.lt.u32.totalorder %s12040_s17, %s16295_s16 }
 0x7ff   : > { %p12042_p7 = pnand %p12041_p4, %p12197_p5 }
 0x800   : > { %p12047_p11 = por %p12046_p10, %p12045_p9 }
 0x801   : > { %p12043_p8 = pneg %p12042_p7 }
 0x802   : > { %p12049_p13 = por %p12048_p12, %p12047_p11 }
 0x804   : > { %p12050_p0 = pnand %p12049_p13, %p12043_p8 }
 0x806   : > { %12053 = shalt.err (!%p12050_p0)
}
 0x807   : > { %11978 = dma.vmem_to_hbm [thread:$0]  (%p12197_p5), %s16297_s20, 128, %s16295_s16, %s8354_s28  }
 0x808 PF: > { %p11984_p1 = scmp.ge.s32.totalorder %s12088_s24, 2  ;;  %s8379_s30 = sand.u32 1, %s12076_s21  }
 0x809   : > { %s8380_s25 = scalar_lea.sflag [#allocation5], %s8379_s30 }
 0x80a   : > { %p11981_p2 = pnand %p11984_p1, %p12201_p6 }
 0x80c   : > { %12071 = dma.done.wait (!%p11981_p2), %s8380_s25, 128  }
 0x80d   : > { %12073 = vsyncadd (!%p11981_p2), %s8380_s25, 4294967168  ;;  %s16433_s24 = sld [smem:[#allocation8_spill]]  ;;  %s16434_s18 = sld [smem:[#allocation7_spill]] }
 0x80e   : > { %s16435_s23 = sld [smem:[#allocation9_spill]]  ;;  %s16436_s21 = smov %s12080_s22 }
 0x813   : > { %p22_p3 = scmp.ge.s32.totalorder %s16433_s24, 4   ;;  %s16437_s22 = smov %s16434_s18 }
 0x815   :  { %24 = sbr.rel (!%p22_p3) target bundleno = 3 (0x3), region = 257 }
 0x81c   :  { %8385 = vsyncpa [#allocation5], 1 }
 0x81d   :  { %8387 = vsyncpa [#allocation5 + $0x1], 1 }

</bundles_post_ra>
